<compile_context>
chip_gen: v5e
topology: v5e:2x2
jax: 0.10.0
libtpu: 0.0.40
codegen_flags: <defaults>
</compile_context>

<pallas_src>
import functools

import jax
import jax.numpy as jnp
from jax.experimental import pallas as pl
from jax.experimental.pallas import tpu as pltpu


def _leaky_relu(x, negative_slope=0.2):
    return jnp.where(x >= 0, x, negative_slope * x)


def generator_kernel(x_ref, w1_ref, b1_ref,
                     w2_hbm, b2_ref,
                     w3_hbm, b3_ref,
                     w4_hbm, b4_ref,
                     o_ref,
                     w2_buf, w3_buf, w4_buf, dma_sems):
    """Fused 4-layer MLP forward with manual weight streaming.

    Small tensors (x, w1, biases) arrive in VMEM via BlockSpec auto-DMA.
    The large weights stay in HBM (memory_space=pl.ANY) and are copied into
    VMEM scratch asynchronously; all copies start immediately so fc1-fc3
    compute hides under the weight DMA.
    """
    cp_w2 = pltpu.make_async_copy(w2_hbm, w2_buf, dma_sems.at[0])
    cp_w3 = pltpu.make_async_copy(w3_hbm, w3_buf, dma_sems.at[1])
    cp_w4 = pltpu.make_async_copy(w4_hbm, w4_buf, dma_sems.at[2])
    cp_w2.start()
    cp_w3.start()
    cp_w4.start()

    # fc1: (B, 32) @ (32, 256)   -- only needs the small resident w1.
    h = jnp.dot(x_ref[...].astype(jnp.bfloat16), w1_ref[...],
                preferred_element_type=jnp.float32) + b1_ref[...]
    h = _leaky_relu(h)

    # fc2: (B, 256) @ (256, 512)
    cp_w2.wait()
    h = jnp.dot(h.astype(jnp.bfloat16), w2_buf[...],
                preferred_element_type=jnp.float32) + b2_ref[...]
    h = _leaky_relu(h)

    # fc3: (B, 512) @ (512, 1024)
    cp_w3.wait()
    h = jnp.dot(h.astype(jnp.bfloat16), w3_buf[...],
                preferred_element_type=jnp.float32) + b3_ref[...]
    h = _leaky_relu(h)

    # fc4: (B, 1024) @ (1024, 896)  (lane-dense padded; cols >= 784 are zero)
    cp_w4.wait()
    h = jnp.dot(h.astype(jnp.bfloat16), w4_buf[...],
                preferred_element_type=jnp.float32) + b4_ref[...]
    o_ref[...] = jnp.tanh(h)


def _vmem_full_spec(shape):
    # Whole-array block (full extent along every dim), single grid point.
    return pl.BlockSpec(shape, lambda: tuple(0 for _ in shape))


def _round_up(n, m):
    return ((n + m - 1) // m) * m


def prepare_params(params, out_size=28 * 28):
    """Kernel-ready params: bf16 weights, fc4 padded to lane-dense width."""
    padded = _round_up(out_size, 128)          # 784 -> 896 = 7 * 128
    kp = {}
    for i in (1, 2, 3):
        kp[f"w{i}"] = params[f"w{i}"].astype(jnp.bfloat16)
        kp[f"b{i}"] = params[f"b{i}"].astype(jnp.float32)
    kp["w4"] = jnp.pad(params["w4"].astype(jnp.bfloat16),
                       ((0, 0), (0, padded - out_size)))
    kp["b4"] = jnp.pad(params["b4"].astype(jnp.float32),
                       ((0, 0), (0, padded - out_size)))
    return kp


@functools.partial(jax.jit, static_argnames=("out_size",))
def generator_forward(x, kparams, out_size=28 * 28):
    B = x.shape[0]
    padded_out = kparams["w4"].shape[1]
    args = (x,
            kparams["w1"], kparams["b1"],
            kparams["w2"], kparams["b2"],
            kparams["w3"], kparams["b3"],
            kparams["w4"], kparams["b4"])
    in_specs = [
        _vmem_full_spec(x.shape),
        _vmem_full_spec(kparams["w1"].shape),
        _vmem_full_spec(kparams["b1"].shape),
        pl.BlockSpec(memory_space=pl.ANY),      # w2 streamed manually
        _vmem_full_spec(kparams["b2"].shape),
        pl.BlockSpec(memory_space=pl.ANY),      # w3 streamed manually
        _vmem_full_spec(kparams["b3"].shape),
        pl.BlockSpec(memory_space=pl.ANY),      # w4 streamed manually
        _vmem_full_spec(kparams["b4"].shape),
    ]
    scratch_shapes = [
        pltpu.VMEM(kparams["w2"].shape, jnp.bfloat16),
        pltpu.VMEM(kparams["w3"].shape, jnp.bfloat16),
        pltpu.VMEM(kparams["w4"].shape, jnp.bfloat16),
        pltpu.SemaphoreType.DMA((3,)),
    ]
    out_padded = pl.pallas_call(
        generator_kernel,
        out_shape=jax.ShapeDtypeStruct((B, padded_out), jnp.float32),
        grid=(),
        in_specs=in_specs,
        out_specs=_vmem_full_spec((B, padded_out)),
        scratch_shapes=scratch_shapes,
    )(*args)
    return out_padded[:, :out_size]


def init_params(key, input_size=32, out_size=28 * 28):
    """Deterministic init mimicking PyTorch nn.Linear default:
    U(-1/sqrt(fan_in), 1/sqrt(fan_in)) for both weight and bias. Kept in f32."""
    dims = [input_size, 256, 512, 1024, out_size]
    params = {}
    keys = jax.random.split(key, 2 * (len(dims) - 1))
    for layer in range(len(dims) - 1):
        fan_in, fan_out = dims[layer], dims[layer + 1]
        bound = 1.0 / (fan_in ** 0.5)
        wk, bk = keys[2 * layer], keys[2 * layer + 1]
        params[f"w{layer + 1}"] = jax.random.uniform(
            wk, (fan_in, fan_out), jnp.float32, minval=-bound, maxval=bound)
        params[f"b{layer + 1}"] = jax.random.uniform(
            bk, (1, fan_out), jnp.float32, minval=-bound, maxval=bound)
    return params


def _reference_forward_f32(x, params):
    """Pure-f32 reference matching the PyTorch module semantics."""
    h = _leaky_relu(x @ params["w1"] + params["b1"])
    h = _leaky_relu(h @ params["w2"] + params["b2"])
    h = _leaky_relu(h @ params["w3"] + params["b3"])
    return jnp.tanh(h @ params["w4"] + params["b4"])


def _reference_forward_bf16(x, kparams, out_size):
    """Plain-JAX reference with the same bf16-weight casting as the kernel."""
    def layer(h, w, b):
        return jnp.dot(h.astype(jnp.bfloat16), w,
                       preferred_element_type=jnp.float32) + b
    h = _leaky_relu(layer(x, kparams["w1"], kparams["b1"]))
    h = _leaky_relu(layer(h, kparams["w2"], kparams["b2"]))
    h = _leaky_relu(layer(h, kparams["w3"], kparams["b3"]))
    y = jnp.tanh(layer(h, kparams["w4"], kparams["b4"]))
    return y[:, :out_size]


if __name__ == "__main__":
    key = jax.random.PRNGKey(0)
    pkey, xkey = jax.random.split(key)

    input_size = 32
    out_size = 28 * 28
    batch = 8

    params = init_params(pkey, input_size=input_size, out_size=out_size)
    kparams = prepare_params(params, out_size=out_size)   # bf16 + padded fc4
    x = jax.random.normal(xkey, (batch, input_size), dtype=jnp.float32)

    out = jax.block_until_ready(generator_forward(x, kparams, out_size=out_size))
    assert out.shape == (batch, out_size)

    # Tight check against a plain-JAX reference using identical bf16 casting.
    ref_bf16 = jax.block_until_ready(_reference_forward_bf16(x, kparams, out_size))
    assert jnp.allclose(out, ref_bf16, atol=1e-2, rtol=1e-2), \
        float(jnp.max(jnp.abs(out - ref_bf16)))

    # Looser semantic check against the full-f32 (PyTorch-equivalent) reference;
    # the only difference is bf16 weight quantization.
    ref_f32 = jax.block_until_ready(_reference_forward_f32(x, params))
    assert jnp.allclose(out, ref_f32, atol=6e-2, rtol=6e-2), \
        float(jnp.max(jnp.abs(out - ref_f32)))

    print("KERNEL_OK")
</pallas_src>

<mosaic_0001>
module attributes {stable_mosaic.version = 11 : i64} {
  func.func @generator_kernel(%arg0: memref<8x32xf32, #tpu.memory_space<vmem>>, %arg1: memref<32x256xbf16, #tpu.memory_space<vmem>>, %arg2: memref<1x256xf32, #tpu.memory_space<vmem>>, %arg3: memref<256x512xbf16, #tpu.memory_space<any>>, %arg4: memref<1x512xf32, #tpu.memory_space<vmem>>, %arg5: memref<512x1024xbf16, #tpu.memory_space<any>>, %arg6: memref<1x1024xf32, #tpu.memory_space<vmem>>, %arg7: memref<1024x896xbf16, #tpu.memory_space<any>>, %arg8: memref<1x896xf32, #tpu.memory_space<vmem>>, %arg9: memref<8x896xf32, #tpu.memory_space<vmem>>, %arg10: memref<256x512xbf16, #tpu.memory_space<vmem>>, %arg11: memref<512x1024xbf16, #tpu.memory_space<vmem>>, %arg12: memref<1024x896xbf16, #tpu.memory_space<vmem>>, %arg13: memref<3x!tpu.dma_semaphore, #tpu.memory_space<semaphore_mem>>) attributes {dimension_semantics = [], scalar_prefetch = 0 : i64, scratch_operands = 4 : i64, tpu.core_type = #tpu.core_type<tc>} {
    %c0_i32 = arith.constant 0 : i32
    %0 = tpu.memref_slice %arg13[%c0_i32] : memref<3x!tpu.dma_semaphore, #tpu.memory_space<semaphore_mem>> -> memref<1x!tpu.dma_semaphore, #tpu.memory_space<semaphore_mem>>
    %1 = tpu.memref_squeeze %0 : memref<1x!tpu.dma_semaphore, #tpu.memory_space<semaphore_mem>> -> memref<!tpu.dma_semaphore, #tpu.memory_space<semaphore_mem>>
    tpu.enqueue_dma source(%arg3 : memref<256x512xbf16, #tpu.memory_space<any>>) target(%arg10 : memref<256x512xbf16, #tpu.memory_space<vmem>>) target_semaphore(%1 : memref<!tpu.dma_semaphore, #tpu.memory_space<semaphore_mem>>)
    %c1_i32 = arith.constant 1 : i32
    %2 = tpu.memref_slice %arg13[%c1_i32] : memref<3x!tpu.dma_semaphore, #tpu.memory_space<semaphore_mem>> -> memref<1x!tpu.dma_semaphore, #tpu.memory_space<semaphore_mem>>
    %3 = tpu.memref_squeeze %2 : memref<1x!tpu.dma_semaphore, #tpu.memory_space<semaphore_mem>> -> memref<!tpu.dma_semaphore, #tpu.memory_space<semaphore_mem>>
    tpu.enqueue_dma source(%arg5 : memref<512x1024xbf16, #tpu.memory_space<any>>) target(%arg11 : memref<512x1024xbf16, #tpu.memory_space<vmem>>) target_semaphore(%3 : memref<!tpu.dma_semaphore, #tpu.memory_space<semaphore_mem>>)
    %c2_i32 = arith.constant 2 : i32
    %4 = tpu.memref_slice %arg13[%c2_i32] : memref<3x!tpu.dma_semaphore, #tpu.memory_space<semaphore_mem>> -> memref<1x!tpu.dma_semaphore, #tpu.memory_space<semaphore_mem>>
    %5 = tpu.memref_squeeze %4 : memref<1x!tpu.dma_semaphore, #tpu.memory_space<semaphore_mem>> -> memref<!tpu.dma_semaphore, #tpu.memory_space<semaphore_mem>>
    tpu.enqueue_dma source(%arg7 : memref<1024x896xbf16, #tpu.memory_space<any>>) target(%arg12 : memref<1024x896xbf16, #tpu.memory_space<vmem>>) target_semaphore(%5 : memref<!tpu.dma_semaphore, #tpu.memory_space<semaphore_mem>>)
    %c0 = arith.constant 0 : index
    %c0_0 = arith.constant 0 : index
    %6 = vector.load %arg0[%c0, %c0_0] : memref<8x32xf32, #tpu.memory_space<vmem>>, vector<8x32xf32>
    %7 = arith.truncf %6 : vector<8x32xf32> to vector<8x32xbf16>
    %c0_1 = arith.constant 0 : index
    %c0_2 = arith.constant 0 : index
    %8 = vector.load %arg1[%c0_1, %c0_2] : memref<32x256xbf16, #tpu.memory_space<vmem>>, vector<32x256xbf16>
    %cst = arith.constant dense<0.000000e+00> : vector<8x256xf32>
    %9 = tpu.matmul %7, %8, %cst {dimension_numbers = #tpu.dot_dimension_numbers<[1], [0], [0], [1], [0, 0, 1, 1], [], []>} : vector<8x32xbf16>, vector<32x256xbf16>, vector<8x256xf32> -> vector<8x256xf32>
    %c0_3 = arith.constant 0 : index
    %c0_4 = arith.constant 0 : index
    %10 = vector.load %arg2[%c0_3, %c0_4] : memref<1x256xf32, #tpu.memory_space<vmem>>, vector<1x256xf32>
    %11 = vector.broadcast %10 : vector<1x256xf32> to vector<8x256xf32>
    %12 = arith.addf %9, %11 : vector<8x256xf32>
    %cst_5 = arith.constant 0.000000e+00 : f32
    %13 = vector.broadcast %cst_5 : f32 to vector<8x256xf32>
    %14 = arith.cmpf oge, %12, %13 : vector<8x256xf32>
    %cst_6 = arith.constant 2.000000e-01 : f32
    %15 = vector.broadcast %cst_6 : f32 to vector<8x256xf32>
    %16 = arith.mulf %15, %12 : vector<8x256xf32>
    %17 = arith.select %14, %12, %16 : vector<8x256xi1>, vector<8x256xf32>
    %c0_i32_7 = arith.constant 0 : i32
    %18 = tpu.memref_slice %arg13[%c0_i32_7] : memref<3x!tpu.dma_semaphore, #tpu.memory_space<semaphore_mem>> -> memref<1x!tpu.dma_semaphore, #tpu.memory_space<semaphore_mem>>
    %19 = tpu.memref_squeeze %18 : memref<1x!tpu.dma_semaphore, #tpu.memory_space<semaphore_mem>> -> memref<!tpu.dma_semaphore, #tpu.memory_space<semaphore_mem>>
    tpu.wait_dma2 semaphore(%19 : memref<!tpu.dma_semaphore, #tpu.memory_space<semaphore_mem>>) src(%arg3 : memref<256x512xbf16, #tpu.memory_space<any>>) dst(%arg10 : memref<256x512xbf16, #tpu.memory_space<vmem>>)
    %20 = arith.truncf %17 : vector<8x256xf32> to vector<8x256xbf16>
    %c0_8 = arith.constant 0 : index
    %c0_9 = arith.constant 0 : index
    %21 = vector.load %arg10[%c0_8, %c0_9] : memref<256x512xbf16, #tpu.memory_space<vmem>>, vector<256x512xbf16>
    %cst_10 = arith.constant dense<0.000000e+00> : vector<8x512xf32>
    %22 = tpu.matmul %20, %21, %cst_10 {dimension_numbers = #tpu.dot_dimension_numbers<[1], [0], [0], [1], [0, 0, 1, 1], [], []>} : vector<8x256xbf16>, vector<256x512xbf16>, vector<8x512xf32> -> vector<8x512xf32>
    %c0_11 = arith.constant 0 : index
    %c0_12 = arith.constant 0 : index
    %23 = vector.load %arg4[%c0_11, %c0_12] : memref<1x512xf32, #tpu.memory_space<vmem>>, vector<1x512xf32>
    %24 = vector.broadcast %23 : vector<1x512xf32> to vector<8x512xf32>
    %25 = arith.addf %22, %24 : vector<8x512xf32>
    %cst_13 = arith.constant 0.000000e+00 : f32
    %26 = vector.broadcast %cst_13 : f32 to vector<8x512xf32>
    %27 = arith.cmpf oge, %25, %26 : vector<8x512xf32>
    %cst_14 = arith.constant 2.000000e-01 : f32
    %28 = vector.broadcast %cst_14 : f32 to vector<8x512xf32>
    %29 = arith.mulf %28, %25 : vector<8x512xf32>
    %30 = arith.select %27, %25, %29 : vector<8x512xi1>, vector<8x512xf32>
    %c1_i32_15 = arith.constant 1 : i32
    %31 = tpu.memref_slice %arg13[%c1_i32_15] : memref<3x!tpu.dma_semaphore, #tpu.memory_space<semaphore_mem>> -> memref<1x!tpu.dma_semaphore, #tpu.memory_space<semaphore_mem>>
    %32 = tpu.memref_squeeze %31 : memref<1x!tpu.dma_semaphore, #tpu.memory_space<semaphore_mem>> -> memref<!tpu.dma_semaphore, #tpu.memory_space<semaphore_mem>>
    tpu.wait_dma2 semaphore(%32 : memref<!tpu.dma_semaphore, #tpu.memory_space<semaphore_mem>>) src(%arg5 : memref<512x1024xbf16, #tpu.memory_space<any>>) dst(%arg11 : memref<512x1024xbf16, #tpu.memory_space<vmem>>)
    %33 = arith.truncf %30 : vector<8x512xf32> to vector<8x512xbf16>
    %c0_16 = arith.constant 0 : index
    %c0_17 = arith.constant 0 : index
    %34 = vector.load %arg11[%c0_16, %c0_17] : memref<512x1024xbf16, #tpu.memory_space<vmem>>, vector<512x1024xbf16>
    %cst_18 = arith.constant dense<0.000000e+00> : vector<8x1024xf32>
    %35 = tpu.matmul %33, %34, %cst_18 {dimension_numbers = #tpu.dot_dimension_numbers<[1], [0], [0], [1], [0, 0, 1, 1], [], []>} : vector<8x512xbf16>, vector<512x1024xbf16>, vector<8x1024xf32> -> vector<8x1024xf32>
    %c0_19 = arith.constant 0 : index
    %c0_20 = arith.constant 0 : index
    %36 = vector.load %arg6[%c0_19, %c0_20] : memref<1x1024xf32, #tpu.memory_space<vmem>>, vector<1x1024xf32>
    %37 = vector.broadcast %36 : vector<1x1024xf32> to vector<8x1024xf32>
    %38 = arith.addf %35, %37 : vector<8x1024xf32>
    %cst_21 = arith.constant 0.000000e+00 : f32
    %39 = vector.broadcast %cst_21 : f32 to vector<8x1024xf32>
    %40 = arith.cmpf oge, %38, %39 : vector<8x1024xf32>
    %cst_22 = arith.constant 2.000000e-01 : f32
    %41 = vector.broadcast %cst_22 : f32 to vector<8x1024xf32>
    %42 = arith.mulf %41, %38 : vector<8x1024xf32>
    %43 = arith.select %40, %38, %42 : vector<8x1024xi1>, vector<8x1024xf32>
    %c2_i32_23 = arith.constant 2 : i32
    %44 = tpu.memref_slice %arg13[%c2_i32_23] : memref<3x!tpu.dma_semaphore, #tpu.memory_space<semaphore_mem>> -> memref<1x!tpu.dma_semaphore, #tpu.memory_space<semaphore_mem>>
    %45 = tpu.memref_squeeze %44 : memref<1x!tpu.dma_semaphore, #tpu.memory_space<semaphore_mem>> -> memref<!tpu.dma_semaphore, #tpu.memory_space<semaphore_mem>>
    tpu.wait_dma2 semaphore(%45 : memref<!tpu.dma_semaphore, #tpu.memory_space<semaphore_mem>>) src(%arg7 : memref<1024x896xbf16, #tpu.memory_space<any>>) dst(%arg12 : memref<1024x896xbf16, #tpu.memory_space<vmem>>)
    %46 = arith.truncf %43 : vector<8x1024xf32> to vector<8x1024xbf16>
    %c0_24 = arith.constant 0 : index
    %c0_25 = arith.constant 0 : index
    %47 = vector.load %arg12[%c0_24, %c0_25] : memref<1024x896xbf16, #tpu.memory_space<vmem>>, vector<1024x896xbf16>
    %cst_26 = arith.constant dense<0.000000e+00> : vector<8x896xf32>
    %48 = tpu.matmul %46, %47, %cst_26 {dimension_numbers = #tpu.dot_dimension_numbers<[1], [0], [0], [1], [0, 0, 1, 1], [], []>} : vector<8x1024xbf16>, vector<1024x896xbf16>, vector<8x896xf32> -> vector<8x896xf32>
    %c0_27 = arith.constant 0 : index
    %c0_28 = arith.constant 0 : index
    %49 = vector.load %arg8[%c0_27, %c0_28] : memref<1x896xf32, #tpu.memory_space<vmem>>, vector<1x896xf32>
    %50 = vector.broadcast %49 : vector<1x896xf32> to vector<8x896xf32>
    %51 = arith.addf %48, %50 : vector<8x896xf32>
    %52 = math.tanh %51 : vector<8x896xf32>
    %c0_29 = arith.constant 0 : index
    %c0_30 = arith.constant 0 : index
    %53 = vector.load %arg9[%c0_29, %c0_30] : memref<8x896xf32, #tpu.memory_space<vmem>>, vector<8x896xf32>
    tpu.vector_store %arg9[%c0_29, %c0_30], %52 {strides = array<i32>} : memref<8x896xf32, #tpu.memory_space<vmem>>, vector<8x896xf32>,
    return
  }
}

</mosaic_0001>

<bundles_post_ra>
// kernel: generator_forward.1
= control target key start
LH: loop header
LB: loop body
LE: loop exit
PB: predicated region body
PF: predicated region fallthrough
CT: control target
= control target key end

     0   :  { %14 = vsyncpa [#allocation7], 0  ;;  %s10863_s0 = inlined_call_operand.hbm [shape: f32[8,32], index: 0, kind: input, shape index: {}]   ;;  %s10864_s1 = inlined_call_operand.hbm [shape: bf16[32,256], index: 1, kind: input, shape index: {}]   ;;  %s10865_s2 = inlined_call_operand.hbm [shape: f32[1,256], index: 2, kind: input, shape index: {}]   ;;  %s10866_s3 = inlined_call_operand.hbm [shape: bf16[256,512], index: 3, kind: input, shape index: {}]   ;;  %s10867_s4 = inlined_call_operand.hbm [shape: f32[1,512], index: 4, kind: input, shape index: {}]   ;;  %s10868_s5 = inlined_call_operand.hbm [shape: bf16[512,1024], index: 5, kind: input, shape index: {}]   ;;  %s10869_s6 = inlined_call_operand.hbm [shape: f32[1,1024], index: 6, kind: input, shape index: {}]   ;;  %s10870_s7 = inlined_call_operand.hbm [shape: bf16[1024,896], index: 7, kind: input, shape index: {}]   ;;  %s10871_s8 = inlined_call_operand.hbm [shape: f32[1,896], index: 8, kind: input, shape index: {}]   ;;  %s10872_s9 = inlined_call_operand.hbm [shape: f32[8,896], index: 9, kind: output, shape index: {}]  }
   0x1   :  { %15 = vsyncpa [#allocation10], 0 }
   0x2   :  { %16 = vsyncpa [#allocation13], 0 }
   0x3   :  { %17 = vsyncpa [#allocation16], 0  ;;  %s34_s11 = sshll.u32 %s10864_s1, 4  ;;  %s35_s11 = int_to_ptr.hbm [resolvable:$true] %s34_s11 }
   0x4   :  { %18 = vsyncpa [#allocation8], 0  ;;  %s10514_s12 = smov [#allocation9]   ;;  %s59_s16 = sshll.u32 %s10867_s4, 4  ;;  %s60_s16 = int_to_ptr.hbm [resolvable:$true] %s59_s16 }
   0x5   :  { %s36_s13 = sshll.u32 %s10514_s12, 4  ;;  %s10515_s17 = smov 128   ;;  %s37_s13 = int_to_ptr.vmem [resolvable:$true] %s36_s13 }
   0x6   :  { %s10516_s18 = smov 8   ;;  %s10517_s19 = smov [#allocation12]  }
   0x7   :  { %42 = dma.hbm_to_vmem [thread:$0]  %s35_s11, 512, %s37_s13, [#allocation10], %s10515_s17, %s10515_s17, %s10516_s18  }
   0x8   :  { %s61_s20 = sshll.u32 %s10517_s19, 4  ;;  %s24_s23 = sshll.u32 %s10863_s0, 4  ;;  %s62_s20 = int_to_ptr.vmem [resolvable:$true] %s61_s20  ;;  %s25_s23 = int_to_ptr.hbm [resolvable:$true] %s24_s23 }
   0x9   :  { %64 = dma.hbm_to_vmem [thread:$0]  %s60_s16, 64, %s62_s20, [#allocation13]  }
   0xa   :  { %s48_s25 = sshll.u32 %s10865_s2, 4  ;;  %s10518_s26 = smov [#allocation6]   ;;  %s49_s25 = int_to_ptr.hbm [resolvable:$true] %s48_s25 }
   0xb   :  { %s26_s27 = sshll.u32 %s10518_s26, 4  ;;  %s10519_s4 = smov [#allocation11]   ;;  %s27_s27 = int_to_ptr.vmem [resolvable:$true] %s26_s27 }
   0xc   :  { %29 = dma.hbm_to_vmem [thread:$0]  %s25_s23, 128, %s27_s27, [#allocation7]  }
   0xd   :  { %s50_s28 = sshll.u32 %s10519_s4, 4  ;;  %s70_s10 = sshll.u32 %s10869_s6, 4  ;;  %s51_s28 = int_to_ptr.vmem [resolvable:$true] %s50_s28  ;;  %s71_s10 = int_to_ptr.hbm [resolvable:$true] %s70_s10 }
   0xe   :  { %53 = dma.hbm_to_vmem [thread:$0]  %s49_s25, 32, %s51_s28, [#allocation10]  }
   0xf   :  { %s81_s12 = sshll.u32 %s10871_s8, 4  ;;  %s10520_s13 = smov [#allocation14]   ;;  %s82_s12 = int_to_ptr.hbm [resolvable:$true] %s81_s12 }
  0x10   :  { %s72_s2 = sshll.u32 %s10520_s13, 4  ;;  %s10521_s14 = smov [#allocation15]   ;;  %s73_s2 = int_to_ptr.vmem [resolvable:$true] %s72_s2 }
  0x11   :  { %75 = dma.hbm_to_vmem [thread:$0]  %s71_s10, 128, %s73_s2, [#allocation13]  }
  0x12   :  { %s83_s15 = sshll.u32 %s10521_s14, 4  ;;  %s84_s15 = int_to_ptr.vmem [resolvable:$true] %s83_s15 }
  0x13   :  { %86 = dma.hbm_to_vmem [thread:$0]  %s82_s12, 112, %s84_s15, [#allocation16]  }
  0x14   :  { %10498 = dma.done.wait [#allocation7], 128  }
  0x15   :  { %10499 = vsyncadd [#allocation7], 4294967168 }
  0x16   :  { %10500 = dma.done.wait [#allocation10], 544  }
  0x17   :  { %10501 = vsyncadd [#allocation10], 4294966752 }
  0x18   :  { %10502 = dma.done.wait [#allocation13], 192  }
  0x19   :  { %10503 = vsyncadd [#allocation13], 4294967104 }
  0x1a   :  { %10504 = dma.done.wait [#allocation16], 112  }
  0x1b   :  { %10505 = vsyncadd [#allocation16], 4294967184  ;;  %v6375_v0 = vld [vmem:[#allocation9 + $0x10] sm:$0xf]  ;;  %v9461_v1 = vld [vmem:[#allocation9 + $0x14] sm:$0xf0] }
  0x1c   :  { %v9460_v2 = vld [vmem:[#allocation9 + $0x14] sm:$0xf]  ;;  %v6376_v3 = vor.u32 %v9461_v1, %v6375_v0  ;;  %v6377_v4 = vld [vmem:[#allocation9 + $0x18] sm:$0xf0]  ;;  %v6367_v5 = vld [vmem:[#allocation9] sm:$0xf] }
  0x1d   :  { %v9459_v6 = vld [vmem:[#allocation9 + $0x4] sm:$0xf0]  ;;  %v6380_v7 = vor.u32 %v9460_v2, %v6377_v4  ;;  %v9458_v8 = vld [vmem:[#allocation9 + $0x4] sm:$0xf]  ;;  %v6369_v9 = vld [vmem:[#allocation9 + $0x8] sm:$0xf0] }
  0x1e   :  { %195 = vmatpush.bf16.msra.mxu0 %v6376_v3  ;;  %v6368_v10 = vor.u32 %v9459_v6, %v6367_v5  ;;  %v153_v11 = vld [vmem:[#allocation6] sm:$0xff]  ;;  %v6372_v12 = vor.u32 %v9458_v8, %v6369_v9  ;;  %vm185_vm0 = vcmask 261120   ;;  %s119_s16 = sshll.u32 %s10866_s3, 4  ;;  %s10522_s17 = smov [#allocation2]   ;;  %v159_v14 = vld [vmem:[#allocation11] sm:$0x3]  ;;  %s120_s16 = int_to_ptr.hbm [resolvable:$true] %s119_s16 }
  0x1f   :  { %208 = vmatpush.bf16.msra.mxu1 %v6380_v7  ;;  %v154_v13 = vpack.c.bf16 %v153_v11, %v153_v11  ;;  %s121_s18 = sshll.u32 %s10522_s17, 4  ;;  %s133_s21 = sshll.u32 %s10868_s5, 4  ;;  %v161_v15 = vperm.slane %v159_v14, 0  ;;  %v162_v16 = vperm.slane %v159_v14, 1  ;;  %s122_s18 = int_to_ptr.vmem [resolvable:$true] %s121_s18  ;;  %s134_s21 = int_to_ptr.hbm [resolvable:$true] %s133_s21 }
  0x20   :  { %124 = dma.hbm_to_vmem [thread:$0]  %s120_s16, 8192, %s122_s18, [#allocation5] }
  0x21   :  { %s10523_s22 = smov [#allocation3]   ;;  %s147_s25 = sshll.u32 %s10870_s7, 4  ;;  %s148_s25 = int_to_ptr.hbm [resolvable:$true] %s147_s25 }
  0x22   :  { %196 = vmatpush.bf16.msra.mxu0 %v6368_v10  ;;  %s135_s23 = sshll.u32 %s10523_s22, 4  ;;  %s10524_s3 = smov [#allocation4]   ;;  %s136_s23 = int_to_ptr.vmem [resolvable:$true] %s135_s23 }
  0x23   :  { %209 = vmatpush.bf16.msra.mxu1 %v6372_v12  ;;  %138 = dma.hbm_to_vmem [thread:$0]  %s134_s21, 32768, %s136_s23, [#allocation5 + $0x1] }
  0x24   :  { %s149_s26 = sshll.u32 %s10524_s3, 4  ;;  %s150_s26 = int_to_ptr.vmem [resolvable:$true] %s149_s26 }
  0x25   :  { %6381 = vmatmul.msk.bf16.vlgmr.msra.gmra.mxu0 %vm185_vm0, %v154_v13  ;;  %152 = dma.hbm_to_vmem [thread:$0]  %s148_s25, 57344, %s150_s26, [#allocation5 + $0x2] }
  0x26   :  { %6382 = vmatmul.msk.bf16.vlgmr.msra.gmra.mxu1 %vm185_vm0, %v154_v13 }
  0xa2   :  { %v198_v17 = vpop.f32.mrf.mxu0 }
  0xa3   :  { %v199_v18 = vadd.f32 %v198_v17, %v161_v15  ;;  %v211_v19 = vpop.f32.mrf.mxu1 }
  0xa4   :  { %v212_v20 = vadd.f32 %v211_v19, %v162_v16 }
  0xa5   :  { %vm215_vm1 = vcmp.ge.f32.partialorder %v199_v18, 0.0  ;;  %v217_v21 = vmul.f32 0.2, %v199_v18 }
  0xa6   :  { %vm216_vm2 = vcmp.ge.f32.partialorder %v212_v20, 0.0  ;;  %v218_v22 = vmul.f32 0.2, %v212_v20 }
  0xa7   :  { %v10603_v23 = vsel %vm215_vm1, %v199_v18, %v217_v21 }
  0xa8   :  { %v10605_v24 = vsel %vm216_vm2, %v212_v20, %v218_v22 }
  0xaa   :  { %v200_v25 = vpop.f32.mrf.mxu0 }
  0xab   :  { %v213_v26 = vpop.f32.mrf.mxu1 }
  0xac   :  { %10506 = dma.done.wait [#allocation5], 8192 }
  0xad   :  { %10507 = vsyncadd [#allocation5], 4294959104  ;;  %v6497_v27 = vld [vmem:[#allocation2 + $0xe0] sm:$0xf]  ;;  %v9492_v28 = vld [vmem:[#allocation2 + $0xec] sm:$0xf0] }
  0xae   :  { %v6625_v29 = vld [vmem:[#allocation2 + $0x1e0] sm:$0xf]  ;;  %v6498_v30 = vor.u32 %v9492_v28, %v6497_v27  ;;  %v9524_v31 = vld [vmem:[#allocation2 + $0x1ec] sm:$0xf0]  ;;  %v9490_v32 = vld [vmem:[#allocation2 + $0xe4] sm:$0xf] }
  0xaf   :  { %v6499_v33 = vld [vmem:[#allocation2 + $0xf0] sm:$0xf0]  ;;  %v6626_v34 = vor.u32 %v9524_v31, %v6625_v29  ;;  %v9522_v36 = vld [vmem:[#allocation2 + $0x1e4] sm:$0xf]  ;;  %v6481_v38 = vld [vmem:[#allocation2 + $0xc0] sm:$0xf] }
  0xb0   :  { %v6502_v35 = vor.u32 %v9490_v32, %v6499_v33  ;;  %v6627_v37 = vld [vmem:[#allocation2 + $0x1f0] sm:$0xf0]  ;;  %621 = vmatpush.bf16.msra.mxu2 %v6498_v30  ;;  %v9488_v40 = vld [vmem:[#allocation2 + $0xcc] sm:$0xf0]  ;;  %v6609_v41 = vld [vmem:[#allocation2 + $0x1c0] sm:$0xf] }
  0xb1   :  { %v6630_v39 = vor.u32 %v9522_v36, %v6627_v37  ;;  %v9520_v42 = vld [vmem:[#allocation2 + $0x1cc] sm:$0xf0]  ;;  %634 = vmatpush.bf16.msra.mxu3 %v6626_v34  ;;  %v6482_v43 = vor.u32 %v9488_v40, %v6481_v38  ;;  %v9486_v45 = vld [vmem:[#allocation2 + $0xc4] sm:$0xf]  ;;  %v6483_v46 = vld [vmem:[#allocation2 + $0xd0] sm:$0xf0] }
  0xb2   :  { %647 = vmatpush.bf16.msrb.mxu0 %v6502_v35  ;;  %v6610_v44 = vor.u32 %v9520_v42, %v6609_v41  ;;  %v9518_v47 = vld [vmem:[#allocation2 + $0x1c4] sm:$0xf]  ;;  %v6486_v48 = vor.u32 %v9486_v45, %v6483_v46  ;;  %v6611_v49 = vld [vmem:[#allocation2 + $0x1d0] sm:$0xf0]  ;;  %v6465_v50 = vld [vmem:[#allocation2 + $0xa0] sm:$0xf] }
  0xb3   :  { %660 = vmatpush.bf16.msrb.mxu1 %v6630_v39  ;;  %v9484_v51 = vld [vmem:[#allocation2 + $0xac] sm:$0xf0]  ;;  %v6614_v52 = vor.u32 %v9518_v47, %v6611_v49  ;;  %v6593_v53 = vld [vmem:[#allocation2 + $0x1a0] sm:$0xf]  ;;  %v9482_v55 = vld [vmem:[#allocation2 + $0xa4] sm:$0xf] }
  0xb4   :  { %v9516_v54 = vld [vmem:[#allocation2 + $0x1ac] sm:$0xf0]  ;;  %622 = vmatpush.bf16.msra.mxu2 %v6482_v43  ;;  %v6466_v56 = vor.u32 %v9484_v51, %v6465_v50  ;;  %v6467_v57 = vld [vmem:[#allocation2 + $0xb0] sm:$0xf0]  ;;  %v9514_v58 = vld [vmem:[#allocation2 + $0x1a4] sm:$0xf] }
  0xb5   :  { %v6595_v59 = vld [vmem:[#allocation2 + $0x1b0] sm:$0xf0]  ;;  %635 = vmatpush.bf16.msra.mxu3 %v6610_v44  ;;  %v6594_v60 = vor.u32 %v9516_v54, %v6593_v53  ;;  %v6470_v61 = vor.u32 %v9482_v55, %v6467_v57  ;;  %v6449_v62 = vld [vmem:[#allocation2 + $0x80] sm:$0xf]  ;;  %v9480_v63 = vld [vmem:[#allocation2 + $0x8c] sm:$0xf0] }
  0xb6   :  { %648 = vmatpush.bf16.msrb.mxu0 %v6486_v48  ;;  %v6577_v0 = vld [vmem:[#allocation2 + $0x180] sm:$0xf]  ;;  %v6598_v1 = vor.u32 %v9514_v58, %v6595_v59  ;;  %v9512_v2 = vld [vmem:[#allocation2 + $0x18c] sm:$0xf0]  ;;  %v9478_v3 = vld [vmem:[#allocation2 + $0x84] sm:$0xf]  ;;  %v6450_v7 = vor.u32 %v9480_v63, %v6449_v62 }
  0xb7   :  { %661 = vmatpush.bf16.msrb.mxu1 %v6614_v52  ;;  %v6451_v4 = vld [vmem:[#allocation2 + $0x90] sm:$0xf0]  ;;  %v9510_v5 = vld [vmem:[#allocation2 + $0x184] sm:$0xf]  ;;  %v6578_v8 = vor.u32 %v9512_v2, %v6577_v0  ;;  %v6433_v10 = vld [vmem:[#allocation2 + $0x60] sm:$0xf] }
  0xb8   :  { %v6579_v6 = vld [vmem:[#allocation2 + $0x190] sm:$0xf0]  ;;  %623 = vmatpush.bf16.msra.mxu2 %v6466_v56  ;;  %v6454_v9 = vor.u32 %v9478_v3, %v6451_v4  ;;  %v9476_v11 = vld [vmem:[#allocation2 + $0x6c] sm:$0xf0]  ;;  %v6561_v12 = vld [vmem:[#allocation2 + $0x160] sm:$0xf] }
  0xb9   :  { %636 = vmatpush.bf16.msra.mxu3 %v6594_v60  ;;  %v6582_v13 = vor.u32 %v9510_v5, %v6579_v6  ;;  %v9508_v14 = vld [vmem:[#allocation2 + $0x16c] sm:$0xf0]  ;;  %v9474_v15 = vld [vmem:[#allocation2 + $0x64] sm:$0xf]  ;;  %v6435_v16 = vld [vmem:[#allocation2 + $0x70] sm:$0xf0]  ;;  %v6434_v19 = vor.u32 %v9476_v11, %v6433_v10 }
  0xba   :  { %649 = vmatpush.bf16.msrb.mxu0 %v6470_v61  ;;  %v9506_v17 = vld [vmem:[#allocation2 + $0x164] sm:$0xf]  ;;  %v6563_v18 = vld [vmem:[#allocation2 + $0x170] sm:$0xf0]  ;;  %v6562_v20 = vor.u32 %v9508_v14, %v6561_v12  ;;  %v6438_v21 = vor.u32 %v9474_v15, %v6435_v16  ;;  %v6417_v22 = vld [vmem:[#allocation2 + $0x40] sm:$0xf]  ;;  %v10609_v15 = vpack.c.bf16 %v10603_v23, %v10603_v23 }
  0xbb   :  { %662 = vmatpush.bf16.msrb.mxu1 %v6598_v1  ;;  %v9472_v25 = vld [vmem:[#allocation2 + $0x4c] sm:$0xf0]  ;;  %v6545_v26 = vld [vmem:[#allocation2 + $0x140] sm:$0xf]  ;;  %v6566_v27 = vor.u32 %v9506_v17, %v6563_v18  ;;  %v9470_v29 = vld [vmem:[#allocation2 + $0x44] sm:$0xf]  ;;  %v10613_v18 = vpack.c.bf16 %v10605_v24, %v10605_v24 }
  0xbc   :  { %624 = vmatpush.bf16.msra.mxu2 %v6450_v7  ;;  %v9504_v28 = vld [vmem:[#allocation2 + $0x14c] sm:$0xf0]  ;;  %v6419_v30 = vld [vmem:[#allocation2 + $0x50] sm:$0xf0]  ;;  %v9502_v31 = vld [vmem:[#allocation2 + $0x144] sm:$0xf]  ;;  %v6418_v33 = vor.u32 %v9472_v25, %v6417_v22 }
  0xbd   :  { %637 = vmatpush.bf16.msra.mxu3 %v6578_v8  ;;  %v6547_v32 = vld [vmem:[#allocation2 + $0x150] sm:$0xf0]  ;;  %v6546_v34 = vor.u32 %v9504_v28, %v6545_v26  ;;  %v6422_v35 = vor.u32 %v9470_v29, %v6419_v30  ;;  %v6401_v36 = vld [vmem:[#allocation2 + $0x20] sm:$0xf]  ;;  %v9468_v37 = vld [vmem:[#allocation2 + $0x2c] sm:$0xf0] }
  0xbe   :  { %650 = vmatpush.bf16.msrb.mxu0 %v6454_v9  ;;  %v6529_v38 = vld [vmem:[#allocation2 + $0x120] sm:$0xf]  ;;  %v6550_v39 = vor.u32 %v9502_v31, %v6547_v32  ;;  %v9500_v40 = vld [vmem:[#allocation2 + $0x12c] sm:$0xf0]  ;;  %v9466_v41 = vld [vmem:[#allocation2 + $0x24] sm:$0xf]  ;;  %v6402_v45 = vor.u32 %v9468_v37, %v6401_v36 }
  0xbf   :  { %663 = vmatpush.bf16.msrb.mxu1 %v6582_v13  ;;  %v6403_v42 = vld [vmem:[#allocation2 + $0x30] sm:$0xf0]  ;;  %v9498_v43 = vld [vmem:[#allocation2 + $0x124] sm:$0xf]  ;;  %v6385_v46 = vld [vmem:[#allocation2] sm:$0xf]  ;;  %v6530_v48 = vor.u32 %v9500_v40, %v6529_v38 }
  0xc0   :  { %625 = vmatpush.bf16.msra.mxu2 %v6434_v19  ;;  %v6531_v44 = vld [vmem:[#allocation2 + $0x130] sm:$0xf0]  ;;  %v9464_v47 = vld [vmem:[#allocation2 + $0xc] sm:$0xf0]  ;;  %v6406_v49 = vor.u32 %v9466_v41, %v6403_v42  ;;  %v6513_v50 = vld [vmem:[#allocation2 + $0x100] sm:$0xf] }
  0xc1   :  { %638 = vmatpush.bf16.msra.mxu3 %v6562_v20  ;;  %v9496_v51 = vld [vmem:[#allocation2 + $0x10c] sm:$0xf0]  ;;  %v9462_v52 = vld [vmem:[#allocation2 + $0x4] sm:$0xf]  ;;  %v6534_v53 = vor.u32 %v9498_v43, %v6531_v44  ;;  %v6387_v54 = vld [vmem:[#allocation2 + $0x10] sm:$0xf0]  ;;  %v6386_v60 = vor.u32 %v9464_v47, %v6385_v46 }
  0xc2   :  { %651 = vmatpush.bf16.msrb.mxu0 %v6438_v21  ;;  %v9494_v55 = vld [vmem:[#allocation2 + $0x104] sm:$0xf]  ;;  %v6515_v56 = vld [vmem:[#allocation2 + $0x110] sm:$0xf0]  ;;  %v6505_v57 = vld [vmem:[#allocation2 + $0xe8] sm:$0xf]  ;;  %v6514_v0 = vor.u32 %v9496_v51, %v6513_v50  ;;  %v6390_v1 = vor.u32 %v9462_v52, %v6387_v54 }
  0xc3   :  { %664 = vmatpush.bf16.msrb.mxu1 %v6566_v27  ;;  %v9493_v58 = vld [vmem:[#allocation2 + $0xf4] sm:$0xf0]  ;;  %v6633_v59 = vld [vmem:[#allocation2 + $0x1e8] sm:$0xf]  ;;  %v9491_v62 = vld [vmem:[#allocation2 + $0xec] sm:$0xf]  ;;  %v6518_v4 = vor.u32 %v9494_v55, %v6515_v56 }
  0xc4   :  { %626 = vmatpush.bf16.msra.mxu2 %v6418_v33  ;;  %v9525_v61 = vld [vmem:[#allocation2 + $0x1f4] sm:$0xf0]  ;;  %v6507_v63 = vld [vmem:[#allocation2 + $0xf8] sm:$0xf0]  ;;  %v9523_v2 = vld [vmem:[#allocation2 + $0x1ec] sm:$0xf]  ;;  %v6506_v5 = vor.u32 %v9493_v58, %v6505_v57 }
  0xc5   :  { %639 = vmatpush.bf16.msra.mxu3 %v6546_v34  ;;  %v6635_v3 = vld [vmem:[#allocation2 + $0x1f8] sm:$0xf0]  ;;  %v6634_v6 = vor.u32 %v9525_v61, %v6633_v59  ;;  %v6510_v7 = vor.u32 %v9491_v62, %v6507_v63  ;;  %v6489_v8 = vld [vmem:[#allocation2 + $0xc8] sm:$0xf]  ;;  %v9489_v9 = vld [vmem:[#allocation2 + $0xd4] sm:$0xf0] }
  0xc6   :  { %652 = vmatpush.bf16.msrb.mxu0 %v6422_v35  ;;  %v6617_v10 = vld [vmem:[#allocation2 + $0x1c8] sm:$0xf]  ;;  %v6638_v11 = vor.u32 %v9523_v2, %v6635_v3  ;;  %v9521_v12 = vld [vmem:[#allocation2 + $0x1d4] sm:$0xf0]  ;;  %v9487_v13 = vld [vmem:[#allocation2 + $0xcc] sm:$0xf]  ;;  %v6490_v19 = vor.u32 %v9489_v9, %v6489_v8 }
  0xc7   :  { %665 = vmatpush.bf16.msrb.mxu1 %v6550_v39  ;;  %v6491_v14 = vld [vmem:[#allocation2 + $0xd8] sm:$0xf0]  ;;  %v9519_v16 = vld [vmem:[#allocation2 + $0x1cc] sm:$0xf]  ;;  %v6618_v20 = vor.u32 %v9521_v12, %v6617_v10  ;;  %v6473_v22 = vld [vmem:[#allocation2 + $0xa8] sm:$0xf] }
  0xc8   :  { %627 = vmatpush.bf16.msra.mxu2 %v6402_v45  ;;  %v6619_v17 = vld [vmem:[#allocation2 + $0x1d8] sm:$0xf0]  ;;  %v6494_v21 = vor.u32 %v9487_v13, %v6491_v14  ;;  %v9485_v25 = vld [vmem:[#allocation2 + $0xb4] sm:$0xf0]  ;;  %v6601_v26 = vld [vmem:[#allocation2 + $0x1a8] sm:$0xf] }
  0xc9   :  { %640 = vmatpush.bf16.msra.mxu3 %v6530_v48  ;;  %v6622_v23 = vor.u32 %v9519_v16, %v6619_v17  ;;  %v9517_v27 = vld [vmem:[#allocation2 + $0x1b4] sm:$0xf0]  ;;  %v9483_v28 = vld [vmem:[#allocation2 + $0xac] sm:$0xf]  ;;  %v6475_v29 = vld [vmem:[#allocation2 + $0xb8] sm:$0xf0]  ;;  %v6474_v31 = vor.u32 %v9485_v25, %v6473_v22 }
  0xca   :  { %653 = vmatpush.bf16.msrb.mxu0 %v6406_v49  ;;  %v9515_v24 = vld [vmem:[#allocation2 + $0x1ac] sm:$0xf]  ;;  %v6603_v30 = vld [vmem:[#allocation2 + $0x1b8] sm:$0xf0]  ;;  %v6602_v32 = vor.u32 %v9517_v27, %v6601_v26  ;;  %v6478_v33 = vor.u32 %v9483_v28, %v6475_v29  ;;  %v6457_v34 = vld [vmem:[#allocation2 + $0x88] sm:$0xf] }
  0xcb   :  { %666 = vmatpush.bf16.msrb.mxu1 %v6534_v53  ;;  %v9481_v35 = vld [vmem:[#allocation2 + $0x94] sm:$0xf0]  ;;  %v6585_v36 = vld [vmem:[#allocation2 + $0x188] sm:$0xf]  ;;  %v6606_v37 = vor.u32 %v9515_v24, %v6603_v30  ;;  %v9479_v39 = vld [vmem:[#allocation2 + $0x8c] sm:$0xf] }
  0xcc   :  { %628 = vmatpush.bf16.msra.mxu2 %v6386_v60  ;;  %v9513_v38 = vld [vmem:[#allocation2 + $0x194] sm:$0xf0]  ;;  %v6459_v40 = vld [vmem:[#allocation2 + $0x98] sm:$0xf0]  ;;  %v9511_v41 = vld [vmem:[#allocation2 + $0x18c] sm:$0xf]  ;;  %v6458_v43 = vor.u32 %v9481_v35, %v6457_v34 }
  0xcd   :  { %641 = vmatpush.bf16.msra.mxu3 %v6514_v0  ;;  %v6587_v42 = vld [vmem:[#allocation2 + $0x198] sm:$0xf0]  ;;  %v6586_v44 = vor.u32 %v9513_v38, %v6585_v36  ;;  %v6462_v45 = vor.u32 %v9479_v39, %v6459_v40  ;;  %v6441_v46 = vld [vmem:[#allocation2 + $0x68] sm:$0xf]  ;;  %v9477_v47 = vld [vmem:[#allocation2 + $0x74] sm:$0xf0] }
  0xce   :  { %654 = vmatpush.bf16.msrb.mxu0 %v6390_v1  ;;  %v6569_v48 = vld [vmem:[#allocation2 + $0x168] sm:$0xf]  ;;  %v6590_v49 = vor.u32 %v9511_v41, %v6587_v42  ;;  %v9509_v50 = vld [vmem:[#allocation2 + $0x174] sm:$0xf0]  ;;  %v9475_v51 = vld [vmem:[#allocation2 + $0x6c] sm:$0xf]  ;;  %v6442_v55 = vor.u32 %v9477_v47, %v6441_v46 }
  0xcf   :  { %667 = vmatpush.bf16.msrb.mxu1 %v6518_v4  ;;  %629 = vmatmul.bf16.vlgmr.msra.gmra.mxu2 %v10609_v15  ;;  %v6443_v52 = vld [vmem:[#allocation2 + $0x78] sm:$0xf0]  ;;  %v9507_v53 = vld [vmem:[#allocation2 + $0x16c] sm:$0xf]  ;;  %v6570_v56 = vor.u32 %v9509_v50, %v6569_v48  ;;  %v6425_v58 = vld [vmem:[#allocation2 + $0x48] sm:$0xf] }
  0xd0   :  { %673 = vmatpush.bf16.msrb.mxu2 %v6506_v5  ;;  %642 = vmatmul.bf16.vlgmr.msra.gmra.mxu3 %v10613_v18  ;;  %v6571_v54 = vld [vmem:[#allocation2 + $0x178] sm:$0xf0]  ;;  %v6446_v57 = vor.u32 %v9475_v51, %v6443_v52  ;;  %v9473_v59 = vld [vmem:[#allocation2 + $0x54] sm:$0xf0]  ;;  %v6553_v60 = vld [vmem:[#allocation2 + $0x148] sm:$0xf] }
  0xd1   :  { %686 = vmatpush.bf16.msrb.mxu3 %v6634_v6  ;;  %655 = vmatmul.bf16.vlgmr.msrb.gmra.mxu0 %v10609_v15  ;;  %v6574_v61 = vor.u32 %v9507_v53, %v6571_v54  ;;  %v9505_v62 = vld [vmem:[#allocation2 + $0x154] sm:$0xf0]  ;;  %v9471_v63 = vld [vmem:[#allocation2 + $0x4c] sm:$0xf]  ;;  %v6427_v0 = vld [vmem:[#allocation2 + $0x58] sm:$0xf0]  ;;  %v6426_v3 = vor.u32 %v9473_v59, %v6425_v58 }
  0xd2   :  { %699 = vmatpush.bf16.msra.mxu0 %v6510_v7  ;;  %668 = vmatmul.bf16.vlgmr.msrb.gmra.mxu1 %v10613_v18  ;;  %v9503_v1 = vld [vmem:[#allocation2 + $0x14c] sm:$0xf]  ;;  %v6555_v2 = vld [vmem:[#allocation2 + $0x158] sm:$0xf0]  ;;  %v6554_v4 = vor.u32 %v9505_v62, %v6553_v60  ;;  %v6430_v5 = vor.u32 %v9471_v63, %v6427_v0  ;;  %v6409_v6 = vld [vmem:[#allocation2 + $0x28] sm:$0xf] }
  0xd3   :  { %712 = vmatpush.bf16.msra.mxu1 %v6638_v11  ;;  %v9469_v7 = vld [vmem:[#allocation2 + $0x34] sm:$0xf0]  ;;  %v6537_v8 = vld [vmem:[#allocation2 + $0x128] sm:$0xf]  ;;  %v6558_v9 = vor.u32 %v9503_v1, %v6555_v2  ;;  %v9467_v11 = vld [vmem:[#allocation2 + $0x2c] sm:$0xf] }
  0xd4   :  { %674 = vmatpush.bf16.msrb.mxu2 %v6490_v19  ;;  %v9501_v10 = vld [vmem:[#allocation2 + $0x134] sm:$0xf0]  ;;  %v6411_v12 = vld [vmem:[#allocation2 + $0x38] sm:$0xf0]  ;;  %v9499_v13 = vld [vmem:[#allocation2 + $0x12c] sm:$0xf]  ;;  %v6410_v16 = vor.u32 %v9469_v7, %v6409_v6 }
  0xd5   :  { %687 = vmatpush.bf16.msrb.mxu3 %v6618_v20  ;;  %v6539_v14 = vld [vmem:[#allocation2 + $0x138] sm:$0xf0]  ;;  %v6538_v17 = vor.u32 %v9501_v10, %v6537_v8  ;;  %v6414_v19 = vor.u32 %v9467_v11, %v6411_v12  ;;  %v6393_v20 = vld [vmem:[#allocation2 + $0x8] sm:$0xf]  ;;  %v9497_v26 = vld [vmem:[#allocation2 + $0x114] sm:$0xf0] }
  0xd6   :  { %700 = vmatpush.bf16.msra.mxu0 %v6494_v21  ;;  %v9465_v21 = vld [vmem:[#allocation2 + $0x14] sm:$0xf0]  ;;  %v6521_v22 = vld [vmem:[#allocation2 + $0x108] sm:$0xf]  ;;  %v6542_v25 = vor.u32 %v9499_v13, %v6539_v14  ;;  %v6395_v27 = vld [vmem:[#allocation2 + $0x18] sm:$0xf0] }
  0xd7   :  { %713 = vmatpush.bf16.msra.mxu1 %v6622_v23  ;;  %v9463_v23 = vld [vmem:[#allocation2 + $0xc] sm:$0xf]  ;;  %v6523_v29 = vld [vmem:[#allocation2 + $0x118] sm:$0xf0]  ;;  %v6394_v24 = vor.u32 %v9465_v21, %v6393_v20  ;;  %v6522_v30 = vor.u32 %v9497_v26, %v6521_v22 }
  0xd8   :  { %675 = vmatpush.bf16.msrb.mxu2 %v6474_v31  ;;  %v9495_v28 = vld [vmem:[#allocation2 + $0x10c] sm:$0xf]  ;;  %v6398_v31 = vor.u32 %v9463_v23, %v6395_v27 }
  0xd9   :  { %688 = vmatpush.bf16.msrb.mxu3 %v6602_v32  ;;  %v6526_v32 = vor.u32 %v9495_v28, %v6523_v29 }
  0xda   :  { %701 = vmatpush.bf16.msra.mxu0 %v6478_v33  ;;  %v291_v33 = vld [vmem:[#allocation12] sm:$0xf] }
  0xdb   :  { %714 = vmatpush.bf16.msra.mxu1 %v6606_v37  ;;  %v294_v34 = vperm.slane %v291_v33, 1  ;;  %v293_v38 = vperm.slane %v291_v33, 0  ;;  %v296_v50 = vperm.slane %v291_v33, 3  ;;  %v295_v54 = vperm.slane %v291_v33, 2 }
  0xdc   :  { %676 = vmatpush.bf16.msrb.mxu2 %v6458_v43 }
  0xdd   :  { %689 = vmatpush.bf16.msrb.mxu3 %v6586_v44 }
  0xde   :  { %702 = vmatpush.bf16.msra.mxu0 %v6462_v45 }
  0xdf   :  { %715 = vmatpush.bf16.msra.mxu1 %v6590_v49 }
  0xe0   :  { %677 = vmatpush.bf16.msrb.mxu2 %v6442_v55 }
  0xe1   :  { %690 = vmatpush.bf16.msrb.mxu3 %v6570_v56 }
  0xe2   :  { %703 = vmatpush.bf16.msra.mxu0 %v6446_v57 }
  0xe3   :  { %716 = vmatpush.bf16.msra.mxu1 %v6574_v61 }
  0xe4   :  { %678 = vmatpush.bf16.msrb.mxu2 %v6426_v3 }
  0xe5   :  { %691 = vmatpush.bf16.msrb.mxu3 %v6554_v4 }
  0xe6   :  { %704 = vmatpush.bf16.msra.mxu0 %v6430_v5 }
  0xe7   :  { %717 = vmatpush.bf16.msra.mxu1 %v6558_v9 }
  0xe8   :  { %679 = vmatpush.bf16.msrb.mxu2 %v6410_v16 }
  0xe9   :  { %692 = vmatpush.bf16.msrb.mxu3 %v6538_v17 }
  0xea   :  { %705 = vmatpush.bf16.msra.mxu0 %v6414_v19 }
  0xeb   :  { %718 = vmatpush.bf16.msra.mxu1 %v6542_v25 }
  0xec   :  { %680 = vmatpush.bf16.msrb.mxu2 %v6394_v24 }
  0xed   :  { %693 = vmatpush.bf16.msrb.mxu3 %v6522_v30 }
  0xee   :  { %706 = vmatpush.bf16.msra.mxu0 %v6398_v31 }
  0xef   :  { %719 = vmatpush.bf16.msra.mxu1 %v6526_v32  ;;  %681 = vmatmul.bf16.vlgmr.msrb.gmra.mxu2 %v10609_v15 }
  0xf0   :  { %694 = vmatmul.bf16.vlgmr.msrb.gmra.mxu3 %v10613_v18 }
  0xf1   :  { %707 = vmatmul.bf16.vlgmr.msra.gmra.mxu0 %v10609_v15 }
  0xf2   :  { %720 = vmatmul.bf16.vlgmr.msra.gmra.mxu1 %v10613_v18 }
 0x14e   :  { %v656_v35 = vpop.f32.mrf.mxu0 }
 0x14f   :  { %v657_v36 = vadd.f32 %v656_v35, %v294_v34  ;;  %v669_v37 = vpop.f32.mrf.mxu1 }
 0x151   :  { %v670_v39 = vadd.f32 %v669_v37, %v657_v36 }
 0x152   :  { %v630_v40 = vpop.f32.mrf.mxu2 }
 0x153   :  { %vm726_vm3 = vcmp.ge.f32.partialorder %v670_v39, 0.0  ;;  %v730_v41 = vmul.f32 0.2, %v670_v39  ;;  %v631_v42 = vadd.f32 %v630_v40, %v293_v38  ;;  %v643_v43 = vpop.f32.mrf.mxu3 }
 0x155   :  { %v10623_v44 = vsel %vm726_vm3, %v670_v39, %v730_v41  ;;  %v644_v45 = vadd.f32 %v643_v43, %v631_v42 }
 0x156   :  { %v658_v46 = vpop.f32.mrf.mxu0 }
 0x157   :  { %v671_v47 = vpop.f32.mrf.mxu1  ;;  %vm725_vm4 = vcmp.ge.f32.partialorder %v644_v45, 0.0  ;;  %v729_v15 = vmul.f32 0.2, %v644_v45 }
 0x159   :  { %v10625_v18 = vsel %vm725_vm4, %v644_v45, %v729_v15 }
 0x15a   :  { %v632_v48 = vpop.f32.mrf.mxu2 }
 0x15b   :  { %v645_v49 = vpop.f32.mrf.mxu3 }
 0x16e   :  { %v708_v51 = vpop.f32.mrf.mxu0 }
 0x16f   :  { %v709_v52 = vadd.f32 %v708_v51, %v296_v50  ;;  %v721_v53 = vpop.f32.mrf.mxu1 }
 0x171   :  { %v722_v55 = vadd.f32 %v721_v53, %v709_v52 }
 0x172   :  { %v682_v57 = vpop.f32.mrf.mxu2 }
 0x173   :  { %vm728_vm5 = vcmp.ge.f32.partialorder %v722_v55, 0.0  ;;  %v732_v56 = vmul.f32 0.2, %v722_v55  ;;  %v683_v58 = vadd.f32 %v682_v57, %v295_v54  ;;  %v695_v59 = vpop.f32.mrf.mxu3 }
 0x175   :  { %v10627_v60 = vsel %vm728_vm5, %v722_v55, %v732_v56  ;;  %v696_v61 = vadd.f32 %v695_v59, %v683_v58 }
 0x176   :  { %v710_v62 = vpop.f32.mrf.mxu0 }
 0x177   :  { %v723_v63 = vpop.f32.mrf.mxu1  ;;  %vm727_vm6 = vcmp.ge.f32.partialorder %v696_v61, 0.0  ;;  %v731_v0 = vmul.f32 0.2, %v696_v61 }
 0x179   :  { %v10629_v1 = vsel %vm727_vm6, %v696_v61, %v731_v0 }
 0x17a   :  { %v684_v2 = vpop.f32.mrf.mxu2 }
 0x17b   :  { %v697_v3 = vpop.f32.mrf.mxu3 }
 0x17c   :  { %10508 = dma.done.wait [#allocation5 + $0x1], 32768 }
 0x17d   :  { %10509 = vsyncadd [#allocation5 + $0x1], 4294934528  ;;  %v6865_v4 = vld [vmem:[#allocation3 + $0x1c0] sm:$0xf] }
 0x17e   :  { %v9586_v5 = vld [vmem:[#allocation3 + $0x1dc] sm:$0xf0] }
 0x17f   :  { %v7121_v6 = vld [vmem:[#allocation3 + $0x3c0] sm:$0xf]  ;;  %v6866_v7 = vor.u32 %v9586_v5, %v6865_v4 }
 0x180   :  { %v9650_v8 = vld [vmem:[#allocation3 + $0x3dc] sm:$0xf0] }
 0x181   :  { %v7377_v9 = vld [vmem:[#allocation3 + $0x5c0] sm:$0xf]  ;;  %v7122_v11 = vor.u32 %v9650_v8, %v7121_v6  ;;  %2299 = vmatpush.bf16.msra.mxu2 %v6866_v7 }
 0x182   :  { %v9714_v10 = vld [vmem:[#allocation3 + $0x5dc] sm:$0xf0] }
 0x183   :  { %v7378_v12 = vor.u32 %v9714_v10, %v7377_v9  ;;  %v7633_v13 = vld [vmem:[#allocation3 + $0x7c0] sm:$0xf]  ;;  %2312 = vmatpush.bf16.msra.mxu3 %v7122_v11 }
 0x184   :  { %v9778_v14 = vld [vmem:[#allocation3 + $0x7dc] sm:$0xf0] }
 0x185   :  { %v6833_v16 = vld [vmem:[#allocation3 + $0x180] sm:$0xf]  ;;  %v7634_v17 = vor.u32 %v9778_v14, %v7633_v13  ;;  %2325 = vmatpush.bf16.msrb.mxu0 %v7378_v12 }
 0x186   :  { %v9578_v19 = vld [vmem:[#allocation3 + $0x19c] sm:$0xf0] }
 0x187   :  { %v7089_v20 = vld [vmem:[#allocation3 + $0x380] sm:$0xf]  ;;  %v6834_v22 = vor.u32 %v9578_v19, %v6833_v16  ;;  %2338 = vmatpush.bf16.msrb.mxu1 %v7634_v17 }
 0x188   :  { %v9642_v21 = vld [vmem:[#allocation3 + $0x39c] sm:$0xf0] }
 0x189   :  { %v7090_v25 = vor.u32 %v9642_v21, %v7089_v20  ;;  %v7345_v26 = vld [vmem:[#allocation3 + $0x580] sm:$0xf]  ;;  %2300 = vmatpush.bf16.msra.mxu2 %v6834_v22 }
 0x18a   :  { %v9706_v23 = vld [vmem:[#allocation3 + $0x59c] sm:$0xf0] }
 0x18b   :  { %v7601_v27 = vld [vmem:[#allocation3 + $0x780] sm:$0xf]  ;;  %v7346_v28 = vor.u32 %v9706_v23, %v7345_v26  ;;  %2313 = vmatpush.bf16.msra.mxu3 %v7090_v25 }
 0x18c   :  { %v9770_v29 = vld [vmem:[#allocation3 + $0x79c] sm:$0xf0] }
 0x18d   :  { %v6801_v24 = vld [vmem:[#allocation3 + $0x140] sm:$0xf]  ;;  %v7602_v31 = vor.u32 %v9770_v29, %v7601_v27  ;;  %2326 = vmatpush.bf16.msrb.mxu0 %v7346_v28 }
 0x18e   :  { %v9570_v30 = vld [vmem:[#allocation3 + $0x15c] sm:$0xf0] }
 0x18f   :  { %v7057_v32 = vld [vmem:[#allocation3 + $0x340] sm:$0xf]  ;;  %v6802_v35 = vor.u32 %v9570_v30, %v6801_v24  ;;  %2339 = vmatpush.bf16.msrb.mxu1 %v7602_v31 }
 0x190   :  { %v9634_v33 = vld [vmem:[#allocation3 + $0x35c] sm:$0xf0] }
 0x191   :  { %v7313_v34 = vld [vmem:[#allocation3 + $0x540] sm:$0xf]  ;;  %v7058_v39 = vor.u32 %v9634_v33, %v7057_v32  ;;  %2301 = vmatpush.bf16.msra.mxu2 %v6802_v35 }
 0x192   :  { %v9698_v36 = vld [vmem:[#allocation3 + $0x55c] sm:$0xf0] }
 0x193   :  { %v7569_v37 = vld [vmem:[#allocation3 + $0x740] sm:$0xf]  ;;  %v7314_v40 = vor.u32 %v9698_v36, %v7313_v34  ;;  %2314 = vmatpush.bf16.msra.mxu3 %v7058_v39  ;;  %v6867_v39 = vld [vmem:[#allocation3 + $0x1e0] sm:$0xf0] }
 0x194   :  { %v9762_v38 = vld [vmem:[#allocation3 + $0x75c] sm:$0xf0] }
 0x195   :  { %v6769_v41 = vld [vmem:[#allocation3 + $0x100] sm:$0xf]  ;;  %v7570_v45 = vor.u32 %v9762_v38, %v7569_v37  ;;  %2327 = vmatpush.bf16.msrb.mxu0 %v7314_v40  ;;  %v9582_v38 = vld [vmem:[#allocation3 + $0x1c4] sm:$0xf] }
 0x196   :  { %v9562_v42 = vld [vmem:[#allocation3 + $0x11c] sm:$0xf0]  ;;  %v9646_v40 = vld [vmem:[#allocation3 + $0x3c4] sm:$0xf] }
 0x197   :  { %v7025_v43 = vld [vmem:[#allocation3 + $0x300] sm:$0xf]  ;;  %v6770_v50 = vor.u32 %v9562_v42, %v6769_v41  ;;  %2340 = vmatpush.bf16.msrb.mxu1 %v7570_v45  ;;  %v7123_v42 = vld [vmem:[#allocation3 + $0x3e0] sm:$0xf0] }
 0x198   :  { %v9626_v46 = vld [vmem:[#allocation3 + $0x31c] sm:$0xf0]  ;;  %v7379_v45 = vld [vmem:[#allocation3 + $0x5e0] sm:$0xf0] }
 0x199   :  { %v7281_v47 = vld [vmem:[#allocation3 + $0x500] sm:$0xf]  ;;  %v7026_v51 = vor.u32 %v9626_v46, %v7025_v43  ;;  %2302 = vmatpush.bf16.msra.mxu2 %v6770_v50  ;;  %v9710_v43 = vld [vmem:[#allocation3 + $0x5c4] sm:$0xf]  ;;  %v6870_v50 = vor.u32 %v9582_v38, %v6867_v39 }
 0x19a   :  { %v9690_v15 = vld [vmem:[#allocation3 + $0x51c] sm:$0xf0] }
 0x19b   :  { %v7537_v48 = vld [vmem:[#allocation3 + $0x700] sm:$0xf]  ;;  %v7282_v52 = vor.u32 %v9690_v15, %v7281_v47  ;;  %2315 = vmatpush.bf16.msra.mxu3 %v7026_v51  ;;  %v9774_v15 = vld [vmem:[#allocation3 + $0x7c4] sm:$0xf]  ;;  %v7126_v51 = vor.u32 %v9646_v40, %v7123_v42 }
 0x19c   :  { %v9754_v49 = vld [vmem:[#allocation3 + $0x71c] sm:$0xf0]  ;;  %v6707_v42 = vld [vmem:[#allocation3 + $0xa0] sm:$0xf0] }
 0x19d   :  { %v6737_v53 = vld [vmem:[#allocation3 + $0xc0] sm:$0xf]  ;;  %v7538_v56 = vor.u32 %v9754_v49, %v7537_v48  ;;  %2328 = vmatpush.bf16.msrb.mxu0 %v7282_v52  ;;  %v7635_v48 = vld [vmem:[#allocation3 + $0x7e0] sm:$0xf0]  ;;  %v7382_v52 = vor.u32 %v9710_v43, %v7379_v45 }
 0x19e   :  { %v9554_v54 = vld [vmem:[#allocation3 + $0xdc] sm:$0xf0]  ;;  %v9606_v43 = vld [vmem:[#allocation3 + $0x284] sm:$0xf] }
 0x19f   :  { %v6993_v55 = vld [vmem:[#allocation3 + $0x2c0] sm:$0xf]  ;;  %v6738_v63 = vor.u32 %v9554_v54, %v6737_v53  ;;  %2341 = vmatpush.bf16.msrb.mxu1 %v7538_v56  ;;  %v9574_v53 = vld [vmem:[#allocation3 + $0x184] sm:$0xf]  ;;  %v7638_v56 = vor.u32 %v9774_v15, %v7635_v48 }
 0x1a0   :  { %v9618_v57 = vld [vmem:[#allocation3 + $0x2dc] sm:$0xf0]  ;;  %v6835_v54 = vld [vmem:[#allocation3 + $0x1a0] sm:$0xf0] }
 0x1a1   :  { %v7249_v58 = vld [vmem:[#allocation3 + $0x4c0] sm:$0xf]  ;;  %v6994_v0 = vor.u32 %v9618_v57, %v6993_v55  ;;  %2303 = vmatpush.bf16.msra.mxu2 %v6738_v63  ;;  %v9638_v55 = vld [vmem:[#allocation3 + $0x384] sm:$0xf] }
 0x1a2   :  { %v9682_v59 = vld [vmem:[#allocation3 + $0x4dc] sm:$0xf0]  ;;  %v7091_v57 = vld [vmem:[#allocation3 + $0x3a0] sm:$0xf0] }
 0x1a3   :  { %v7505_v61 = vld [vmem:[#allocation3 + $0x6c0] sm:$0xf]  ;;  %v7250_v2 = vor.u32 %v9682_v59, %v7249_v58  ;;  %2316 = vmatpush.bf16.msra.mxu3 %v6994_v0  ;;  %v9702_v58 = vld [vmem:[#allocation3 + $0x584] sm:$0xf]  ;;  %v10637_v0 = vpack.c.bf16 %v10623_v44, %v10623_v44 }
 0x1a4   :  { %v9746_v62 = vld [vmem:[#allocation3 + $0x6dc] sm:$0xf0]  ;;  %v7347_v59 = vld [vmem:[#allocation3 + $0x5a0] sm:$0xf0] }
 0x1a5   :  { %v6705_v3 = vld [vmem:[#allocation3 + $0x80] sm:$0xf]  ;;  %v7506_v6 = vor.u32 %v9746_v62, %v7505_v61  ;;  %2329 = vmatpush.bf16.msrb.mxu0 %v7250_v2  ;;  %v10633_v61 = vpack.c.bf16 %v10625_v18, %v10625_v18  ;;  %v9766_v62 = vld [vmem:[#allocation3 + $0x784] sm:$0xf]  ;;  %v10641_v2 = vpack.c.bf16 %v10629_v1, %v10629_v1  ;;  %v7094_v18 = vor.u32 %v9638_v55, %v7091_v57 }
 0x1a6   :  { %v9546_v4 = vld [vmem:[#allocation3 + $0x9c] sm:$0xf0]  ;;  %v7603_v63 = vld [vmem:[#allocation3 + $0x7a0] sm:$0xf0] }
 0x1a7   :  { %v6961_v5 = vld [vmem:[#allocation3 + $0x280] sm:$0xf]  ;;  %v6706_v12 = vor.u32 %v9546_v4, %v6705_v3  ;;  %2342 = vmatpush.bf16.msrb.mxu1 %v7506_v6  ;;  %v6838_v3 = vor.u32 %v9574_v53, %v6835_v54  ;;  %v10645_v4 = vpack.c.bf16 %v10627_v60, %v10627_v60  ;;  %v9566_v6 = vld [vmem:[#allocation3 + $0x144] sm:$0xf]  ;;  %v7606_v44 = vor.u32 %v9766_v62, %v7603_v63 }
 0x1a8   :  { %v9610_v7 = vld [vmem:[#allocation3 + $0x29c] sm:$0xf0]  ;;  %v7315_v1 = vld [vmem:[#allocation3 + $0x560] sm:$0xf0] }
 0x1a9   :  { %v7217_v8 = vld [vmem:[#allocation3 + $0x480] sm:$0xf]  ;;  %v6962_v13 = vor.u32 %v9610_v7, %v6961_v5  ;;  %2304 = vmatpush.bf16.msra.mxu2 %v6706_v12  ;;  %v7350_v5 = vor.u32 %v9702_v58, %v7347_v59  ;;  %v6803_v7 = vld [vmem:[#allocation3 + $0x160] sm:$0xf0] }
 0x1aa   :  { %v9674_v9 = vld [vmem:[#allocation3 + $0x49c] sm:$0xf0]  ;;  %v7571_v12 = vld [vmem:[#allocation3 + $0x760] sm:$0xf0]  ;;  %v6806_v60 = vor.u32 %v9566_v6, %v6803_v7 }
 0x1ab   :  { %v7473_v10 = vld [vmem:[#allocation3 + $0x680] sm:$0xf]  ;;  %v7218_v14 = vor.u32 %v9674_v9, %v7217_v8  ;;  %2317 = vmatpush.bf16.msra.mxu3 %v6962_v13  ;;  %v9630_v8 = vld [vmem:[#allocation3 + $0x344] sm:$0xf] }
 0x1ac   :  { %v9738_v11 = vld [vmem:[#allocation3 + $0x69c] sm:$0xf0]  ;;  %v7059_v9 = vld [vmem:[#allocation3 + $0x360] sm:$0xf0] }
 0x1ad   :  { %v6673_v16 = vld [vmem:[#allocation3 + $0x40] sm:$0xf]  ;;  %v7474_v20 = vor.u32 %v9738_v11, %v7473_v10  ;;  %2330 = vmatpush.bf16.msrb.mxu0 %v7218_v14  ;;  %v9694_v10 = vld [vmem:[#allocation3 + $0x544] sm:$0xf]  ;;  %v7062_v13 = vor.u32 %v9630_v8, %v7059_v9 }
 0x1ae   :  { %v9538_v17 = vld [vmem:[#allocation3 + $0x5c] sm:$0xf0]  ;;  %v9758_v11 = vld [vmem:[#allocation3 + $0x744] sm:$0xf]  ;;  %v7318_v14 = vor.u32 %v9694_v10, %v7315_v1 }
 0x1af   :  { %v6929_v19 = vld [vmem:[#allocation3 + $0x240] sm:$0xf]  ;;  %v6674_v27 = vor.u32 %v9538_v17, %v6673_v16  ;;  %2343 = vmatpush.bf16.msrb.mxu1 %v7474_v20  ;;  %v9558_v16 = vld [vmem:[#allocation3 + $0x104] sm:$0xf]  ;;  %v7574_v20 = vor.u32 %v9758_v11, %v7571_v12 }
 0x1b0   :  { %v9602_v21 = vld [vmem:[#allocation3 + $0x25c] sm:$0xf0]  ;;  %v6771_v17 = vld [vmem:[#allocation3 + $0x120] sm:$0xf0] }
 0x1b1   :  { %v7185_v22 = vld [vmem:[#allocation3 + $0x440] sm:$0xf]  ;;  %v6930_v24 = vor.u32 %v9602_v21, %v6929_v19  ;;  %2305 = vmatpush.bf16.msra.mxu2 %v6674_v27  ;;  %v9622_v19 = vld [vmem:[#allocation3 + $0x304] sm:$0xf]  ;;  %v6774_v27 = vor.u32 %v9558_v16, %v6771_v17  ;;  %v9651_v17 = vld [vmem:[#allocation3 + $0x3e4] sm:$0xf0] }
 0x1b2   :  { %v9666_v25 = vld [vmem:[#allocation3 + $0x45c] sm:$0xf0]  ;;  %v7027_v21 = vld [vmem:[#allocation3 + $0x320] sm:$0xf0] }
 0x1b3   :  { %v7441_v26 = vld [vmem:[#allocation3 + $0x640] sm:$0xf]  ;;  %v7186_v30 = vor.u32 %v9666_v25, %v7185_v22  ;;  %2318 = vmatpush.bf16.msra.mxu3 %v6930_v24  ;;  %v9686_v22 = vld [vmem:[#allocation3 + $0x504] sm:$0xf] }
 0x1b4   :  { %v9730_v23 = vld [vmem:[#allocation3 + $0x65c] sm:$0xf0]  ;;  %v7283_v25 = vld [vmem:[#allocation3 + $0x520] sm:$0xf0] }
 0x1b5   :  { %v6641_v28 = vld [vmem:[#allocation3] sm:$0xf]  ;;  %v7442_v34 = vor.u32 %v9730_v23, %v7441_v26  ;;  %2331 = vmatpush.bf16.msrb.mxu0 %v7186_v30  ;;  %v9750_v26 = vld [vmem:[#allocation3 + $0x704] sm:$0xf] }
 0x1b6   :  { %v9530_v29 = vld [vmem:[#allocation3 + $0x1c] sm:$0xf0]  ;;  %v7539_v23 = vld [vmem:[#allocation3 + $0x720] sm:$0xf0] }
 0x1b7   :  { %v6897_v31 = vld [vmem:[#allocation3 + $0x200] sm:$0xf]  ;;  %v6642_v41 = vor.u32 %v9530_v29, %v6641_v28  ;;  %2344 = vmatpush.bf16.msrb.mxu1 %v7442_v34  ;;  %v7030_v28 = vor.u32 %v9622_v19, %v7027_v21  ;;  %v7286_v29 = vor.u32 %v9686_v22, %v7283_v25  ;;  %v9550_v24 = vld [vmem:[#allocation3 + $0xc4] sm:$0xf]  ;;  %v7385_v19 = vld [vmem:[#allocation3 + $0x5c8] sm:$0xf] }
 0x1b8   :  { %v9594_v32 = vld [vmem:[#allocation3 + $0x21c] sm:$0xf0]  ;;  %v6739_v30 = vld [vmem:[#allocation3 + $0xe0] sm:$0xf0]  ;;  %v7641_v25 = vld [vmem:[#allocation3 + $0x7c8] sm:$0xf] }
 0x1b9   :  { %v7153_v33 = vld [vmem:[#allocation3 + $0x400] sm:$0xf]  ;;  %v6898_v46 = vor.u32 %v9594_v32, %v6897_v31  ;;  %2306 = vmatpush.bf16.msra.mxu2 %v6642_v41  ;;  %v9614_v31 = vld [vmem:[#allocation3 + $0x2c4] sm:$0xf]  ;;  %v7542_v32 = vor.u32 %v9750_v26, %v7539_v23  ;;  %v6742_v38 = vor.u32 %v9550_v24, %v6739_v30  ;;  %v9779_v26 = vld [vmem:[#allocation3 + $0x7e4] sm:$0xf0] }
 0x1ba   :  { %v9658_v35 = vld [vmem:[#allocation3 + $0x41c] sm:$0xf0]  ;;  %v9678_v34 = vld [vmem:[#allocation3 + $0x4c4] sm:$0xf]  ;;  %v6841_v24 = vld [vmem:[#allocation3 + $0x188] sm:$0xf] }
 0x1bb   :  { %v7409_v36 = vld [vmem:[#allocation3 + $0x600] sm:$0xf]  ;;  %v7154_v47 = vor.u32 %v9658_v35, %v7153_v33  ;;  %2319 = vmatpush.bf16.msra.mxu3 %v6898_v46  ;;  %v6995_v33 = vld [vmem:[#allocation3 + $0x2e0] sm:$0xf0]  ;;  %v9579_v30 = vld [vmem:[#allocation3 + $0x1a4] sm:$0xf0] }
 0x1bc   :  { %v9722_v37 = vld [vmem:[#allocation3 + $0x61c] sm:$0xf0]  ;;  %2307 = vmatmul.bf16.vlgmr.msra.gmra.mxu2 %v10633_v61  ;;  %v7251_v35 = vld [vmem:[#allocation3 + $0x4e0] sm:$0xf0]  ;;  %v6998_v39 = vor.u32 %v9614_v31, %v6995_v33  ;;  %v7097_v31 = vld [vmem:[#allocation3 + $0x388] sm:$0xf] }
 0x1bd   :  { %v7410_v49 = vor.u32 %v9722_v37, %v7409_v36  ;;  %2332 = vmatpush.bf16.msrb.mxu0 %v7154_v47  ;;  %2351 = vmatpush.bf16.msrb.mxu2 %v6870_v50  ;;  %v9742_v36 = vld [vmem:[#allocation3 + $0x6c4] sm:$0xf]  ;;  %v7254_v40 = vor.u32 %v9678_v34, %v7251_v35  ;;  %v9643_v33 = vld [vmem:[#allocation3 + $0x3a4] sm:$0xf0] }
 0x1be   :  { %2320 = vmatmul.bf16.vlgmr.msra.gmra.mxu3 %v10637_v0  ;;  %v7507_v37 = vld [vmem:[#allocation3 + $0x6e0] sm:$0xf0]  ;;  %v7353_v34 = vld [vmem:[#allocation3 + $0x588] sm:$0xf] }
 0x1bf   :  { %2345 = vmatpush.bf16.msrb.mxu1 %v7410_v49  ;;  %2364 = vmatpush.bf16.msrb.mxu3 %v7126_v51  ;;  %v9542_v41 = vld [vmem:[#allocation3 + $0x84] sm:$0xf]  ;;  %v7510_v45 = vor.u32 %v9742_v36, %v7507_v37  ;;  %v9707_v35 = vld [vmem:[#allocation3 + $0x5a4] sm:$0xf0] }
 0x1c0   :  { %2333 = vmatmul.bf16.vlgmr.msrb.gmra.mxu0 %v10641_v2  ;;  %v6963_v46 = vld [vmem:[#allocation3 + $0x2a0] sm:$0xf0]  ;;  %v6710_v50 = vor.u32 %v9542_v41, %v6707_v42  ;;  %v7609_v36 = vld [vmem:[#allocation3 + $0x788] sm:$0xf] }
 0x1c1   :  { %2377 = vmatpush.bf16.msra.mxu0 %v7382_v52  ;;  %2352 = vmatpush.bf16.msrb.mxu2 %v6838_v3  ;;  %v9670_v47 = vld [vmem:[#allocation3 + $0x484] sm:$0xf]  ;;  %v6966_v51 = vor.u32 %v9606_v43, %v6963_v46  ;;  %v9771_v37 = vld [vmem:[#allocation3 + $0x7a4] sm:$0xf0] }
 0x1c2   :  { %2346 = vmatmul.bf16.vlgmr.msrb.gmra.mxu1 %v10645_v4  ;;  %v7219_v15 = vld [vmem:[#allocation3 + $0x4a0] sm:$0xf0]  ;;  %v6809_v41 = vld [vmem:[#allocation3 + $0x148] sm:$0xf] }
 0x1c3   :  { %2390 = vmatpush.bf16.msra.mxu1 %v7638_v56  ;;  %2365 = vmatpush.bf16.msrb.mxu3 %v7094_v18  ;;  %v9734_v48 = vld [vmem:[#allocation3 + $0x684] sm:$0xf]  ;;  %v7222_v52 = vor.u32 %v9670_v47, %v7219_v15  ;;  %v9571_v42 = vld [vmem:[#allocation3 + $0x164] sm:$0xf0] }
 0x1c4   :  { %v7475_v49 = vld [vmem:[#allocation3 + $0x6a0] sm:$0xf0]  ;;  %v7065_v43 = vld [vmem:[#allocation3 + $0x348] sm:$0xf] }
 0x1c5   :  { %2378 = vmatpush.bf16.msra.mxu0 %v7350_v5  ;;  %2353 = vmatpush.bf16.msrb.mxu2 %v6806_v60  ;;  %v9534_v53 = vld [vmem:[#allocation3 + $0x44] sm:$0xf]  ;;  %v7478_v56 = vor.u32 %v9734_v48, %v7475_v49  ;;  %v6873_v60 = vld [vmem:[#allocation3 + $0x1c8] sm:$0xf] }
 0x1c6   :  { %v6675_v54 = vld [vmem:[#allocation3 + $0x60] sm:$0xf0]  ;;  %v9635_v46 = vld [vmem:[#allocation3 + $0x364] sm:$0xf0] }
 0x1c7   :  { %2391 = vmatpush.bf16.msra.mxu1 %v7606_v44  ;;  %2366 = vmatpush.bf16.msrb.mxu3 %v7062_v13  ;;  %v9598_v55 = vld [vmem:[#allocation3 + $0x244] sm:$0xf]  ;;  %v6678_v3 = vor.u32 %v9534_v53, %v6675_v54  ;;  %v9587_v13 = vld [vmem:[#allocation3 + $0x1e4] sm:$0xf0] }
 0x1c8   :  { %v6931_v57 = vld [vmem:[#allocation3 + $0x260] sm:$0xf0]  ;;  %v7321_v47 = vld [vmem:[#allocation3 + $0x548] sm:$0xf] }
 0x1c9   :  { %2379 = vmatpush.bf16.msra.mxu0 %v7318_v14  ;;  %2354 = vmatpush.bf16.msrb.mxu2 %v6774_v27  ;;  %v9662_v58 = vld [vmem:[#allocation3 + $0x444] sm:$0xf]  ;;  %v6934_v6 = vor.u32 %v9598_v55, %v6931_v57  ;;  %v7129_v14 = vld [vmem:[#allocation3 + $0x3c8] sm:$0xf]  ;;  %v6874_v27 = vor.u32 %v9587_v13, %v6873_v60 }
 0x1ca   :  { %v7187_v59 = vld [vmem:[#allocation3 + $0x460] sm:$0xf0]  ;;  %v9699_v15 = vld [vmem:[#allocation3 + $0x564] sm:$0xf0] }
 0x1cb   :  { %2392 = vmatpush.bf16.msra.mxu1 %v7574_v20  ;;  %2367 = vmatpush.bf16.msrb.mxu3 %v7030_v28  ;;  %v9726_v62 = vld [vmem:[#allocation3 + $0x644] sm:$0xf]  ;;  %v7190_v7 = vor.u32 %v9662_v58, %v7187_v59  ;;  %v9715_v20 = vld [vmem:[#allocation3 + $0x5e4] sm:$0xf0]  ;;  %v7130_v28 = vor.u32 %v9651_v17, %v7129_v14 }
 0x1cc   :  { %v7443_v63 = vld [vmem:[#allocation3 + $0x660] sm:$0xf0]  ;;  %v7577_v48 = vld [vmem:[#allocation3 + $0x748] sm:$0xf] }
 0x1cd   :  { %2380 = vmatpush.bf16.msra.mxu0 %v7286_v29  ;;  %2355 = vmatpush.bf16.msrb.mxu2 %v6742_v38  ;;  %v9526_v18 = vld [vmem:[#allocation3 + $0x4] sm:$0xf]  ;;  %v7446_v10 = vor.u32 %v9726_v62, %v7443_v63  ;;  %v7386_v29 = vor.u32 %v9715_v20, %v7385_v19  ;;  %v6842_v38 = vor.u32 %v9579_v30, %v6841_v24  ;;  %v9763_v49 = vld [vmem:[#allocation3 + $0x764] sm:$0xf0] }
 0x1ce   :  { %v6643_v5 = vld [vmem:[#allocation3 + $0x20] sm:$0xf0]  ;;  %v6777_v53 = vld [vmem:[#allocation3 + $0x108] sm:$0xf] }
 0x1cf   :  { %2393 = vmatpush.bf16.msra.mxu1 %v7542_v32  ;;  %2368 = vmatpush.bf16.msrb.mxu3 %v6998_v39  ;;  %v9590_v8 = vld [vmem:[#allocation3 + $0x204] sm:$0xf]  ;;  %v6646_v16 = vor.u32 %v9526_v18, %v6643_v5  ;;  %v7642_v32 = vor.u32 %v9779_v26, %v7641_v25  ;;  %v7098_v39 = vor.u32 %v9643_v33, %v7097_v31  ;;  %v9563_v54 = vld [vmem:[#allocation3 + $0x124] sm:$0xf0] }
 0x1d0   :  { %v6899_v44 = vld [vmem:[#allocation3 + $0x220] sm:$0xf0]  ;;  %v7033_v55 = vld [vmem:[#allocation3 + $0x308] sm:$0xf] }
 0x1d1   :  { %2381 = vmatpush.bf16.msra.mxu0 %v7254_v40  ;;  %2356 = vmatpush.bf16.msrb.mxu2 %v6710_v50  ;;  %v9654_v9 = vld [vmem:[#allocation3 + $0x404] sm:$0xf]  ;;  %v6902_v21 = vor.u32 %v9590_v8, %v6899_v44  ;;  %v7354_v40 = vor.u32 %v9707_v35, %v7353_v34  ;;  %v6810_v50 = vor.u32 %v9571_v42, %v6809_v41  ;;  %v9627_v57 = vld [vmem:[#allocation3 + $0x324] sm:$0xf0] }
 0x1d2   :  { %v7155_v1 = vld [vmem:[#allocation3 + $0x420] sm:$0xf0]  ;;  %v7289_v58 = vld [vmem:[#allocation3 + $0x508] sm:$0xf]  ;;  %v7034_v18 = vor.u32 %v9627_v57, %v7033_v55  ;;  %v9711_v55 = vld [vmem:[#allocation3 + $0x5cc] sm:$0xf] }
 0x1d3   :  { %2394 = vmatpush.bf16.msra.mxu1 %v7510_v45  ;;  %2369 = vmatpush.bf16.msrb.mxu3 %v6966_v51  ;;  %v9718_v11 = vld [vmem:[#allocation3 + $0x604] sm:$0xf]  ;;  %v7158_v22 = vor.u32 %v9654_v9, %v7155_v1  ;;  %v7610_v45 = vor.u32 %v9771_v37, %v7609_v36  ;;  %v7066_v51 = vor.u32 %v9635_v46, %v7065_v43  ;;  %v9691_v59 = vld [vmem:[#allocation3 + $0x524] sm:$0xf0] }
 0x1d4   :  { %v7411_v12 = vld [vmem:[#allocation3 + $0x620] sm:$0xf0]  ;;  %v7545_v62 = vld [vmem:[#allocation3 + $0x708] sm:$0xf]  ;;  %v7290_v5 = vor.u32 %v9691_v59, %v7289_v58  ;;  %v9775_v59 = vld [vmem:[#allocation3 + $0x7cc] sm:$0xf] }
 0x1d5   :  { %2382 = vmatpush.bf16.msra.mxu0 %v7222_v52  ;;  %2357 = vmatpush.bf16.msrb.mxu2 %v6678_v3  ;;  %v7414_v23 = vor.u32 %v9718_v11, %v7411_v12  ;;  %v7322_v52 = vor.u32 %v9699_v15, %v7321_v47  ;;  %v9755_v63 = vld [vmem:[#allocation3 + $0x724] sm:$0xf0]  ;;  %v6778_v3 = vor.u32 %v9563_v54, %v6777_v53  ;;  %v7131_v54 = vld [vmem:[#allocation3 + $0x3e8] sm:$0xf0] }
 0x1d6   :  { %v7001_v8 = vld [vmem:[#allocation3 + $0x2c8] sm:$0xf]  ;;  %v7546_v44 = vor.u32 %v9755_v63, %v7545_v62  ;;  %v7643_v62 = vld [vmem:[#allocation3 + $0x7e8] sm:$0xf0] }
 0x1d7   :  { %2395 = vmatpush.bf16.msra.mxu1 %v7478_v56  ;;  %2370 = vmatpush.bf16.msrb.mxu3 %v6934_v6  ;;  %v7578_v56 = vor.u32 %v9763_v49, %v7577_v48  ;;  %v6745_v6 = vld [vmem:[#allocation3 + $0xc8] sm:$0xf] }
 0x1d8   :  { %v9619_v9 = vld [vmem:[#allocation3 + $0x2e4] sm:$0xf0] }
 0x1d9   :  { %2383 = vmatpush.bf16.msra.mxu0 %v7190_v7  ;;  %2358 = vmatpush.bf16.msrb.mxu2 %v6646_v16  ;;  %v9555_v7 = vld [vmem:[#allocation3 + $0xe4] sm:$0xf0]  ;;  %v7002_v13 = vor.u32 %v9619_v9, %v7001_v8  ;;  %v9639_v8 = vld [vmem:[#allocation3 + $0x38c] sm:$0xf] }
 0x1da   :  { %v9683_v1 = vld [vmem:[#allocation3 + $0x4e4] sm:$0xf0]  ;;  %v6746_v60 = vor.u32 %v9555_v7, %v6745_v6  ;;  %v9575_v6 = vld [vmem:[#allocation3 + $0x18c] sm:$0xf] }
 0x1db   :  { %2396 = vmatpush.bf16.msra.mxu1 %v7446_v10  ;;  %2371 = vmatpush.bf16.msrb.mxu3 %v6902_v21  ;;  %v7257_v10 = vld [vmem:[#allocation3 + $0x4c8] sm:$0xf]  ;;  %v6843_v7 = vld [vmem:[#allocation3 + $0x1a8] sm:$0xf0] }
 0x1dc   :  { %2359 = vmatmul.bf16.vlgmr.msrb.gmra.mxu2 %v10633_v61  ;;  %v7513_v11 = vld [vmem:[#allocation3 + $0x6c8] sm:$0xf]  ;;  %v7258_v14 = vor.u32 %v9683_v1, %v7257_v10  ;;  %v7099_v9 = vld [vmem:[#allocation3 + $0x3a8] sm:$0xf0] }
 0x1dd   :  { %2384 = vmatpush.bf16.msra.mxu0 %v7158_v22  ;;  %2403 = vmatpush.bf16.msra.mxu2 %v6874_v27  ;;  %v9747_v12 = vld [vmem:[#allocation3 + $0x6e4] sm:$0xf0]  ;;  %v9703_v10 = vld [vmem:[#allocation3 + $0x58c] sm:$0xf] }
 0x1de   :  { %2372 = vmatmul.bf16.vlgmr.msrb.gmra.mxu3 %v10637_v0  ;;  %v6713_v16 = vld [vmem:[#allocation3 + $0x88] sm:$0xf]  ;;  %v7514_v20 = vor.u32 %v9747_v12, %v7513_v11  ;;  %v7355_v1 = vld [vmem:[#allocation3 + $0x5a8] sm:$0xf0] }
 0x1df   :  { %2397 = vmatpush.bf16.msra.mxu1 %v7414_v23  ;;  %2416 = vmatpush.bf16.msra.mxu3 %v7130_v28  ;;  %v9547_v17 = vld [vmem:[#allocation3 + $0xa4] sm:$0xf0]  ;;  %v9767_v11 = vld [vmem:[#allocation3 + $0x78c] sm:$0xf] }
 0x1e0   :  { %2385 = vmatmul.bf16.vlgmr.msra.gmra.mxu0 %v10641_v2  ;;  %v6969_v19 = vld [vmem:[#allocation3 + $0x288] sm:$0xf]  ;;  %v6714_v27 = vor.u32 %v9547_v17, %v6713_v16  ;;  %v7611_v12 = vld [vmem:[#allocation3 + $0x7a8] sm:$0xf0] }
 0x1e1   :  { %2429 = vmatpush.bf16.msrb.mxu0 %v7386_v29  ;;  %2404 = vmatpush.bf16.msra.mxu2 %v6842_v38  ;;  %v9611_v21 = vld [vmem:[#allocation3 + $0x2a4] sm:$0xf0]  ;;  %v9567_v16 = vld [vmem:[#allocation3 + $0x14c] sm:$0xf] }
 0x1e2   :  { %2398 = vmatmul.bf16.vlgmr.msra.gmra.mxu1 %v10645_v4  ;;  %v7225_v22 = vld [vmem:[#allocation3 + $0x488] sm:$0xf]  ;;  %v6970_v28 = vor.u32 %v9611_v21, %v6969_v19  ;;  %v6811_v17 = vld [vmem:[#allocation3 + $0x168] sm:$0xf0] }
 0x1e3   :  { %2442 = vmatpush.bf16.msrb.mxu1 %v7642_v32  ;;  %2417 = vmatpush.bf16.msra.mxu3 %v7098_v39  ;;  %v9675_v25 = vld [vmem:[#allocation3 + $0x4a4] sm:$0xf0]  ;;  %v9631_v19 = vld [vmem:[#allocation3 + $0x34c] sm:$0xf] }
 0x1e4   :  { %v7481_v26 = vld [vmem:[#allocation3 + $0x688] sm:$0xf]  ;;  %v7226_v29 = vor.u32 %v9675_v25, %v7225_v22  ;;  %v7067_v21 = vld [vmem:[#allocation3 + $0x368] sm:$0xf0] }
 0x1e5   :  { %2430 = vmatpush.bf16.msrb.mxu0 %v7354_v40  ;;  %2405 = vmatpush.bf16.msra.mxu2 %v6810_v50  ;;  %v9739_v23 = vld [vmem:[#allocation3 + $0x6a4] sm:$0xf0]  ;;  %v9583_v50 = vld [vmem:[#allocation3 + $0x1cc] sm:$0xf] }
 0x1e6   :  { %v6681_v24 = vld [vmem:[#allocation3 + $0x48] sm:$0xf]  ;;  %v7482_v32 = vor.u32 %v9739_v23, %v7481_v26  ;;  %v9695_v22 = vld [vmem:[#allocation3 + $0x54c] sm:$0xf] }
 0x1e7   :  { %2443 = vmatpush.bf16.msrb.mxu1 %v7610_v45  ;;  %2418 = vmatpush.bf16.msra.mxu3 %v7066_v51  ;;  %v9539_v30 = vld [vmem:[#allocation3 + $0x64] sm:$0xf0]  ;;  %v6875_v51 = vld [vmem:[#allocation3 + $0x1e8] sm:$0xf0] }
 0x1e8   :  { %v6937_v31 = vld [vmem:[#allocation3 + $0x248] sm:$0xf]  ;;  %v6682_v38 = vor.u32 %v9539_v30, %v6681_v24  ;;  %v7323_v25 = vld [vmem:[#allocation3 + $0x568] sm:$0xf0] }
 0x1e9   :  { %2431 = vmatpush.bf16.msrb.mxu0 %v7322_v52  ;;  %2406 = vmatpush.bf16.msra.mxu2 %v6778_v3  ;;  %v9603_v33 = vld [vmem:[#allocation3 + $0x264] sm:$0xf0]  ;;  %v9647_v52 = vld [vmem:[#allocation3 + $0x3cc] sm:$0xf]  ;;  %v6878_v3 = vor.u32 %v9583_v50, %v6875_v51 }
 0x1ea   :  { %v7193_v34 = vld [vmem:[#allocation3 + $0x448] sm:$0xf]  ;;  %v6938_v41 = vor.u32 %v9603_v33, %v6937_v31  ;;  %v9759_v26 = vld [vmem:[#allocation3 + $0x74c] sm:$0xf] }
 0x1eb   :  { %2444 = vmatpush.bf16.msrb.mxu1 %v7578_v56  ;;  %2419 = vmatpush.bf16.msra.mxu3 %v7034_v18  ;;  %v9667_v35 = vld [vmem:[#allocation3 + $0x464] sm:$0xf0]  ;;  %v7387_v56 = vld [vmem:[#allocation3 + $0x5e8] sm:$0xf0]  ;;  %v7134_v18 = vor.u32 %v9647_v52, %v7131_v54 }
 0x1ec   :  { %v7449_v36 = vld [vmem:[#allocation3 + $0x648] sm:$0xf]  ;;  %v7194_v42 = vor.u32 %v9667_v35, %v7193_v34  ;;  %v7579_v23 = vld [vmem:[#allocation3 + $0x768] sm:$0xf0] }
 0x1ed   :  { %2432 = vmatpush.bf16.msrb.mxu0 %v7290_v5  ;;  %2407 = vmatpush.bf16.msra.mxu2 %v6746_v60  ;;  %v9731_v37 = vld [vmem:[#allocation3 + $0x664] sm:$0xf0]  ;;  %v7390_v5 = vor.u32 %v9711_v55, %v7387_v56  ;;  %v6846_v60 = vor.u32 %v9575_v6, %v6843_v7  ;;  %v9559_v24 = vld [vmem:[#allocation3 + $0x10c] sm:$0xf] }
 0x1ee   :  { %v6649_v39 = vld [vmem:[#allocation3 + $0x8] sm:$0xf]  ;;  %v7450_v47 = vor.u32 %v9731_v37, %v7449_v36  ;;  %v6779_v30 = vld [vmem:[#allocation3 + $0x128] sm:$0xf0] }
 0x1ef   :  { %2445 = vmatpush.bf16.msrb.mxu1 %v7546_v44  ;;  %2420 = vmatpush.bf16.msra.mxu3 %v7002_v13  ;;  %v9531_v40 = vld [vmem:[#allocation3 + $0x24] sm:$0xf0]  ;;  %v7646_v44 = vor.u32 %v9775_v59, %v7643_v62  ;;  %v7102_v13 = vor.u32 %v9639_v8, %v7099_v9  ;;  %v9623_v31 = vld [vmem:[#allocation3 + $0x30c] sm:$0xf] }
 0x1f0   :  { %v6905_v43 = vld [vmem:[#allocation3 + $0x208] sm:$0xf]  ;;  %v6650_v53 = vor.u32 %v9531_v40, %v6649_v39  ;;  %v7035_v33 = vld [vmem:[#allocation3 + $0x328] sm:$0xf0] }
 0x1f1   :  { %2433 = vmatpush.bf16.msrb.mxu0 %v7258_v14  ;;  %2408 = vmatpush.bf16.msra.mxu2 %v6714_v27  ;;  %v9595_v45 = vld [vmem:[#allocation3 + $0x224] sm:$0xf0]  ;;  %v7358_v14 = vor.u32 %v9703_v10, %v7355_v1  ;;  %v6814_v27 = vor.u32 %v9567_v16, %v6811_v17  ;;  %v9687_v34 = vld [vmem:[#allocation3 + $0x50c] sm:$0xf]  ;;  %v7038_v39 = vor.u32 %v9623_v31, %v7035_v33  ;;  %v7393_v31 = vld [vmem:[#allocation3 + $0x5d0] sm:$0xf] }
 0x1f2   :  { %v7161_v46 = vld [vmem:[#allocation3 + $0x408] sm:$0xf]  ;;  %v6906_v57 = vor.u32 %v9595_v45, %v6905_v43  ;;  %v7291_v35 = vld [vmem:[#allocation3 + $0x528] sm:$0xf0] }
 0x1f3   :  { %2446 = vmatpush.bf16.msrb.mxu1 %v7514_v20  ;;  %2421 = vmatpush.bf16.msra.mxu3 %v6970_v28  ;;  %v9659_v15 = vld [vmem:[#allocation3 + $0x424] sm:$0xf0]  ;;  %v7614_v20 = vor.u32 %v9767_v11, %v7611_v12  ;;  %v7070_v28 = vor.u32 %v9631_v19, %v7067_v21  ;;  %v9751_v36 = vld [vmem:[#allocation3 + $0x70c] sm:$0xf]  ;;  %v7294_v40 = vor.u32 %v9687_v34, %v7291_v35  ;;  %v7649_v35 = vld [vmem:[#allocation3 + $0x7d0] sm:$0xf] }
 0x1f4   :  { %v7417_v48 = vld [vmem:[#allocation3 + $0x608] sm:$0xf]  ;;  %v7162_v58 = vor.u32 %v9659_v15, %v7161_v46  ;;  %v7547_v37 = vld [vmem:[#allocation3 + $0x728] sm:$0xf0] }
 0x1f5   :  { %2434 = vmatpush.bf16.msrb.mxu0 %v7226_v29  ;;  %v9723_v49 = vld [vmem:[#allocation3 + $0x624] sm:$0xf0]  ;;  %2409 = vmatpush.bf16.msra.mxu2 %v6682_v38  ;;  %v7326_v29 = vor.u32 %v9695_v22, %v7323_v25  ;;  %v6782_v38 = vor.u32 %v9559_v24, %v6779_v30  ;;  %v9615_v43 = vld [vmem:[#allocation3 + $0x2cc] sm:$0xf]  ;;  %v7550_v45 = vor.u32 %v9751_v36, %v7547_v37  ;;  %v9652_v30 = vld [vmem:[#allocation3 + $0x3ec] sm:$0xf0] }
 0x1f6   :  { %v7418_v63 = vor.u32 %v9723_v49, %v7417_v48  ;;  %v7003_v46 = vld [vmem:[#allocation3 + $0x2e8] sm:$0xf0]  ;;  %v9780_v36 = vld [vmem:[#allocation3 + $0x7ec] sm:$0xf0] }
 0x1f7   :  { %2447 = vmatpush.bf16.msrb.mxu1 %v7482_v32  ;;  %2422 = vmatpush.bf16.msra.mxu3 %v6938_v41  ;;  %v7582_v32 = vor.u32 %v9759_v26, %v7579_v23  ;;  %v9551_v41 = vld [vmem:[#allocation3 + $0xcc] sm:$0xf]  ;;  %v7006_v51 = vor.u32 %v9615_v43, %v7003_v46  ;;  %v7105_v43 = vld [vmem:[#allocation3 + $0x390] sm:$0xf] }
 0x1f8   :  { %v7259_v15 = vld [vmem:[#allocation3 + $0x4e8] sm:$0xf0]  ;;  %v9644_v46 = vld [vmem:[#allocation3 + $0x3ac] sm:$0xf0] }
 0x1f9   :  { %2435 = vmatpush.bf16.msrb.mxu0 %v7194_v42  ;;  %2410 = vmatpush.bf16.msra.mxu2 %v6650_v53  ;;  %v6747_v42 = vld [vmem:[#allocation3 + $0xe8] sm:$0xf0] }
 0x1fa   :  { %v9743_v48 = vld [vmem:[#allocation3 + $0x6cc] sm:$0xf]  ;;  %v6750_v50 = vor.u32 %v9551_v41, %v6747_v42  ;;  %v6849_v41 = vld [vmem:[#allocation3 + $0x190] sm:$0xf] }
 0x1fb   :  { %2448 = vmatpush.bf16.msrb.mxu1 %v7450_v47  ;;  %2423 = vmatpush.bf16.msra.mxu3 %v6906_v57  ;;  %v9679_v47 = vld [vmem:[#allocation3 + $0x4cc] sm:$0xf]  ;;  %v9580_v42 = vld [vmem:[#allocation3 + $0x1ac] sm:$0xf0] }
 0x1fc   :  { %2411 = vmatmul.bf16.vlgmr.msra.gmra.mxu2 %v10633_v61  ;;  %v7515_v49 = vld [vmem:[#allocation3 + $0x6e8] sm:$0xf0]  ;;  %v7262_v52 = vor.u32 %v9679_v47, %v7259_v15  ;;  %v7361_v47 = vld [vmem:[#allocation3 + $0x590] sm:$0xf] }
 0x1fd   :  { %2436 = vmatpush.bf16.msrb.mxu0 %v7162_v58  ;;  %2455 = vmatpush.bf16.msrb.mxu2 %v6878_v3  ;;  %v9543_v53 = vld [vmem:[#allocation3 + $0x8c] sm:$0xf]  ;;  %v7518_v56 = vor.u32 %v9743_v48, %v7515_v49  ;;  %v9708_v15 = vld [vmem:[#allocation3 + $0x5ac] sm:$0xf0] }
 0x1fe   :  { %2424 = vmatmul.bf16.vlgmr.msra.gmra.mxu3 %v10637_v0  ;;  %v6715_v54 = vld [vmem:[#allocation3 + $0xa8] sm:$0xf0]  ;;  %v7617_v48 = vld [vmem:[#allocation3 + $0x790] sm:$0xf] }
 0x1ff   :  { %2449 = vmatpush.bf16.msrb.mxu1 %v7418_v63  ;;  %2468 = vmatpush.bf16.msrb.mxu3 %v7134_v18  ;;  %v9607_v55 = vld [vmem:[#allocation3 + $0x28c] sm:$0xf]  ;;  %v6718_v3 = vor.u32 %v9543_v53, %v6715_v54  ;;  %v9772_v49 = vld [vmem:[#allocation3 + $0x7ac] sm:$0xf0] }
 0x200   :  { %2437 = vmatmul.bf16.vlgmr.msrb.gmra.mxu0 %v10641_v2  ;;  %v6971_v57 = vld [vmem:[#allocation3 + $0x2a8] sm:$0xf0]  ;;  %v6817_v53 = vld [vmem:[#allocation3 + $0x150] sm:$0xf] }
 0x201   :  { %2481 = vmatpush.bf16.msra.mxu0 %v7390_v5  ;;  %2456 = vmatpush.bf16.msrb.mxu2 %v6846_v60  ;;  %v9671_v58 = vld [vmem:[#allocation3 + $0x48c] sm:$0xf]  ;;  %v6974_v18 = vor.u32 %v9607_v55, %v6971_v57  ;;  %v9572_v54 = vld [vmem:[#allocation3 + $0x16c] sm:$0xf0] }
 0x202   :  { %2450 = vmatmul.bf16.vlgmr.msrb.gmra.mxu1 %v10645_v4  ;;  %v7227_v59 = vld [vmem:[#allocation3 + $0x4a8] sm:$0xf0]  ;;  %v7073_v55 = vld [vmem:[#allocation3 + $0x350] sm:$0xf] }
 0x203   :  { %2494 = vmatpush.bf16.msra.mxu1 %v7646_v44  ;;  %2469 = vmatpush.bf16.msrb.mxu3 %v7102_v13  ;;  %v9735_v62 = vld [vmem:[#allocation3 + $0x68c] sm:$0xf]  ;;  %v7230_v5 = vor.u32 %v9671_v58, %v7227_v59  ;;  %v9636_v57 = vld [vmem:[#allocation3 + $0x36c] sm:$0xf0] }
 0x204   :  { %v7483_v63 = vld [vmem:[#allocation3 + $0x6a8] sm:$0xf0]  ;;  %v7329_v58 = vld [vmem:[#allocation3 + $0x550] sm:$0xf] }
 0x205   :  { %2482 = vmatpush.bf16.msra.mxu0 %v7358_v14  ;;  %2457 = vmatpush.bf16.msrb.mxu2 %v6814_v27  ;;  %v9535_v6 = vld [vmem:[#allocation3 + $0x4c] sm:$0xf]  ;;  %v7486_v44 = vor.u32 %v9735_v62, %v7483_v63  ;;  %v6881_v27 = vld [vmem:[#allocation3 + $0x1d0] sm:$0xf] }
 0x206   :  { %v6683_v7 = vld [vmem:[#allocation3 + $0x68] sm:$0xf0]  ;;  %v9700_v59 = vld [vmem:[#allocation3 + $0x56c] sm:$0xf0] }
 0x207   :  { %2495 = vmatpush.bf16.msra.mxu1 %v7614_v20  ;;  %2470 = vmatpush.bf16.msrb.mxu3 %v7070_v28  ;;  %v9599_v8 = vld [vmem:[#allocation3 + $0x24c] sm:$0xf]  ;;  %v6686_v60 = vor.u32 %v9535_v6, %v6683_v7  ;;  %v9588_v28 = vld [vmem:[#allocation3 + $0x1ec] sm:$0xf0] }
 0x208   :  { %v6939_v9 = vld [vmem:[#allocation3 + $0x268] sm:$0xf0]  ;;  %v7585_v62 = vld [vmem:[#allocation3 + $0x750] sm:$0xf] }
 0x209   :  { %2483 = vmatpush.bf16.msra.mxu0 %v7326_v29  ;;  %2458 = vmatpush.bf16.msrb.mxu2 %v6782_v38  ;;  %v9663_v10 = vld [vmem:[#allocation3 + $0x44c] sm:$0xf]  ;;  %v6942_v16 = vor.u32 %v9599_v8, %v6939_v9  ;;  %v7137_v29 = vld [vmem:[#allocation3 + $0x3d0] sm:$0xf]  ;;  %v6882_v38 = vor.u32 %v9588_v28, %v6881_v27 }
 0x20a   :  { %v7195_v1 = vld [vmem:[#allocation3 + $0x468] sm:$0xf0]  ;;  %v9764_v63 = vld [vmem:[#allocation3 + $0x76c] sm:$0xf0] }
 0x20b   :  { %2496 = vmatpush.bf16.msra.mxu1 %v7582_v32  ;;  %2471 = vmatpush.bf16.msrb.mxu3 %v7038_v39  ;;  %v9727_v11 = vld [vmem:[#allocation3 + $0x64c] sm:$0xf]  ;;  %v7198_v17 = vor.u32 %v9663_v10, %v7195_v1  ;;  %v9716_v32 = vld [vmem:[#allocation3 + $0x5ec] sm:$0xf0]  ;;  %v7138_v39 = vor.u32 %v9652_v30, %v7137_v29 }
 0x20c   :  { %v7451_v12 = vld [vmem:[#allocation3 + $0x668] sm:$0xf0]  ;;  %v6785_v6 = vld [vmem:[#allocation3 + $0x110] sm:$0xf] }
 0x20d   :  { %2484 = vmatpush.bf16.msra.mxu0 %v7294_v40  ;;  %2459 = vmatpush.bf16.msrb.mxu2 %v6750_v50  ;;  %v9527_v13 = vld [vmem:[#allocation3 + $0xc] sm:$0xf]  ;;  %v7454_v22 = vor.u32 %v9727_v11, %v7451_v12  ;;  %v7394_v40 = vor.u32 %v9716_v32, %v7393_v31  ;;  %v6850_v50 = vor.u32 %v9580_v42, %v6849_v41  ;;  %v9564_v7 = vld [vmem:[#allocation3 + $0x12c] sm:$0xf0] }
 0x20e   :  { %v6651_v14 = vld [vmem:[#allocation3 + $0x28] sm:$0xf0]  ;;  %v7041_v8 = vld [vmem:[#allocation3 + $0x310] sm:$0xf] }
 0x20f   :  { %2497 = vmatpush.bf16.msra.mxu1 %v7550_v45  ;;  %2472 = vmatpush.bf16.msrb.mxu3 %v7006_v51  ;;  %v9591_v19 = vld [vmem:[#allocation3 + $0x20c] sm:$0xf]  ;;  %v6654_v24 = vor.u32 %v9527_v13, %v6651_v14  ;;  %v7650_v45 = vor.u32 %v9780_v36, %v7649_v35  ;;  %v7106_v51 = vor.u32 %v9644_v46, %v7105_v43  ;;  %v9628_v9 = vld [vmem:[#allocation3 + $0x32c] sm:$0xf0] }
 0x210   :  { %v6907_v20 = vld [vmem:[#allocation3 + $0x228] sm:$0xf0]  ;;  %v7297_v10 = vld [vmem:[#allocation3 + $0x510] sm:$0xf]  ;;  %v7042_v13 = vor.u32 %v9628_v9, %v7041_v8  ;;  %v9712_v8 = vld [vmem:[#allocation3 + $0x5d4] sm:$0xf] }
 0x211   :  { %2485 = vmatpush.bf16.msra.mxu0 %v7262_v52  ;;  %2460 = vmatpush.bf16.msrb.mxu2 %v6718_v3  ;;  %v9655_v21 = vld [vmem:[#allocation3 + $0x40c] sm:$0xf]  ;;  %v6910_v33 = vor.u32 %v9591_v19, %v6907_v20  ;;  %v7362_v52 = vor.u32 %v9708_v15, %v7361_v47  ;;  %v6818_v3 = vor.u32 %v9572_v54, %v6817_v53  ;;  %v9692_v1 = vld [vmem:[#allocation3 + $0x52c] sm:$0xf0] }
 0x212   :  { %v7163_v25 = vld [vmem:[#allocation3 + $0x428] sm:$0xf0]  ;;  %v7553_v11 = vld [vmem:[#allocation3 + $0x710] sm:$0xf]  ;;  %v7298_v14 = vor.u32 %v9692_v1, %v7297_v10  ;;  %v9776_v1 = vld [vmem:[#allocation3 + $0x7d4] sm:$0xf] }
 0x213   :  { %2498 = vmatpush.bf16.msra.mxu1 %v7518_v56  ;;  %2473 = vmatpush.bf16.msrb.mxu3 %v6974_v18  ;;  %v9719_v26 = vld [vmem:[#allocation3 + $0x60c] sm:$0xf]  ;;  %v7166_v34 = vor.u32 %v9655_v21, %v7163_v25  ;;  %v7618_v56 = vor.u32 %v9772_v49, %v7617_v48  ;;  %v7074_v18 = vor.u32 %v9636_v57, %v7073_v55  ;;  %v9756_v12 = vld [vmem:[#allocation3 + $0x72c] sm:$0xf0] }
 0x214   :  { %v7419_v23 = vld [vmem:[#allocation3 + $0x628] sm:$0xf0]  ;;  %v7009_v19 = vld [vmem:[#allocation3 + $0x2d0] sm:$0xf]  ;;  %v7554_v20 = vor.u32 %v9756_v12, %v7553_v11  ;;  %v7651_v11 = vld [vmem:[#allocation3 + $0x7f0] sm:$0xf0] }
 0x215   :  { %2486 = vmatpush.bf16.msra.mxu0 %v7230_v5  ;;  %2461 = vmatpush.bf16.msrb.mxu2 %v6686_v60  ;;  %v7422_v37 = vor.u32 %v9719_v26, %v7419_v23  ;;  %v7330_v5 = vor.u32 %v9700_v59, %v7329_v58  ;;  %v6786_v60 = vor.u32 %v9564_v7, %v6785_v6  ;;  %v9620_v21 = vld [vmem:[#allocation3 + $0x2ec] sm:$0xf0]  ;;  %v7139_v7 = vld [vmem:[#allocation3 + $0x3f0] sm:$0xf0] }
 0x216   :  { %v9684_v25 = vld [vmem:[#allocation3 + $0x4ec] sm:$0xf0]  ;;  %v7010_v28 = vor.u32 %v9620_v21, %v7009_v19  ;;  %v9640_v19 = vld [vmem:[#allocation3 + $0x394] sm:$0xf] }
 0x217   :  { %2499 = vmatpush.bf16.msra.mxu1 %v7486_v44  ;;  %2474 = vmatpush.bf16.msrb.mxu3 %v6942_v16  ;;  %v7586_v44 = vor.u32 %v9764_v63, %v7585_v62  ;;  %v6753_v16 = vld [vmem:[#allocation3 + $0xd0] sm:$0xf]  ;;  %v7107_v21 = vld [vmem:[#allocation3 + $0x3b0] sm:$0xf0] }
 0x218   :  { %v7521_v26 = vld [vmem:[#allocation3 + $0x6d0] sm:$0xf] }
 0x219   :  { %2487 = vmatpush.bf16.msra.mxu0 %v7198_v17  ;;  %2462 = vmatpush.bf16.msrb.mxu2 %v6654_v24  ;;  %v9556_v17 = vld [vmem:[#allocation3 + $0xec] sm:$0xf0] }
 0x21a   :  { %v9748_v23 = vld [vmem:[#allocation3 + $0x6ec] sm:$0xf0]  ;;  %v6754_v27 = vor.u32 %v9556_v17, %v6753_v16  ;;  %v9576_v16 = vld [vmem:[#allocation3 + $0x194] sm:$0xf] }
 0x21b   :  { %2500 = vmatpush.bf16.msra.mxu1 %v7454_v22  ;;  %2475 = vmatpush.bf16.msrb.mxu3 %v6910_v33  ;;  %v7265_v22 = vld [vmem:[#allocation3 + $0x4d0] sm:$0xf]  ;;  %v7522_v32 = vor.u32 %v9748_v23, %v7521_v26  ;;  %v6851_v17 = vld [vmem:[#allocation3 + $0x1b0] sm:$0xf0] }
 0x21c   :  { %2463 = vmatmul.bf16.vlgmr.msrb.gmra.mxu2 %v10633_v61  ;;  %v7266_v29 = vor.u32 %v9684_v25, %v7265_v22  ;;  %v6721_v24 = vld [vmem:[#allocation3 + $0x90] sm:$0xf]  ;;  %v9704_v22 = vld [vmem:[#allocation3 + $0x594] sm:$0xf] }
 0x21d   :  { %2488 = vmatpush.bf16.msra.mxu0 %v7166_v34  ;;  %2507 = vmatpush.bf16.msra.mxu2 %v6882_v38  ;;  %v9548_v30 = vld [vmem:[#allocation3 + $0xac] sm:$0xf0]  ;;  %v7363_v25 = vld [vmem:[#allocation3 + $0x5b0] sm:$0xf0] }
 0x21e   :  { %2476 = vmatmul.bf16.vlgmr.msrb.gmra.mxu3 %v10637_v0  ;;  %v6977_v31 = vld [vmem:[#allocation3 + $0x290] sm:$0xf]  ;;  %v6722_v38 = vor.u32 %v9548_v30, %v6721_v24  ;;  %v9768_v26 = vld [vmem:[#allocation3 + $0x794] sm:$0xf] }
 0x21f   :  { %2501 = vmatpush.bf16.msra.mxu1 %v7422_v37  ;;  %2520 = vmatpush.bf16.msra.mxu3 %v7138_v39  ;;  %v9612_v33 = vld [vmem:[#allocation3 + $0x2ac] sm:$0xf0]  ;;  %v7619_v23 = vld [vmem:[#allocation3 + $0x7b0] sm:$0xf0] }
 0x220   :  { %2489 = vmatmul.bf16.vlgmr.msra.gmra.mxu0 %v10641_v2  ;;  %v7233_v34 = vld [vmem:[#allocation3 + $0x490] sm:$0xf]  ;;  %v6978_v39 = vor.u32 %v9612_v33, %v6977_v31  ;;  %v9568_v24 = vld [vmem:[#allocation3 + $0x154] sm:$0xf] }
 0x221   :  { %2533 = vmatpush.bf16.msrb.mxu0 %v7394_v40  ;;  %2508 = vmatpush.bf16.msra.mxu2 %v6850_v50  ;;  %v9676_v35 = vld [vmem:[#allocation3 + $0x4ac] sm:$0xf0]  ;;  %v6819_v30 = vld [vmem:[#allocation3 + $0x170] sm:$0xf0] }
 0x222   :  { %2502 = vmatmul.bf16.vlgmr.msra.gmra.mxu1 %v10645_v4  ;;  %v7489_v36 = vld [vmem:[#allocation3 + $0x690] sm:$0xf]  ;;  %v7234_v40 = vor.u32 %v9676_v35, %v7233_v34  ;;  %v9632_v31 = vld [vmem:[#allocation3 + $0x354] sm:$0xf] }
 0x223   :  { %2546 = vmatpush.bf16.msrb.mxu1 %v7650_v45  ;;  %2521 = vmatpush.bf16.msra.mxu3 %v7106_v51  ;;  %v9740_v37 = vld [vmem:[#allocation3 + $0x6ac] sm:$0xf0]  ;;  %v7075_v33 = vld [vmem:[#allocation3 + $0x370] sm:$0xf0] }
 0x224   :  { %v6689_v41 = vld [vmem:[#allocation3 + $0x50] sm:$0xf]  ;;  %v7490_v45 = vor.u32 %v9740_v37, %v7489_v36  ;;  %v9696_v34 = vld [vmem:[#allocation3 + $0x554] sm:$0xf] }
 0x225   :  { %2534 = vmatpush.bf16.msrb.mxu0 %v7362_v52  ;;  %2509 = vmatpush.bf16.msra.mxu2 %v6818_v3  ;;  %v9540_v42 = vld [vmem:[#allocation3 + $0x6c] sm:$0xf0]  ;;  %v9584_v3 = vld [vmem:[#allocation3 + $0x1d4] sm:$0xf] }
 0x226   :  { %v6945_v43 = vld [vmem:[#allocation3 + $0x250] sm:$0xf]  ;;  %v6690_v50 = vor.u32 %v9540_v42, %v6689_v41  ;;  %v7331_v35 = vld [vmem:[#allocation3 + $0x570] sm:$0xf0] }
 0x227   :  { %2547 = vmatpush.bf16.msrb.mxu1 %v7618_v56  ;;  %2522 = vmatpush.bf16.msra.mxu3 %v7074_v18  ;;  %v9604_v46 = vld [vmem:[#allocation3 + $0x26c] sm:$0xf0]  ;;  %v6883_v18 = vld [vmem:[#allocation3 + $0x1f0] sm:$0xf0] }
 0x228   :  { %v7201_v47 = vld [vmem:[#allocation3 + $0x450] sm:$0xf]  ;;  %v6946_v53 = vor.u32 %v9604_v46, %v6945_v43  ;;  %v9760_v36 = vld [vmem:[#allocation3 + $0x754] sm:$0xf] }
 0x229   :  { %2535 = vmatpush.bf16.msrb.mxu0 %v7330_v5  ;;  %2510 = vmatpush.bf16.msra.mxu2 %v6786_v60  ;;  %v9668_v15 = vld [vmem:[#allocation3 + $0x46c] sm:$0xf0]  ;;  %v9648_v5 = vld [vmem:[#allocation3 + $0x3d4] sm:$0xf]  ;;  %v6886_v60 = vor.u32 %v9584_v3, %v6883_v18 }
 0x22a   :  { %v7457_v48 = vld [vmem:[#allocation3 + $0x650] sm:$0xf]  ;;  %v7202_v54 = vor.u32 %v9668_v15, %v7201_v47  ;;  %v7587_v37 = vld [vmem:[#allocation3 + $0x770] sm:$0xf0] }
 0x22b   :  { %2548 = vmatpush.bf16.msrb.mxu1 %v7586_v44  ;;  %2523 = vmatpush.bf16.msra.mxu3 %v7042_v13  ;;  %v9732_v49 = vld [vmem:[#allocation3 + $0x66c] sm:$0xf0]  ;;  %v7395_v44 = vld [vmem:[#allocation3 + $0x5f0] sm:$0xf0]  ;;  %v7142_v13 = vor.u32 %v9648_v5, %v7139_v7 }
 0x22c   :  { %v6657_v51 = vld [vmem:[#allocation3 + $0x10] sm:$0xf]  ;;  %v7458_v58 = vor.u32 %v9732_v49, %v7457_v48  ;;  %v9560_v41 = vld [vmem:[#allocation3 + $0x114] sm:$0xf] }
 0x22d   :  { %2536 = vmatpush.bf16.msrb.mxu0 %v7298_v14  ;;  %2511 = vmatpush.bf16.msra.mxu2 %v6754_v27  ;;  %v9532_v52 = vld [vmem:[#allocation3 + $0x2c] sm:$0xf0]  ;;  %v7398_v14 = vor.u32 %v9712_v8, %v7395_v44  ;;  %v6854_v27 = vor.u32 %v9576_v16, %v6851_v17  ;;  %v6787_v42 = vld [vmem:[#allocation3 + $0x130] sm:$0xf0] }
 0x22e   :  { %v6913_v55 = vld [vmem:[#allocation3 + $0x210] sm:$0xf]  ;;  %v6658_v6 = vor.u32 %v9532_v52, %v6657_v51  ;;  %v9624_v43 = vld [vmem:[#allocation3 + $0x314] sm:$0xf]  ;;  %v6790_v51 = vor.u32 %v9560_v41, %v6787_v42 }
 0x22f   :  { %2549 = vmatpush.bf16.msrb.mxu1 %v7554_v20  ;;  %2524 = vmatpush.bf16.msra.mxu3 %v7010_v28  ;;  %v9596_v56 = vld [vmem:[#allocation3 + $0x22c] sm:$0xf0]  ;;  %v7654_v20 = vor.u32 %v9776_v1, %v7651_v11  ;;  %v7110_v28 = vor.u32 %v9640_v19, %v7107_v21  ;;  %v7043_v46 = vld [vmem:[#allocation3 + $0x330] sm:$0xf0] }
 0x230   :  { %v7169_v57 = vld [vmem:[#allocation3 + $0x410] sm:$0xf]  ;;  %v6914_v9 = vor.u32 %v9596_v56, %v6913_v55  ;;  %v9688_v47 = vld [vmem:[#allocation3 + $0x514] sm:$0xf] }
 0x231   :  { %2537 = vmatpush.bf16.msrb.mxu0 %v7266_v29  ;;  %2512 = vmatpush.bf16.msra.mxu2 %v6722_v38  ;;  %v9660_v59 = vld [vmem:[#allocation3 + $0x42c] sm:$0xf0]  ;;  %v7366_v29 = vor.u32 %v9704_v22, %v7363_v25  ;;  %v6822_v38 = vor.u32 %v9568_v24, %v6819_v30  ;;  %v7299_v15 = vld [vmem:[#allocation3 + $0x530] sm:$0xf0] }
 0x232   :  { %v7425_v62 = vld [vmem:[#allocation3 + $0x610] sm:$0xf]  ;;  %v7170_v10 = vor.u32 %v9660_v59, %v7169_v57  ;;  %v9752_v48 = vld [vmem:[#allocation3 + $0x714] sm:$0xf]  ;;  %v7302_v55 = vor.u32 %v9688_v47, %v7299_v15 }
 0x233   :  { %2550 = vmatpush.bf16.msrb.mxu1 %v7522_v32  ;;  %2525 = vmatpush.bf16.msra.mxu3 %v6978_v39  ;;  %v9724_v63 = vld [vmem:[#allocation3 + $0x62c] sm:$0xf0]  ;;  %v7622_v32 = vor.u32 %v9768_v26, %v7619_v23  ;;  %v7078_v39 = vor.u32 %v9632_v31, %v7075_v33  ;;  %v7555_v49 = vld [vmem:[#allocation3 + $0x730] sm:$0xf0] }
 0x234   :  { %v7426_v12 = vor.u32 %v9724_v63, %v7425_v62  ;;  %v9552_v52 = vld [vmem:[#allocation3 + $0xd4] sm:$0xf]  ;;  %v7558_v62 = vor.u32 %v9752_v48, %v7555_v49 }
 0x235   :  { %2538 = vmatpush.bf16.msrb.mxu0 %v7234_v40  ;;  %2513 = vmatpush.bf16.msra.mxu2 %v6690_v50  ;;  %v7334_v40 = vor.u32 %v9696_v34, %v7331_v35  ;;  %v10667_v50 = vld [vmem:[#allocation14] sm:$0xff] }
 0x236   :  { %v6755_v56 = vld [vmem:[#allocation3 + $0xf0] sm:$0xf0]  ;;  %v1003_v18 = vperm.slane %v10667_v50, 0 }
 0x237   :  { %2551 = vmatpush.bf16.msrb.mxu1 %v7490_v45  ;;  %2526 = vmatpush.bf16.msra.mxu3 %v6946_v53  ;;  %v7590_v45 = vor.u32 %v9760_v36, %v7587_v37  ;;  %v9616_v57 = vld [vmem:[#allocation3 + $0x2d4] sm:$0xf]  ;;  %v6758_v7 = vor.u32 %v9552_v52, %v6755_v56  ;;  %v7145_v56 = vld [vmem:[#allocation3 + $0x3d8] sm:$0xf] }
 0x238   :  { %v9680_v63 = vld [vmem:[#allocation3 + $0x4d4] sm:$0xf] }
 0x239   :  { %2539 = vmatpush.bf16.msrb.mxu0 %v7202_v54  ;;  %2514 = vmatpush.bf16.msra.mxu2 %v6658_v6  ;;  %v7046_v54 = vor.u32 %v9624_v43, %v7043_v46  ;;  %v7267_v3 = vld [vmem:[#allocation3 + $0x4f0] sm:$0xf0] }
 0x23a   :  { %v9744_v5 = vld [vmem:[#allocation3 + $0x6d4] sm:$0xf]  ;;  %v7270_v44 = vor.u32 %v9680_v63, %v7267_v3 }
 0x23b   :  { %2552 = vmatpush.bf16.msrb.mxu1 %v7458_v58  ;;  %2527 = vmatpush.bf16.msra.mxu3 %v6914_v9  ;;  %v7011_v58 = vld [vmem:[#allocation3 + $0x2f0] sm:$0xf0] }
 0x23c   :  { %2515 = vmatmul.bf16.vlgmr.msra.gmra.mxu2 %v10633_v61  ;;  %v7523_v6 = vld [vmem:[#allocation3 + $0x6f0] sm:$0xf0]  ;;  %v7014_v8 = vor.u32 %v9616_v57, %v7011_v58  ;;  %v9653_v58 = vld [vmem:[#allocation3 + $0x3f4] sm:$0xf0] }
 0x23d   :  { %2540 = vmatpush.bf16.msrb.mxu0 %v7170_v10  ;;  %2559 = vmatpush.bf16.msrb.mxu2 %v6886_v60  ;;  %v2334_v53 = vpop.f32.mrf.mxu0  ;;  %v9544_v9 = vld [vmem:[#allocation3 + $0x94] sm:$0xf] }
 0x23e   :  { %2528 = vmatmul.bf16.vlgmr.msra.gmra.mxu3 %v10637_v0  ;;  %v6723_v10 = vld [vmem:[#allocation3 + $0xb0] sm:$0xf0] }
 0x23f   :  { %2553 = vmatpush.bf16.msrb.mxu1 %v7426_v12  ;;  %2572 = vmatpush.bf16.msrb.mxu3 %v7142_v13  ;;  %v2347_v59 = vpop.f32.mrf.mxu1  ;;  %v9608_v1 = vld [vmem:[#allocation3 + $0x294] sm:$0xf]  ;;  %v2308_v11 = vpop.f32.mrf.mxu2  ;;  %v7526_v12 = vor.u32 %v9744_v5, %v7523_v6  ;;  %v6726_v21 = vor.u32 %v9544_v9, %v6723_v10  ;;  %v7657_v5 = vld [vmem:[#allocation3 + $0x7d8] sm:$0xf] }
 0x240   :  { %2541 = vmatmul.bf16.vlgmr.msrb.gmra.mxu0 %v10641_v2  ;;  %v6979_v60 = vld [vmem:[#allocation3 + $0x2b0] sm:$0xf0]  ;;  %v2309_v16 = vadd.f32 %v2308_v11, %v1003_v18  ;;  %v9781_v6 = vld [vmem:[#allocation3 + $0x7f4] sm:$0xf0] }
 0x241   :  { %2585 = vmatpush.bf16.msra.mxu0 %v7398_v14  ;;  %2560 = vmatpush.bf16.msrb.mxu2 %v6854_v27  ;;  %v9672_v13 = vld [vmem:[#allocation3 + $0x494] sm:$0xf]  ;;  %v2321_v17 = vpop.f32.mrf.mxu3  ;;  %v6982_v26 = vor.u32 %v9608_v1, %v6979_v60  ;;  %v6857_v10 = vld [vmem:[#allocation3 + $0x198] sm:$0xf] }
 0x242   :  { %2554 = vmatmul.bf16.vlgmr.msrb.gmra.mxu1 %v10645_v4  ;;  %v7235_v14 = vld [vmem:[#allocation3 + $0x4b0] sm:$0xf0]  ;;  %v2322_v22 = vadd.f32 %v2321_v17, %v2309_v16  ;;  %v9581_v1 = vld [vmem:[#allocation3 + $0x1b4] sm:$0xf0] }
 0x243   :  { %2598 = vmatpush.bf16.msra.mxu1 %v7654_v20  ;;  %2573 = vmatpush.bf16.msrb.mxu3 %v7110_v28  ;;  %v9736_v19 = vld [vmem:[#allocation3 + $0x694] sm:$0xf]  ;;  %v7238_v23 = vor.u32 %v9672_v13, %v7235_v14  ;;  %v7113_v11 = vld [vmem:[#allocation3 + $0x398] sm:$0xf] }
 0x244   :  { %v7491_v20 = vld [vmem:[#allocation3 + $0x6b0] sm:$0xf0]  ;;  %v2335_v34 = vadd.f32 %v2334_v53, %v2322_v22  ;;  %v9645_v60 = vld [vmem:[#allocation3 + $0x3b4] sm:$0xf0] }
 0x245   :  { %2586 = vmatpush.bf16.msra.mxu0 %v7366_v29  ;;  %2561 = vmatpush.bf16.msrb.mxu2 %v6822_v38  ;;  %v2336_v25 = vpop.f32.mrf.mxu0  ;;  %v9536_v27 = vld [vmem:[#allocation3 + $0x54] sm:$0xf]  ;;  %v7494_v30 = vor.u32 %v9736_v19, %v7491_v20  ;;  %v7369_v13 = vld [vmem:[#allocation3 + $0x598] sm:$0xf]  ;;  %v6858_v19 = vor.u32 %v9581_v1, %v6857_v10  ;;  %v7114_v20 = vor.u32 %v9645_v60, %v7113_v11 }
 0x246   :  { %v6691_v28 = vld [vmem:[#allocation3 + $0x70] sm:$0xf0]  ;;  %v2348_v42 = vadd.f32 %v2347_v59, %v2335_v34  ;;  %v7401_v59 = vld [vmem:[#allocation3 + $0x5d8] sm:$0xf] }
 0x247   :  { %2599 = vmatpush.bf16.msra.mxu1 %v7622_v32  ;;  %2574 = vmatpush.bf16.msrb.mxu3 %v7078_v39  ;;  %v9600_v29 = vld [vmem:[#allocation3 + $0x254] sm:$0xf]  ;;  %v2349_v24 = vpop.f32.mrf.mxu1  ;;  %v6694_v38 = vor.u32 %v9536_v27, %v6691_v28  ;;  %v2310_v48 = vpop.f32.mrf.mxu2  ;;  %v9709_v14 = vld [vmem:[#allocation3 + $0x5b4] sm:$0xf0] }
 0x248   :  { %v6947_v31 = vld [vmem:[#allocation3 + $0x270] sm:$0xf0]  ;;  %vm2715_vm7 = vcmp.ge.f32.partialorder %v2348_v42, 0.0  ;;  %v2723_v52 = vmul.f32 0.2, %v2348_v42 }
 0x249   :  { %2587 = vmatpush.bf16.msra.mxu0 %v7334_v40  ;;  %2562 = vmatpush.bf16.msrb.mxu2 %v6790_v51  ;;  %v9664_v32 = vld [vmem:[#allocation3 + $0x454] sm:$0xf]  ;;  %v6950_v43 = vor.u32 %v9600_v29, %v6947_v31  ;;  %v2323_v53 = vpop.f32.mrf.mxu3  ;;  %v7625_v16 = vld [vmem:[#allocation3 + $0x798] sm:$0xf] }
 0x24a   :  { %v7203_v33 = vld [vmem:[#allocation3 + $0x470] sm:$0xf0]  ;;  %v10670_v63 = vsel %vm2715_vm7, %v2348_v42, %v2723_v52  ;;  %v9773_v17 = vld [vmem:[#allocation3 + $0x7b4] sm:$0xf0] }
 0x24b   :  { %2600 = vmatpush.bf16.msra.mxu1 %v7590_v45  ;;  %2575 = vmatpush.bf16.msrb.mxu3 %v7046_v54  ;;  %v9728_v35 = vld [vmem:[#allocation3 + $0x654] sm:$0xf]  ;;  %v7206_v45 = vor.u32 %v9664_v32, %v7203_v33  ;;  %v6889_v54 = vld [vmem:[#allocation3 + $0x1d8] sm:$0xf] }
 0x24c   :  { %v7459_v36 = vld [vmem:[#allocation3 + $0x670] sm:$0xf0]  ;;  %v6825_v22 = vld [vmem:[#allocation3 + $0x158] sm:$0xf] }
 0x24d   :  { %2588 = vmatpush.bf16.msra.mxu0 %v7302_v55  ;;  %2563 = vmatpush.bf16.msrb.mxu2 %v6758_v7  ;;  %v9528_v37 = vld [vmem:[#allocation3 + $0x14] sm:$0xf]  ;;  %v7462_v49 = vor.u32 %v9728_v35, %v7459_v36  ;;  %v9589_v55 = vld [vmem:[#allocation3 + $0x1f4] sm:$0xf0] }
 0x24e   :  { %v6659_v39 = vld [vmem:[#allocation3 + $0x30] sm:$0xf0]  ;;  %v9573_v25 = vld [vmem:[#allocation3 + $0x174] sm:$0xf0] }
 0x24f   :  { %2601 = vmatpush.bf16.msra.mxu1 %v7558_v62  ;;  %2576 = vmatpush.bf16.msrb.mxu3 %v7014_v8  ;;  %v9592_v40 = vld [vmem:[#allocation3 + $0x214] sm:$0xf]  ;;  %v6662_v57 = vor.u32 %v9528_v37, %v6659_v39  ;;  %v9717_v62 = vld [vmem:[#allocation3 + $0x5f4] sm:$0xf0]  ;;  %v6890_v8 = vor.u32 %v9589_v55, %v6889_v54  ;;  %v6826_v31 = vor.u32 %v9573_v25, %v6825_v22 }
 0x250   :  { %v6915_v41 = vld [vmem:[#allocation3 + $0x230] sm:$0xf0]  ;;  %v7402_v9 = vor.u32 %v9717_v62, %v7401_v59  ;;  %v9637_v27 = vld [vmem:[#allocation3 + $0x374] sm:$0xf0] }
 0x251   :  { %2589 = vmatpush.bf16.msra.mxu0 %v7270_v44  ;;  %2564 = vmatpush.bf16.msrb.mxu2 %v6726_v21  ;;  %v9656_v46 = vld [vmem:[#allocation3 + $0x414] sm:$0xf]  ;;  %v6918_v3 = vor.u32 %v9592_v40, %v6915_v41  ;;  %v7146_v44 = vor.u32 %v9653_v58, %v7145_v56  ;;  %v7370_v21 = vor.u32 %v9709_v14, %v7369_v13  ;;  %v7337_v28 = vld [vmem:[#allocation3 + $0x558] sm:$0xf]  ;;  %v1004_v56 = vperm.slane %v10667_v50, 1 }
 0x252   :  { %v7171_v47 = vld [vmem:[#allocation3 + $0x430] sm:$0xf0]  ;;  %v9701_v29 = vld [vmem:[#allocation3 + $0x574] sm:$0xf0] }
 0x253   :  { %2602 = vmatpush.bf16.msra.mxu1 %v7526_v12  ;;  %2577 = vmatpush.bf16.msrb.mxu3 %v6982_v26  ;;  %v9720_v15 = vld [vmem:[#allocation3 + $0x614] sm:$0xf]  ;;  %v7174_v18 = vor.u32 %v9656_v46, %v7171_v47  ;;  %v7658_v12 = vor.u32 %v9781_v6, %v7657_v5  ;;  %v7081_v26 = vld [vmem:[#allocation3 + $0x358] sm:$0xf]  ;;  %v7338_v33 = vor.u32 %v9701_v29, %v7337_v28 }
 0x254   :  { %v7427_v51 = vld [vmem:[#allocation3 + $0x630] sm:$0xf0]  ;;  %v7593_v24 = vld [vmem:[#allocation3 + $0x758] sm:$0xf]  ;;  %v7082_v32 = vor.u32 %v9637_v27, %v7081_v26 }
 0x255   :  { %2590 = vmatpush.bf16.msra.mxu0 %v7238_v23  ;;  %2565 = vmatpush.bf16.msrb.mxu2 %v6694_v38  ;;  %v7430_v7 = vor.u32 %v9720_v15, %v7427_v51  ;;  %v7626_v23 = vor.u32 %v9773_v17, %v7625_v16  ;;  %v6793_v34 = vld [vmem:[#allocation3 + $0x118] sm:$0xf] }
 0x256   :  { %v9565_v35 = vld [vmem:[#allocation3 + $0x134] sm:$0xf0] }
 0x257   :  { %2603 = vmatpush.bf16.msra.mxu1 %v7494_v30  ;;  %2578 = vmatpush.bf16.msrb.mxu3 %v6950_v43  ;;  %v9765_v30 = vld [vmem:[#allocation3 + $0x774] sm:$0xf0]  ;;  %v6794_v43 = vor.u32 %v9565_v35, %v6793_v34 }
 0x258   :  { %v7049_v36 = vld [vmem:[#allocation3 + $0x318] sm:$0xf]  ;;  %v7594_v37 = vor.u32 %v9765_v30, %v7593_v24 }
 0x259   :  { %2591 = vmatpush.bf16.msra.mxu0 %v7206_v45  ;;  %2566 = vmatpush.bf16.msrb.mxu2 %v6662_v57  ;;  %v9629_v38 = vld [vmem:[#allocation3 + $0x334] sm:$0xf0] }
 0x25a   :  { %v7305_v39 = vld [vmem:[#allocation3 + $0x518] sm:$0xf]  ;;  %v7050_v47 = vor.u32 %v9629_v38, %v7049_v36 }
 0x25b   :  { %2604 = vmatpush.bf16.msra.mxu1 %v7462_v49  ;;  %2579 = vmatpush.bf16.msrb.mxu3 %v6918_v3  ;;  %v9693_v40 = vld [vmem:[#allocation3 + $0x534] sm:$0xf0] }
 0x25c   :  { %2567 = vmatmul.bf16.vlgmr.msrb.gmra.mxu2 %v10633_v61  ;;  %v7561_v41 = vld [vmem:[#allocation3 + $0x718] sm:$0xf]  ;;  %v7306_v15 = vor.u32 %v9693_v40, %v7305_v39 }
 0x25d   :  { %2592 = vmatpush.bf16.msra.mxu0 %v7174_v18  ;;  %2611 = vmatpush.bf16.msra.mxu2 %v6890_v8  ;;  %v9757_v42 = vld [vmem:[#allocation3 + $0x734] sm:$0xf0]  ;;  %v2386_v46 = vpop.f32.mrf.mxu0 }
 0x25e   :  { %2580 = vmatmul.bf16.vlgmr.msrb.gmra.mxu3 %v10637_v0  ;;  %v6761_v45 = vld [vmem:[#allocation3 + $0xd8] sm:$0xf]  ;;  %v7562_v53 = vor.u32 %v9757_v42, %v7561_v41 }
 0x25f   :  { %2605 = vmatpush.bf16.msra.mxu1 %v7430_v7  ;;  %2624 = vmatpush.bf16.msra.mxu3 %v7146_v44  ;;  %v9557_v48 = vld [vmem:[#allocation3 + $0xf4] sm:$0xf0]  ;;  %v2399_v52 = vpop.f32.mrf.mxu1  ;;  %v2360_v7 = vpop.f32.mrf.mxu2 }
 0x260   :  { %2593 = vmatmul.bf16.vlgmr.msra.gmra.mxu0 %v10641_v2  ;;  %v7017_v49 = vld [vmem:[#allocation3 + $0x2d8] sm:$0xf]  ;;  %v6762_v59 = vor.u32 %v9557_v48, %v6761_v45  ;;  %v2361_v1 = vadd.f32 %v2360_v7, %v1004_v56  ;;  %v6891_v48 = vld [vmem:[#allocation3 + $0x1f8] sm:$0xf0] }
 0x261   :  { %2637 = vmatpush.bf16.msrb.mxu0 %v7402_v9  ;;  %2612 = vmatpush.bf16.msra.mxu2 %v6858_v19  ;;  %v9621_v51 = vld [vmem:[#allocation3 + $0x2f4] sm:$0xf0]  ;;  %v2373_v11 = vpop.f32.mrf.mxu3  ;;  %v6859_v7 = vld [vmem:[#allocation3 + $0x1b8] sm:$0xf0] }
 0x262   :  { %2606 = vmatmul.bf16.vlgmr.msra.gmra.mxu1 %v10645_v4  ;;  %v7273_v54 = vld [vmem:[#allocation3 + $0x4d8] sm:$0xf]  ;;  %v7018_v62 = vor.u32 %v9621_v51, %v7017_v49  ;;  %v2374_v14 = vadd.f32 %v2373_v11, %v2361_v1  ;;  %v9649_v49 = vld [vmem:[#allocation3 + $0x3dc] sm:$0xf] }
 0x263   :  { %2650 = vmatpush.bf16.msrb.mxu1 %v7658_v12  ;;  %2625 = vmatpush.bf16.msra.mxu3 %v7114_v20  ;;  %v9685_v55 = vld [vmem:[#allocation3 + $0x4f4] sm:$0xf0]  ;;  %v7371_v1 = vld [vmem:[#allocation3 + $0x5b8] sm:$0xf0] }
 0x264   :  { %v7529_v57 = vld [vmem:[#allocation3 + $0x6d8] sm:$0xf]  ;;  %v7274_v3 = vor.u32 %v9685_v55, %v7273_v54  ;;  %v2387_v29 = vadd.f32 %v2386_v46, %v2374_v14  ;;  %v7403_v54 = vld [vmem:[#allocation3 + $0x5f8] sm:$0xf0] }
 0x265   :  { %2638 = vmatpush.bf16.msrb.mxu0 %v7370_v21  ;;  %2613 = vmatpush.bf16.msra.mxu2 %v6826_v31  ;;  %v9749_v58 = vld [vmem:[#allocation3 + $0x6f4] sm:$0xf0]  ;;  %v2388_v16 = vpop.f32.mrf.mxu0  ;;  %v9769_v11 = vld [vmem:[#allocation3 + $0x79c] sm:$0xf] }
 0x266   :  { %v6729_v18 = vld [vmem:[#allocation3 + $0x98] sm:$0xf]  ;;  %v7530_v8 = vor.u32 %v9749_v58, %v7529_v57  ;;  %v2400_v36 = vadd.f32 %v2399_v52, %v2387_v29  ;;  %v7147_v52 = vld [vmem:[#allocation3 + $0x3f8] sm:$0xf0] }
 0x267   :  { %2651 = vmatpush.bf16.msrb.mxu1 %v7626_v23  ;;  %2626 = vmatpush.bf16.msra.mxu3 %v7082_v32  ;;  %v9549_v5 = vld [vmem:[#allocation3 + $0xb4] sm:$0xf0]  ;;  %v2401_v25 = vpop.f32.mrf.mxu1  ;;  %v2362_v42 = vpop.f32.mrf.mxu2  ;;  %v9777_v58 = vld [vmem:[#allocation3 + $0x7dc] sm:$0xf] }
 0x268   :  { %v6985_v6 = vld [vmem:[#allocation3 + $0x298] sm:$0xf]  ;;  %v6730_v13 = vor.u32 %v9549_v5, %v6729_v18  ;;  %vm2716_vm8 = vcmp.ge.f32.partialorder %v2400_v36, 0.0  ;;  %v2724_v46 = vmul.f32 0.2, %v2400_v36  ;;  %v7150_v18 = vor.u32 %v9649_v49, %v7147_v52 }
 0x269   :  { %2639 = vmatpush.bf16.msrb.mxu0 %v7338_v33  ;;  %2614 = vmatpush.bf16.msra.mxu2 %v6794_v43  ;;  %v9613_v44 = vld [vmem:[#allocation3 + $0x2b4] sm:$0xf0]  ;;  %v9569_v16 = vld [vmem:[#allocation3 + $0x15c] sm:$0xf] }
 0x26a   :  { %v7241_v9 = vld [vmem:[#allocation3 + $0x498] sm:$0xf]  ;;  %v6986_v17 = vor.u32 %v9613_v44, %v6985_v6  ;;  %v10677_v55 = vsel %vm2716_vm8, %v2400_v36, %v2724_v46  ;;  %v9577_v6 = vld [vmem:[#allocation3 + $0x19c] sm:$0xf] }
 0x26b   :  { %2652 = vmatpush.bf16.msrb.mxu1 %v7594_v37  ;;  %2627 = vmatpush.bf16.msra.mxu3 %v7050_v47  ;;  %v9677_v10 = vld [vmem:[#allocation3 + $0x4b4] sm:$0xf0]  ;;  %v2375_v47 = vpop.f32.mrf.mxu3  ;;  %v7339_v25 = vld [vmem:[#allocation3 + $0x578] sm:$0xf0] }
 0x26c   :  { %v7497_v12 = vld [vmem:[#allocation3 + $0x698] sm:$0xf]  ;;  %v7242_v19 = vor.u32 %v9677_v10, %v7241_v9  ;;  %v7115_v9 = vld [vmem:[#allocation3 + $0x3b8] sm:$0xf0] }
 0x26d   :  { %2640 = vmatpush.bf16.msrb.mxu0 %v7306_v15  ;;  %v9741_v60 = vld [vmem:[#allocation3 + $0x6b4] sm:$0xf0]  ;;  %2615 = vmatpush.bf16.msra.mxu2 %v6762_v59  ;;  %v9585_v15 = vld [vmem:[#allocation3 + $0x1dc] sm:$0xf] }
 0x26e   :  { %v6697_v20 = vld [vmem:[#allocation3 + $0x58] sm:$0xf]  ;;  %v7498_v26 = vor.u32 %v9741_v60, %v7497_v12  ;;  %v7659_v59 = vld [vmem:[#allocation3 + $0x7f8] sm:$0xf0]  ;;  %v6862_v60 = vor.u32 %v9577_v6, %v6859_v7 }
 0x26f   :  { %2653 = vmatpush.bf16.msrb.mxu1 %v7562_v53  ;;  %2628 = vmatpush.bf16.msra.mxu3 %v7018_v62  ;;  %v9541_v21 = vld [vmem:[#allocation3 + $0x74] sm:$0xf0]  ;;  %v9713_v53 = vld [vmem:[#allocation3 + $0x5dc] sm:$0xf]  ;;  %v7662_v44 = vor.u32 %v9777_v58, %v7659_v59 }
 0x270   :  { %v6953_v22 = vld [vmem:[#allocation3 + $0x258] sm:$0xf]  ;;  %v6698_v32 = vor.u32 %v9541_v21, %v6697_v20  ;;  %v7406_v5 = vor.u32 %v9713_v53, %v7403_v54  ;;  %v9705_v10 = vld [vmem:[#allocation3 + $0x59c] sm:$0xf] }
 0x271   :  { %2641 = vmatpush.bf16.msrb.mxu0 %v7274_v3  ;;  %v9605_v23 = vld [vmem:[#allocation3 + $0x274] sm:$0xf0]  ;;  %2616 = vmatpush.bf16.msra.mxu2 %v6730_v13  ;;  %v6894_v3 = vor.u32 %v9585_v15, %v6891_v48  ;;  %v7627_v12 = vld [vmem:[#allocation3 + $0x7b8] sm:$0xf0]  ;;  %v7374_v14 = vor.u32 %v9705_v10, %v7371_v1 }
 0x272   :  { %v7209_v27 = vld [vmem:[#allocation3 + $0x458] sm:$0xf]  ;;  %v6954_v37 = vor.u32 %v9605_v23, %v6953_v22  ;;  %v7630_v20 = vor.u32 %v9769_v11, %v7627_v12  ;;  %v7083_v21 = vld [vmem:[#allocation3 + $0x378] sm:$0xf0] }
 0x273   :  { %2654 = vmatpush.bf16.msrb.mxu1 %v7530_v8  ;;  %v9669_v28 = vld [vmem:[#allocation3 + $0x474] sm:$0xf0]  ;;  %2629 = vmatpush.bf16.msra.mxu3 %v6986_v17  ;;  %v9641_v8 = vld [vmem:[#allocation3 + $0x39c] sm:$0xf] }
 0x274   :  { %v7465_v24 = vld [vmem:[#allocation3 + $0x658] sm:$0xf]  ;;  %v7210_v38 = vor.u32 %v9669_v28, %v7209_v27  ;;  %v7118_v13 = vor.u32 %v9641_v8, %v7115_v9  ;;  %v6827_v17 = vld [vmem:[#allocation3 + $0x178] sm:$0xf0] }
 0x275   :  { %v9733_v30 = vld [vmem:[#allocation3 + $0x674] sm:$0xf0]  ;;  %2642 = vmatpush.bf16.msrb.mxu0 %v7242_v19  ;;  %2617 = vmatpush.bf16.msra.mxu2 %v6698_v32  ;;  %v9633_v19 = vld [vmem:[#allocation3 + $0x35c] sm:$0xf]  ;;  %v6830_v27 = vor.u32 %v9569_v16, %v6827_v17 }
 0x276   :  { %v6665_v31 = vld [vmem:[#allocation3 + $0x18] sm:$0xf]  ;;  %v7466_v43 = vor.u32 %v9733_v30, %v7465_v24  ;;  %v9697_v22 = vld [vmem:[#allocation3 + $0x55c] sm:$0xf]  ;;  %v7086_v28 = vor.u32 %v9633_v19, %v7083_v21 }
 0x277   :  { %v9533_v33 = vld [vmem:[#allocation3 + $0x34] sm:$0xf0]  ;;  %2655 = vmatpush.bf16.msrb.mxu1 %v7498_v26  ;;  %2630 = vmatpush.bf16.msra.mxu3 %v6954_v37  ;;  %v9761_v26 = vld [vmem:[#allocation3 + $0x75c] sm:$0xf]  ;;  %v7342_v29 = vor.u32 %v9697_v22, %v7339_v25 }
 0x278   :  { %v6921_v34 = vld [vmem:[#allocation3 + $0x218] sm:$0xf]  ;;  %v6666_v51 = vor.u32 %v9533_v33, %v6665_v31  ;;  %v7595_v23 = vld [vmem:[#allocation3 + $0x778] sm:$0xf0] }
 0x279   :  { %v9597_v35 = vld [vmem:[#allocation3 + $0x234] sm:$0xf0]  ;;  %2643 = vmatpush.bf16.msrb.mxu0 %v7210_v38  ;;  %v9561_v24 = vld [vmem:[#allocation3 + $0x11c] sm:$0xf]  ;;  %v7598_v32 = vor.u32 %v9761_v26, %v7595_v23 }
 0x27a   :  { %v7177_v39 = vld [vmem:[#allocation3 + $0x418] sm:$0xf]  ;;  %v6922_v56 = vor.u32 %v9597_v35, %v6921_v34  ;;  %2618 = vmatpush.bf16.msra.mxu2 %v6666_v51  ;;  %v6795_v30 = vld [vmem:[#allocation3 + $0x138] sm:$0xf0]  ;;  %v1005_v51 = vperm.slane %v10667_v50, 2 }
 0x27b   :  { %v9661_v40 = vld [vmem:[#allocation3 + $0x434] sm:$0xf0]  ;;  %2656 = vmatpush.bf16.msrb.mxu1 %v7466_v43  ;;  %v9625_v31 = vld [vmem:[#allocation3 + $0x31c] sm:$0xf]  ;;  %v6798_v38 = vor.u32 %v9561_v24, %v6795_v30 }
 0x27c   :  { %v7433_v41 = vld [vmem:[#allocation3 + $0x618] sm:$0xf]  ;;  %v7178_v57 = vor.u32 %v9661_v40, %v7177_v39  ;;  %2631 = vmatpush.bf16.msra.mxu3 %v6922_v56  ;;  %v7051_v33 = vld [vmem:[#allocation3 + $0x338] sm:$0xf0] }
 0x27d   :  { %v9725_v45 = vld [vmem:[#allocation3 + $0x634] sm:$0xf0]  ;;  %2619 = vmatmul.bf16.vlgmr.msra.gmra.mxu2 %v10633_v61  ;;  %v9689_v34 = vld [vmem:[#allocation3 + $0x51c] sm:$0xf]  ;;  %v2438_v40 = vpop.f32.mrf.mxu0 }
 0x27e   :  { %v7434_v62 = vor.u32 %v9725_v45, %v7433_v41  ;;  %2644 = vmatpush.bf16.msrb.mxu0 %v7178_v57  ;;  %2663 = vmatpush.bf16.msrb.mxu2 %v6894_v3  ;;  %v7307_v35 = vld [vmem:[#allocation3 + $0x538] sm:$0xf0]  ;;  %v7054_v41 = vor.u32 %v9625_v31, %v7051_v33 }
 0x27f   :  { %2632 = vmatmul.bf16.vlgmr.msra.gmra.mxu3 %v10637_v0  ;;  %v9753_v36 = vld [vmem:[#allocation3 + $0x71c] sm:$0xf]  ;;  %v7310_v42 = vor.u32 %v9689_v34, %v7307_v35  ;;  %v2451_v47 = vpop.f32.mrf.mxu1  ;;  %v2412_v3 = vpop.f32.mrf.mxu2 }
 0x280   :  { %2657 = vmatpush.bf16.msrb.mxu1 %v7434_v62  ;;  %2676 = vmatpush.bf16.msrb.mxu3 %v7150_v18  ;;  %v7563_v37 = vld [vmem:[#allocation3 + $0x738] sm:$0xf0]  ;;  %v2413_v8 = vadd.f32 %v2412_v3, %v1005_v51  ;;  %v1006_v51 = vperm.slane %v10667_v50, 3 }
 0x281   :  { %2645 = vmatmul.bf16.vlgmr.msrb.gmra.mxu0 %v10641_v2  ;;  %v9553_v39 = vld [vmem:[#allocation3 + $0xdc] sm:$0xf]  ;;  %v7566_v15 = vor.u32 %v9753_v36, %v7563_v37 }
 0x282   :  { %2689 = vmatpush.bf16.msra.mxu0 %v7406_v5  ;;  %2664 = vmatpush.bf16.msrb.mxu2 %v6862_v60  ;;  %v6763_v43 = vld [vmem:[#allocation3 + $0xf8] sm:$0xf0] }
 0x283   :  { %2658 = vmatmul.bf16.vlgmr.msrb.gmra.mxu1 %v10645_v4  ;;  %v9617_v45 = vld [vmem:[#allocation3 + $0x2dc] sm:$0xf]  ;;  %v6766_v54 = vor.u32 %v9553_v39, %v6763_v43 }
 0x284   :  { %2702 = vmatpush.bf16.msra.mxu1 %v7662_v44  ;;  %2677 = vmatpush.bf16.msrb.mxu3 %v7118_v13  ;;  %v7019_v46 = vld [vmem:[#allocation3 + $0x2f8] sm:$0xf0]  ;;  %v2425_v44 = vpop.f32.mrf.mxu3 }
 0x285   :  { %v9681_v48 = vld [vmem:[#allocation3 + $0x4dc] sm:$0xf]  ;;  %v7022_v56 = vor.u32 %v9617_v45, %v7019_v46  ;;  %v2426_v11 = vadd.f32 %v2425_v44, %v2413_v8  ;;  %v2440_v12 = vpop.f32.mrf.mxu0 }
 0x286   :  { %2690 = vmatpush.bf16.msra.mxu0 %v7374_v14  ;;  %2665 = vmatpush.bf16.msrb.mxu2 %v6830_v27  ;;  %v7275_v49 = vld [vmem:[#allocation3 + $0x4f8] sm:$0xf0] }
 0x287   :  { %v9745_v52 = vld [vmem:[#allocation3 + $0x6dc] sm:$0xf]  ;;  %v7278_v57 = vor.u32 %v9681_v48, %v7275_v49  ;;  %v2453_v19 = vpop.f32.mrf.mxu1  ;;  %v2439_v26 = vadd.f32 %v2438_v40, %v2426_v11  ;;  %v2414_v36 = vpop.f32.mrf.mxu2 }
 0x288   :  { %2703 = vmatpush.bf16.msra.mxu1 %v7630_v20  ;;  %2678 = vmatpush.bf16.msrb.mxu3 %v7086_v28  ;;  %v7531_v53 = vld [vmem:[#allocation3 + $0x6f8] sm:$0xf0]  ;;  %v1008_v19 = vperm.slane %v10667_v50, 5 }
 0x289   :  { %v9545_v58 = vld [vmem:[#allocation3 + $0x9c] sm:$0xf]  ;;  %v7534_v18 = vor.u32 %v9745_v52, %v7531_v53  ;;  %v2452_v30 = vadd.f32 %v2451_v47, %v2439_v26 }
 0x28a   :  { %2691 = vmatpush.bf16.msra.mxu0 %v7342_v29  ;;  %2666 = vmatpush.bf16.msrb.mxu2 %v6798_v38  ;;  %v6731_v59 = vld [vmem:[#allocation3 + $0xb8] sm:$0xf0] }
 0x28b   :  { %v9609_v62 = vld [vmem:[#allocation3 + $0x29c] sm:$0xf]  ;;  %v6734_v1 = vor.u32 %v9545_v58, %v6731_v59  ;;  %vm2717_vm9 = vcmp.ge.f32.partialorder %v2452_v30, 0.0  ;;  %v2725_v39 = vmul.f32 0.2, %v2452_v30 }
 0x28c   :  { %2704 = vmatpush.bf16.msra.mxu1 %v7598_v32  ;;  %2679 = vmatpush.bf16.msrb.mxu3 %v7054_v41  ;;  %v6987_v5 = vld [vmem:[#allocation3 + $0x2b8] sm:$0xf0]  ;;  %v2427_v40 = vpop.f32.mrf.mxu3 }
 0x28d   :  { %v9673_v6 = vld [vmem:[#allocation3 + $0x49c] sm:$0xf]  ;;  %v6990_v60 = vor.u32 %v9609_v62, %v6987_v5  ;;  %v10684_v45 = vsel %vm2717_vm9, %v2452_v30, %v2725_v39  ;;  %v1007_v5 = vperm.slane %v10667_v50, 4 }
 0x28e   :  { %2692 = vmatpush.bf16.msra.mxu0 %v7310_v42  ;;  %v7243_v7 = vld [vmem:[#allocation3 + $0x4b8] sm:$0xf0]  ;;  %2667 = vmatpush.bf16.msrb.mxu2 %v6766_v54 }
 0x28f   :  { %v9737_v9 = vld [vmem:[#allocation3 + $0x69c] sm:$0xf]  ;;  %v7246_v13 = vor.u32 %v9673_v6, %v7243_v7 }
 0x290   :  { %2705 = vmatpush.bf16.msra.mxu1 %v7566_v15  ;;  %v7499_v10 = vld [vmem:[#allocation3 + $0x6b8] sm:$0xf0]  ;;  %2680 = vmatpush.bf16.msrb.mxu3 %v7022_v56 }
 0x291   :  { %v9537_v14 = vld [vmem:[#allocation3 + $0x5c] sm:$0xf]  ;;  %v7502_v20 = vor.u32 %v9737_v9, %v7499_v10 }
 0x292   :  { %2693 = vmatpush.bf16.msra.mxu0 %v7278_v57  ;;  %v6699_v16 = vld [vmem:[#allocation3 + $0x78] sm:$0xf0]  ;;  %2668 = vmatpush.bf16.msrb.mxu2 %v6734_v1 }
 0x293   :  { %v9601_v17 = vld [vmem:[#allocation3 + $0x25c] sm:$0xf]  ;;  %v6702_v28 = vor.u32 %v9537_v14, %v6699_v16 }
 0x294   :  { %2706 = vmatpush.bf16.msra.mxu1 %v7534_v18  ;;  %v6955_v21 = vld [vmem:[#allocation3 + $0x278] sm:$0xf0]  ;;  %2681 = vmatpush.bf16.msrb.mxu3 %v6990_v60 }
 0x295   :  { %v9665_v22 = vld [vmem:[#allocation3 + $0x45c] sm:$0xf]  ;;  %v6958_v31 = vor.u32 %v9601_v17, %v6955_v21 }
 0x296   :  { %v7211_v25 = vld [vmem:[#allocation3 + $0x478] sm:$0xf0]  ;;  %2694 = vmatpush.bf16.msra.mxu0 %v7246_v13  ;;  %2669 = vmatpush.bf16.msrb.mxu2 %v6702_v28 }
 0x297   :  { %v9729_v23 = vld [vmem:[#allocation3 + $0x65c] sm:$0xf]  ;;  %v7214_v32 = vor.u32 %v9665_v22, %v7211_v25 }
 0x298   :  { %v7467_v27 = vld [vmem:[#allocation3 + $0x678] sm:$0xf0]  ;;  %2707 = vmatpush.bf16.msra.mxu1 %v7502_v20  ;;  %2682 = vmatpush.bf16.msrb.mxu3 %v6958_v31 }
 0x299   :  { %v9529_v29 = vld [vmem:[#allocation3 + $0x1c] sm:$0xf]  ;;  %v7470_v37 = vor.u32 %v9729_v23, %v7467_v27 }
 0x29a   :  { %v6667_v24 = vld [vmem:[#allocation3 + $0x38] sm:$0xf0]  ;;  %2695 = vmatpush.bf16.msra.mxu0 %v7214_v32 }
 0x29b   :  { %v9593_v33 = vld [vmem:[#allocation3 + $0x21c] sm:$0xf]  ;;  %v6670_v43 = vor.u32 %v9529_v29, %v6667_v24 }
 0x29c   :  { %v6923_v34 = vld [vmem:[#allocation3 + $0x238] sm:$0xf0]  ;;  %2708 = vmatpush.bf16.msra.mxu1 %v7470_v37 }
 0x29d   :  { %v9657_v35 = vld [vmem:[#allocation3 + $0x41c] sm:$0xf]  ;;  %v6926_v46 = vor.u32 %v9593_v33, %v6923_v34  ;;  %2670 = vmatpush.bf16.msrb.mxu2 %v6670_v43  ;;  %v2490_v48 = vpop.f32.mrf.mxu0  ;;  %v1009_v34 = vperm.slane %v10667_v50, 6 }
 0x29e   :  { %v7179_v38 = vld [vmem:[#allocation3 + $0x438] sm:$0xf0] }
 0x29f   :  { %v9721_v41 = vld [vmem:[#allocation3 + $0x61c] sm:$0xf]  ;;  %v7182_v47 = vor.u32 %v9657_v35, %v7179_v38  ;;  %2683 = vmatpush.bf16.msrb.mxu3 %v6926_v46  ;;  %v2503_v49 = vpop.f32.mrf.mxu1  ;;  %v2464_v52 = vpop.f32.mrf.mxu2 }
 0x2a0   :  { %v7435_v42 = vld [vmem:[#allocation3 + $0x638] sm:$0xf0]  ;;  %2671 = vmatmul.bf16.vlgmr.msrb.gmra.mxu2 %v10633_v61  ;;  %v2465_v53 = vadd.f32 %v2464_v52, %v1006_v51  ;;  %v1010_v51 = vperm.slane %v10667_v50, 7 }
 0x2a1   :  { %v7438_v15 = vor.u32 %v9721_v41, %v7435_v42  ;;  %2696 = vmatpush.bf16.msra.mxu0 %v7182_v47  ;;  %v2477_v54 = vpop.f32.mrf.mxu3 }
 0x2a2   :  { %2684 = vmatmul.bf16.vlgmr.msrb.gmra.mxu3 %v10637_v0  ;;  %v2478_v56 = vadd.f32 %v2477_v54, %v2465_v53 }
 0x2a3   :  { %2709 = vmatpush.bf16.msra.mxu1 %v7438_v15 }
 0x2a4   :  { %2697 = vmatmul.bf16.vlgmr.msra.gmra.mxu0 %v10641_v2  ;;  %v2491_v59 = vadd.f32 %v2490_v48, %v2478_v56 }
 0x2a5   :  { %v2492_v57 = vpop.f32.mrf.mxu0 }
 0x2a6   :  { %2710 = vmatmul.bf16.vlgmr.msra.gmra.mxu1 %v10645_v4  ;;  %v2504_v62 = vadd.f32 %v2503_v49, %v2491_v59 }
 0x2a7   :  { %v2505_v58 = vpop.f32.mrf.mxu1  ;;  %v2466_v3 = vpop.f32.mrf.mxu2 }
 0x2a8   :  { %vm2718_vm10 = vcmp.ge.f32.partialorder %v2504_v62, 0.0  ;;  %v2726_v61 = vmul.f32 0.2, %v2504_v62 }
 0x2a9   :  { %v2479_v0 = vpop.f32.mrf.mxu3 }
 0x2aa   :  { %v10691_v18 = vsel %vm2718_vm10, %v2504_v62, %v2726_v61 }
 0x2bd   :  { %v2542_v2 = vpop.f32.mrf.mxu0 }
 0x2bf   :  { %v2555_v4 = vpop.f32.mrf.mxu1  ;;  %v2516_v6 = vpop.f32.mrf.mxu2 }
 0x2c0   :  { %v2517_v7 = vadd.f32 %v2516_v6, %v1007_v5 }
 0x2c1   :  { %v2529_v8 = vpop.f32.mrf.mxu3 }
 0x2c2   :  { %v2530_v44 = vadd.f32 %v2529_v8, %v2517_v7 }
 0x2c4   :  { %v2543_v1 = vadd.f32 %v2542_v2, %v2530_v44 }
 0x2c5   :  { %v2544_v9 = vpop.f32.mrf.mxu0 }
 0x2c6   :  { %v2556_v11 = vadd.f32 %v2555_v4, %v2543_v1 }
 0x2c7   :  { %v2557_v10 = vpop.f32.mrf.mxu1  ;;  %v2518_v12 = vpop.f32.mrf.mxu2 }
 0x2c8   :  { %vm2719_vm11 = vcmp.ge.f32.partialorder %v2556_v11, 0.0  ;;  %v2727_v60 = vmul.f32 0.2, %v2556_v11 }
 0x2c9   :  { %v2531_v13 = vpop.f32.mrf.mxu3 }
 0x2ca   :  { %v10694_v14 = vsel %vm2719_vm11, %v2556_v11, %v2727_v60 }
 0x2dd   :  { %v2594_v16 = vpop.f32.mrf.mxu0 }
 0x2df   :  { %v2607_v17 = vpop.f32.mrf.mxu1  ;;  %v2568_v20 = vpop.f32.mrf.mxu2 }
 0x2e0   :  { %v2569_v21 = vadd.f32 %v2568_v20, %v1008_v19 }
 0x2e1   :  { %v2581_v22 = vpop.f32.mrf.mxu3 }
 0x2e2   :  { %v2582_v25 = vadd.f32 %v2581_v22, %v2569_v21 }
 0x2e4   :  { %v2595_v27 = vadd.f32 %v2594_v16, %v2582_v25 }
 0x2e5   :  { %v2596_v26 = vpop.f32.mrf.mxu0 }
 0x2e6   :  { %v2608_v28 = vadd.f32 %v2607_v17, %v2595_v27 }
 0x2e7   :  { %v2609_v23 = vpop.f32.mrf.mxu1  ;;  %v2570_v29 = vpop.f32.mrf.mxu2 }
 0x2e8   :  { %vm2720_vm12 = vcmp.ge.f32.partialorder %v2608_v28, 0.0  ;;  %v2728_v24 = vmul.f32 0.2, %v2608_v28 }
 0x2e9   :  { %v2583_v30 = vpop.f32.mrf.mxu3 }
 0x2ea   :  { %v10697_v31 = vsel %vm2720_vm12, %v2608_v28, %v2728_v24 }
 0x2fe   :  { %v2646_v32 = vpop.f32.mrf.mxu0 }
 0x300   :  { %v2659_v33 = vpop.f32.mrf.mxu1  ;;  %v2620_v35 = vpop.f32.mrf.mxu2 }
 0x301   :  { %v2621_v36 = vadd.f32 %v2620_v35, %v1009_v34 }
 0x302   :  { %v2633_v37 = vpop.f32.mrf.mxu3 }
 0x303   :  { %v2634_v38 = vadd.f32 %v2633_v37, %v2621_v36 }
 0x305   :  { %v2647_v41 = vadd.f32 %v2646_v32, %v2634_v38 }
 0x306   :  { %v2648_v39 = vpop.f32.mrf.mxu0 }
 0x307   :  { %v2660_v42 = vadd.f32 %v2659_v33, %v2647_v41 }
 0x308   :  { %v2661_v40 = vpop.f32.mrf.mxu1  ;;  %v2622_v43 = vpop.f32.mrf.mxu2 }
 0x309   :  { %vm2721_vm13 = vcmp.ge.f32.partialorder %v2660_v42, 0.0  ;;  %v2729_v46 = vmul.f32 0.2, %v2660_v42 }
 0x30a   :  { %v2635_v47 = vpop.f32.mrf.mxu3 }
 0x30b   :  { %v10700_v15 = vsel %vm2721_vm13, %v2660_v42, %v2729_v46 }
 0x321   :  { %v2698_v48 = vpop.f32.mrf.mxu0 }
 0x323   :  { %v2711_v49 = vpop.f32.mrf.mxu1  ;;  %v2672_v52 = vpop.f32.mrf.mxu2 }
 0x324   :  { %v2673_v53 = vadd.f32 %v2672_v52, %v1010_v51 }
 0x325   :  { %v2685_v54 = vpop.f32.mrf.mxu3 }
 0x326   :  { %v2686_v56 = vadd.f32 %v2685_v54, %v2673_v53 }
 0x328   :  { %v2699_v59 = vadd.f32 %v2698_v48, %v2686_v56 }
 0x329   :  { %v2700_v57 = vpop.f32.mrf.mxu0 }
 0x32a   :  { %v2712_v62 = vadd.f32 %v2711_v49, %v2699_v59 }
 0x32b   :  { %v2713_v58 = vpop.f32.mrf.mxu1  ;;  %v2674_v3 = vpop.f32.mrf.mxu2 }
 0x32c   :  { %vm2722_vm14 = vcmp.ge.f32.partialorder %v2712_v62, 0.0  ;;  %v2730_v61 = vmul.f32 0.2, %v2712_v62 }
 0x32d   :  { %v2687_v0 = vpop.f32.mrf.mxu3 }
 0x32e   :  { %v10703_v2 = vsel %vm2722_vm14, %v2712_v62, %v2730_v61 }
 0x32f   :  { %10510 = dma.done.wait [#allocation5 + $0x2], 57344 }
 0x330   :  { %10511 = vsyncadd [#allocation5 + $0x2], 4294909952  ;;  %v7861_v4 = vld [vmem:[#allocation4 + $0x188] sm:$0xf]  ;;  %v9834_v5 = vld [vmem:[#allocation4 + $0x1a0] sm:$0xf0] }
 0x331   :  { %v8085_v6 = vld [vmem:[#allocation4 + $0x348] sm:$0xf]  ;;  %v7862_v50 = vor.u32 %v9834_v5, %v7861_v4  ;;  %v9890_v7 = vld [vmem:[#allocation4 + $0x360] sm:$0xf0]  ;;  %v7833_v1 = vld [vmem:[#allocation4 + $0x150] sm:$0xf] }
 0x332   :  { %v8309_v8 = vld [vmem:[#allocation4 + $0x508] sm:$0xf]  ;;  %v9946_v44 = vld [vmem:[#allocation4 + $0x520] sm:$0xf0]  ;;  %v8086_v9 = vor.u32 %v9890_v7, %v8085_v6  ;;  %v9827_v11 = vld [vmem:[#allocation4 + $0x168] sm:$0xf0] }
 0x333   :  { %v8310_v10 = vor.u32 %v9946_v44, %v8309_v8  ;;  %v8057_v12 = vld [vmem:[#allocation4 + $0x310] sm:$0xf]  ;;  %5583 = vmatpush.bf16.msra.mxu2 %v7862_v50  ;;  %v7834_v60 = vor.u32 %v9827_v11, %v7833_v1  ;;  %v9883_v13 = vld [vmem:[#allocation4 + $0x328] sm:$0xf0]  ;;  %v8533_v16 = vld [vmem:[#allocation4 + $0x6c8] sm:$0xf] }
 0x334   :  { %v10002_v17 = vld [vmem:[#allocation4 + $0x6e0] sm:$0xf0]  ;;  %5596 = vmatpush.bf16.msra.mxu3 %v8086_v9  ;;  %v8058_v19 = vor.u32 %v9883_v13, %v8057_v12  ;;  %v8281_v21 = vld [vmem:[#allocation4 + $0x4d0] sm:$0xf]  ;;  %v9939_v22 = vld [vmem:[#allocation4 + $0x4e8] sm:$0xf0] }
 0x335   :  { %5609 = vmatpush.bf16.msrb.mxu0 %v8310_v10  ;;  %v8534_v20 = vor.u32 %v10002_v17, %v8533_v16  ;;  %v7805_v25 = vld [vmem:[#allocation4 + $0x118] sm:$0xf]  ;;  %v8282_v26 = vor.u32 %v9939_v22, %v8281_v21  ;;  %v9820_v23 = vld [vmem:[#allocation4 + $0x130] sm:$0xf0]  ;;  %v8505_v29 = vld [vmem:[#allocation4 + $0x690] sm:$0xf] }
 0x336   :  { %v8029_v27 = vld [vmem:[#allocation4 + $0x2d8] sm:$0xf]  ;;  %v9876_v28 = vld [vmem:[#allocation4 + $0x2f0] sm:$0xf0]  ;;  %v9995_v24 = vld [vmem:[#allocation4 + $0x6a8] sm:$0xf0]  ;;  %v7806_v32 = vor.u32 %v9820_v23, %v7805_v25 }
 0x337   :  { %5622 = vmatpush.bf16.msrb.mxu1 %v8534_v20  ;;  %v8253_v30 = vld [vmem:[#allocation4 + $0x498] sm:$0xf]  ;;  %5584 = vmatpush.bf16.msra.mxu2 %v7834_v60  ;;  %v8506_v33 = vor.u32 %v9995_v24, %v8505_v29  ;;  %v9932_v34 = vld [vmem:[#allocation4 + $0x4b0] sm:$0xf0]  ;;  %v7777_v35 = vld [vmem:[#allocation4 + $0xe0] sm:$0xf]  ;;  %v8030_v37 = vor.u32 %v9876_v28, %v8029_v27 }
 0x338   :  { %v9813_v36 = vld [vmem:[#allocation4 + $0xf8] sm:$0xf0]  ;;  %5597 = vmatpush.bf16.msra.mxu3 %v8058_v19  ;;  %v8254_v38 = vor.u32 %v9932_v34, %v8253_v30  ;;  %v8001_v39 = vld [vmem:[#allocation4 + $0x2a0] sm:$0xf]  ;;  %v8477_v41 = vld [vmem:[#allocation4 + $0x658] sm:$0xf] }
 0x339   :  { %5610 = vmatpush.bf16.msrb.mxu0 %v8282_v26  ;;  %v9869_v40 = vld [vmem:[#allocation4 + $0x2b8] sm:$0xf0]  ;;  %v9988_v42 = vld [vmem:[#allocation4 + $0x670] sm:$0xf0]  ;;  %v8225_v43 = vld [vmem:[#allocation4 + $0x460] sm:$0xf]  ;;  %v7778_v48 = vor.u32 %v9813_v36, %v7777_v35 }
 0x33a   :  { %v9925_v46 = vld [vmem:[#allocation4 + $0x478] sm:$0xf0]  ;;  %v8478_v47 = vor.u32 %v9988_v42, %v8477_v41  ;;  %v8449_v49 = vld [vmem:[#allocation4 + $0x620] sm:$0xf]  ;;  %v8002_v52 = vor.u32 %v9869_v40, %v8001_v39  ;;  %v7749_v54 = vld [vmem:[#allocation4 + $0xa8] sm:$0xf] }
 0x33b   :  { %5623 = vmatpush.bf16.msrb.mxu1 %v8506_v33  ;;  %5585 = vmatpush.bf16.msra.mxu2 %v7806_v32  ;;  %v9981_v51 = vld [vmem:[#allocation4 + $0x638] sm:$0xf0]  ;;  %v8226_v53 = vor.u32 %v9925_v46, %v8225_v43  ;;  %v9806_v56 = vld [vmem:[#allocation4 + $0xc0] sm:$0xf0]  ;;  %v7973_v57 = vld [vmem:[#allocation4 + $0x268] sm:$0xf] }
 0x33c   :  { %5598 = vmatpush.bf16.msra.mxu3 %v8030_v37  ;;  %v9862_v58 = vld [vmem:[#allocation4 + $0x280] sm:$0xf0]  ;;  %v8197_v59 = vld [vmem:[#allocation4 + $0x428] sm:$0xf]  ;;  %v8450_v3 = vor.u32 %v9981_v51, %v8449_v49  ;;  %v7750_v61 = vor.u32 %v9806_v56, %v7749_v54  ;;  %v7721_v50 = vld [vmem:[#allocation4 + $0x70] sm:$0xf] }
 0x33d   :  { %5611 = vmatpush.bf16.msrb.mxu0 %v8254_v38  ;;  %v9918_v62 = vld [vmem:[#allocation4 + $0x440] sm:$0xf0]  ;;  %v8421_v0 = vld [vmem:[#allocation4 + $0x5e8] sm:$0xf]  ;;  %v7974_v5 = vor.u32 %v9862_v58, %v7973_v57  ;;  %v9799_v7 = vld [vmem:[#allocation4 + $0x88] sm:$0xf0] }
 0x33e   :  { %v9974_v4 = vld [vmem:[#allocation4 + $0x600] sm:$0xf0]  ;;  %v8198_v6 = vor.u32 %v9918_v62, %v8197_v59  ;;  %v7945_v8 = vld [vmem:[#allocation4 + $0x230] sm:$0xf]  ;;  %v9855_v44 = vld [vmem:[#allocation4 + $0x248] sm:$0xf0]  ;;  %v7722_v11 = vor.u32 %v9799_v7, %v7721_v50 }
 0x33f   :  { %5624 = vmatpush.bf16.msrb.mxu1 %v8478_v47  ;;  %5586 = vmatpush.bf16.msra.mxu2 %v7778_v48  ;;  %v8169_v9 = vld [vmem:[#allocation4 + $0x3f0] sm:$0xf]  ;;  %v9911_v10 = vld [vmem:[#allocation4 + $0x408] sm:$0xf0]  ;;  %v8422_v1 = vor.u32 %v9974_v4, %v8421_v0  ;;  %v7946_v13 = vor.u32 %v9855_v44, %v7945_v8  ;;  %v7693_v17 = vld [vmem:[#allocation4 + $0x38] sm:$0xf]  ;;  %v10711_v44 = vpack.c.bf16 %v10677_v55, %v10677_v55 }
 0x340   :  { %5599 = vmatpush.bf16.msra.mxu3 %v8002_v52  ;;  %v8393_v12 = vld [vmem:[#allocation4 + $0x5b0] sm:$0xf]  ;;  %v9967_v60 = vld [vmem:[#allocation4 + $0x5c8] sm:$0xf0]  ;;  %v8170_v16 = vor.u32 %v9911_v10, %v8169_v9  ;;  %v9792_v19 = vld [vmem:[#allocation4 + $0x50] sm:$0xf0] }
 0x341   :  { %5612 = vmatpush.bf16.msrb.mxu0 %v8226_v53  ;;  %v7917_v20 = vld [vmem:[#allocation4 + $0x1f8] sm:$0xf]  ;;  %v9848_v21 = vld [vmem:[#allocation4 + $0x210] sm:$0xf0]  ;;  %v8394_v26 = vor.u32 %v9967_v60, %v8393_v12  ;;  %v7665_v23 = vld [vmem:[#allocation4] sm:$0xf]  ;;  %v7694_v27 = vor.u32 %v9792_v19, %v7693_v17 }
 0x342   :  { %v8141_v22 = vld [vmem:[#allocation4 + $0x3b8] sm:$0xf]  ;;  %v9904_v25 = vld [vmem:[#allocation4 + $0x3d0] sm:$0xf0]  ;;  %v9785_v28 = vld [vmem:[#allocation4 + $0x18] sm:$0xf0]  ;;  %v7918_v30 = vor.u32 %v9848_v21, %v7917_v20 }
 0x343   :  { %5625 = vmatpush.bf16.msrb.mxu1 %v8450_v3  ;;  %5587 = vmatpush.bf16.msra.mxu2 %v7750_v61  ;;  %v8365_v29 = vld [vmem:[#allocation4 + $0x578] sm:$0xf]  ;;  %v9960_v24 = vld [vmem:[#allocation4 + $0x590] sm:$0xf0]  ;;  %v8142_v32 = vor.u32 %v9904_v25, %v8141_v22  ;;  %v7889_v33 = vld [vmem:[#allocation4 + $0x1c0] sm:$0xf]  ;;  %v7666_v43 = vor.u32 %v9785_v28, %v7665_v23 }
 0x344   :  { %5600 = vmatpush.bf16.msra.mxu3 %v7974_v5  ;;  %v9841_v34 = vld [vmem:[#allocation4 + $0x1d8] sm:$0xf0]  ;;  %v8757_v35 = vld [vmem:[#allocation4 + $0x888] sm:$0xf]  ;;  %v10058_v36 = vld [vmem:[#allocation4 + $0x8a0] sm:$0xf0]  ;;  %v8366_v39 = vor.u32 %v9960_v24, %v8365_v29 }
 0x345   :  { %5613 = vmatpush.bf16.msrb.mxu0 %v8198_v6  ;;  %v8981_v37 = vld [vmem:[#allocation4 + $0xa48] sm:$0xf]  ;;  %v10114_v38 = vld [vmem:[#allocation4 + $0xa60] sm:$0xf0]  ;;  %v8113_v40 = vld [vmem:[#allocation4 + $0x380] sm:$0xf]  ;;  %v7890_v49 = vor.u32 %v9841_v34, %v7889_v33  ;;  %v8758_v51 = vor.u32 %v10058_v36, %v8757_v35  ;;  %v10707_v6 = vpack.c.bf16 %v10670_v63, %v10670_v63 }
 0x346   :  { %v9897_v41 = vld [vmem:[#allocation4 + $0x398] sm:$0xf0]  ;;  %v9205_v42 = vld [vmem:[#allocation4 + $0xc08] sm:$0xf]  ;;  %v10170_v46 = vld [vmem:[#allocation4 + $0xc20] sm:$0xf0]  ;;  %v8982_v54 = vor.u32 %v10114_v38, %v8981_v37 }
 0x347   :  { %5626 = vmatpush.bf16.msrb.mxu1 %v8422_v1  ;;  %5588 = vmatpush.bf16.msra.mxu2 %v7722_v11  ;;  %v8337_v47 = vld [vmem:[#allocation4 + $0x540] sm:$0xf]  ;;  %v9953_v48 = vld [vmem:[#allocation4 + $0x558] sm:$0xf0]  ;;  %v9429_v52 = vld [vmem:[#allocation4 + $0xdc8] sm:$0xf]  ;;  %v8114_v56 = vor.u32 %v9897_v41, %v8113_v40  ;;  %v9206_v59 = vor.u32 %v10170_v46, %v9205_v42  ;;  %v10715_v11 = vpack.c.bf16 %v10684_v45, %v10684_v45 }
 0x348   :  { %5601 = vmatpush.bf16.msra.mxu3 %v7946_v13  ;;  %v10226_v53 = vld [vmem:[#allocation4 + $0xde0] sm:$0xf0]  ;;  %v8729_v57 = vld [vmem:[#allocation4 + $0x850] sm:$0xf]  ;;  %v10051_v58 = vld [vmem:[#allocation4 + $0x868] sm:$0xf0]  ;;  %v8338_v62 = vor.u32 %v9953_v48, %v8337_v47  ;;  %v10719_v13 = vpack.c.bf16 %v10691_v18, %v10691_v18 }
 0x349   :  { %5614 = vmatpush.bf16.msrb.mxu0 %v8170_v16  ;;  %v8953_v3 = vld [vmem:[#allocation4 + $0xa10] sm:$0xf]  ;;  %v10107_v61 = vld [vmem:[#allocation4 + $0xa28] sm:$0xf0]  ;;  %v9430_v0 = vor.u32 %v10226_v53, %v9429_v52  ;;  %v8730_v50 = vor.u32 %v10051_v58, %v8729_v57  ;;  %v8701_v10 = vld [vmem:[#allocation4 + $0x818] sm:$0xf] }
 0x34a   :  { %v9177_v4 = vld [vmem:[#allocation4 + $0xbd0] sm:$0xf]  ;;  %v10163_v5 = vld [vmem:[#allocation4 + $0xbe8] sm:$0xf0]  ;;  %v8954_v9 = vor.u32 %v10107_v61, %v8953_v3  ;;  %v10044_v1 = vld [vmem:[#allocation4 + $0x830] sm:$0xf0] }
 0x34b   :  { %5627 = vmatpush.bf16.msrb.mxu1 %v8394_v26  ;;  %5589 = vmatpush.bf16.msra.mxu2 %v7694_v27  ;;  %v9401_v7 = vld [vmem:[#allocation4 + $0xd90] sm:$0xf]  ;;  %v10219_v8 = vld [vmem:[#allocation4 + $0xda8] sm:$0xf0]  ;;  %v9178_v63 = vor.u32 %v10163_v5, %v9177_v4  ;;  %v8925_v12 = vld [vmem:[#allocation4 + $0x9d8] sm:$0xf]  ;;  %v8702_v19 = vor.u32 %v10044_v1, %v8701_v10 }
 0x34c   :  { %5602 = vmatpush.bf16.msra.mxu3 %v7918_v30  ;;  %v10100_v60 = vld [vmem:[#allocation4 + $0x9f0] sm:$0xf0]  ;;  %v9402_v55 = vor.u32 %v10219_v8, %v9401_v7  ;;  %v9149_v16 = vld [vmem:[#allocation4 + $0xb98] sm:$0xf]  ;;  %v8673_v22 = vld [vmem:[#allocation4 + $0x7e0] sm:$0xf] }
 0x34d   :  { %5615 = vmatpush.bf16.msrb.mxu0 %v8142_v32  ;;  %v10156_v17 = vld [vmem:[#allocation4 + $0xbb0] sm:$0xf0]  ;;  %v9373_v20 = vld [vmem:[#allocation4 + $0xd58] sm:$0xf]  ;;  %v8926_v21 = vor.u32 %v10100_v60, %v8925_v12  ;;  %v10037_v25 = vld [vmem:[#allocation4 + $0x7f8] sm:$0xf0] }
 0x34e   :  { %v10212_v45 = vld [vmem:[#allocation4 + $0xd70] sm:$0xf0]  ;;  %v9150_v18 = vor.u32 %v10156_v17, %v9149_v16  ;;  %v8897_v26 = vld [vmem:[#allocation4 + $0x9a0] sm:$0xf]  ;;  %v10093_v23 = vld [vmem:[#allocation4 + $0x9b8] sm:$0xf0]  ;;  %v8674_v24 = vor.u32 %v10037_v25, %v8673_v22 }
 0x34f   :  { %5628 = vmatpush.bf16.msrb.mxu1 %v8366_v39  ;;  %5590 = vmatpush.bf16.msra.mxu2 %v7666_v43  ;;  %v9374_v27 = vor.u32 %v10212_v45, %v9373_v20  ;;  %v9121_v28 = vld [vmem:[#allocation4 + $0xb60] sm:$0xf]  ;;  %v10149_v29 = vld [vmem:[#allocation4 + $0xb78] sm:$0xf0]  ;;  %v8898_v33 = vor.u32 %v10093_v23, %v8897_v26  ;;  %v8645_v34 = vld [vmem:[#allocation4 + $0x7a8] sm:$0xf] }
 0x350   :  { %5603 = vmatpush.bf16.msra.mxu3 %v7890_v49  ;;  %v9345_v30 = vld [vmem:[#allocation4 + $0xd20] sm:$0xf]  ;;  %v10205_v32 = vld [vmem:[#allocation4 + $0xd38] sm:$0xf0]  ;;  %v10030_v35 = vld [vmem:[#allocation4 + $0x7c0] sm:$0xf0]  ;;  %v9122_v36 = vor.u32 %v10149_v29, %v9121_v28 }
 0x351   :  { %5616 = vmatpush.bf16.msrb.mxu0 %v8114_v56  ;;  %v8869_v37 = vld [vmem:[#allocation4 + $0x968] sm:$0xf]  ;;  %v10086_v38 = vld [vmem:[#allocation4 + $0x980] sm:$0xf0]  ;;  %v9346_v39 = vor.u32 %v10205_v32, %v9345_v30  ;;  %v8646_v42 = vor.u32 %v10030_v35, %v8645_v34  ;;  %v8617_v48 = vld [vmem:[#allocation4 + $0x770] sm:$0xf] }
 0x352   :  { %5591 = vmatmul.bf16.vlgmr.msra.gmra.mxu2 %v10707_v6  ;;  %v9093_v40 = vld [vmem:[#allocation4 + $0xb28] sm:$0xf]  ;;  %v10142_v41 = vld [vmem:[#allocation4 + $0xb40] sm:$0xf0]  ;;  %v8870_v47 = vor.u32 %v10086_v38, %v8869_v37  ;;  %v10023_v49 = vld [vmem:[#allocation4 + $0x788] sm:$0xf0] }
 0x353   :  { %5635 = vmatpush.bf16.msrb.mxu2 %v8758_v51  ;;  %5629 = vmatpush.bf16.msrb.mxu1 %v8338_v62  ;;  %v9317_v43 = vld [vmem:[#allocation4 + $0xce8] sm:$0xf]  ;;  %v10198_v46 = vld [vmem:[#allocation4 + $0xd00] sm:$0xf0]  ;;  %v9094_v51 = vor.u32 %v10142_v41, %v9093_v40  ;;  %v8841_v52 = vld [vmem:[#allocation4 + $0x930] sm:$0xf]  ;;  %v8618_v58 = vor.u32 %v10023_v49, %v8617_v48  ;;  %v10727_v48 = vpack.c.bf16 %v10694_v14, %v10694_v14 }
 0x354   :  { %5648 = vmatpush.bf16.msrb.mxu3 %v8982_v54  ;;  %5617 = vmatmul.bf16.vlgmr.msrb.gmra.mxu0 %v10715_v11  ;;  %v10079_v53 = vld [vmem:[#allocation4 + $0x948] sm:$0xf0]  ;;  %v9318_v54 = vor.u32 %v10198_v46, %v9317_v43  ;;  %v9065_v56 = vld [vmem:[#allocation4 + $0xaf0] sm:$0xf]  ;;  %v8589_v61 = vld [vmem:[#allocation4 + $0x738] sm:$0xf] }
 0x355   :  { %5661 = vmatpush.bf16.msra.mxu0 %v9206_v59  ;;  %5604 = vmatmul.bf16.vlgmr.msra.gmra.mxu3 %v10711_v44  ;;  %v10135_v57 = vld [vmem:[#allocation4 + $0xb08] sm:$0xf0]  ;;  %v9289_v59 = vld [vmem:[#allocation4 + $0xcb0] sm:$0xf]  ;;  %v8842_v3 = vor.u32 %v10079_v53, %v8841_v52  ;;  %v8813_v5 = vld [vmem:[#allocation4 + $0x8f8] sm:$0xf]  ;;  %v10731_v53 = vpack.c.bf16 %v10697_v31, %v10697_v31 }
 0x356   :  { %5630 = vmatmul.bf16.vlgmr.msrb.gmra.mxu1 %v10719_v13  ;;  %v10191_v62 = vld [vmem:[#allocation4 + $0xcc8] sm:$0xf0]  ;;  %v9066_v4 = vor.u32 %v10135_v57, %v9065_v56  ;;  %v9037_v8 = vld [vmem:[#allocation4 + $0xab8] sm:$0xf]  ;;  %v8561_v10 = vld [vmem:[#allocation4 + $0x700] sm:$0xf] }
 0x357   :  { %5674 = vmatpush.bf16.msra.mxu1 %v9430_v0  ;;  %5636 = vmatpush.bf16.msrb.mxu2 %v8730_v50  ;;  %v10016_v0 = vld [vmem:[#allocation4 + $0x750] sm:$0xf0]  ;;  %v9290_v7 = vor.u32 %v10191_v62, %v9289_v59  ;;  %v9261_v12 = vld [vmem:[#allocation4 + $0xc78] sm:$0xf]  ;;  %v8785_v16 = vld [vmem:[#allocation4 + $0x8c0] sm:$0xf] }
 0x358   :  { %5649 = vmatpush.bf16.msrb.mxu3 %v8954_v9  ;;  %v10072_v50 = vld [vmem:[#allocation4 + $0x910] sm:$0xf0]  ;;  %v8590_v1 = vor.u32 %v10016_v0, %v8589_v61  ;;  %v10065_v17 = vld [vmem:[#allocation4 + $0x8d8] sm:$0xf0]  ;;  %v7863_v45 = vld [vmem:[#allocation4 + $0x1a4] sm:$0xf0] }
 0x359   :  { %5662 = vmatpush.bf16.msra.mxu0 %v9178_v63  ;;  %v10128_v9 = vld [vmem:[#allocation4 + $0xad0] sm:$0xf0]  ;;  %v10009_v63 = vld [vmem:[#allocation4 + $0x718] sm:$0xf0]  ;;  %v8087_v22 = vld [vmem:[#allocation4 + $0x364] sm:$0xf0]  ;;  %v8786_v30 = vor.u32 %v10065_v17, %v8785_v16 }
 0x35a   :  { %v10184_v60 = vld [vmem:[#allocation4 + $0xc90] sm:$0xf0]  ;;  %v9038_v20 = vor.u32 %v10128_v9, %v9037_v8  ;;  %v10121_v26 = vld [vmem:[#allocation4 + $0xa98] sm:$0xf0]  ;;  %v9943_v23 = vld [vmem:[#allocation4 + $0x50c] sm:$0xf] }
 0x35b   :  { %5675 = vmatpush.bf16.msra.mxu1 %v9402_v55  ;;  %5637 = vmatpush.bf16.msrb.mxu2 %v8702_v19  ;;  %v8814_v55 = vor.u32 %v10072_v50, %v8813_v5  ;;  %v9831_v19 = vld [vmem:[#allocation4 + $0x18c] sm:$0xf]  ;;  %v9262_v25 = vor.u32 %v10184_v60, %v9261_v12  ;;  %v8311_v28 = vld [vmem:[#allocation4 + $0x524] sm:$0xf0]  ;;  %v9233_v29 = vld [vmem:[#allocation4 + $0xc40] sm:$0xf] }
 0x35c   :  { %5650 = vmatpush.bf16.msrb.mxu3 %v8926_v21  ;;  %v9887_v21 = vld [vmem:[#allocation4 + $0x34c] sm:$0xf]  ;;  %v7866_v32 = vor.u32 %v9831_v19, %v7863_v45  ;;  %v8535_v34 = vld [vmem:[#allocation4 + $0x6e4] sm:$0xf0]  ;;  %v9824_v37 = vld [vmem:[#allocation4 + $0x154] sm:$0xf] }
 0x35d   :  { %5663 = vmatpush.bf16.msra.mxu0 %v9150_v18  ;;  %v9009_v18 = vld [vmem:[#allocation4 + $0xa80] sm:$0xf]  ;;  %v8090_v35 = vor.u32 %v9887_v21, %v8087_v22  ;;  %v7835_v38 = vld [vmem:[#allocation4 + $0x16c] sm:$0xf0]  ;;  %v9880_v41 = vld [vmem:[#allocation4 + $0x314] sm:$0xf] }
 0x35e   :  { %v9936_v46 = vld [vmem:[#allocation4 + $0x4d4] sm:$0xf]  ;;  %v7838_v49 = vor.u32 %v9824_v37, %v7835_v38  ;;  %v8507_v52 = vld [vmem:[#allocation4 + $0x6ac] sm:$0xf0]  ;;  %v9817_v56 = vld [vmem:[#allocation4 + $0x11c] sm:$0xf] }
 0x35f   :  { %5676 = vmatpush.bf16.msra.mxu1 %v9374_v27  ;;  %5638 = vmatpush.bf16.msrb.mxu2 %v8674_v24  ;;  %v8562_v27 = vor.u32 %v10009_v63, %v8561_v10  ;;  %v10177_v24 = vld [vmem:[#allocation4 + $0xc58] sm:$0xf0]  ;;  %v7807_v57 = vld [vmem:[#allocation4 + $0x134] sm:$0xf0]  ;;  %v7779_v8 = vld [vmem:[#allocation4 + $0xfc] sm:$0xf0] }
 0x360   :  { %5651 = vmatpush.bf16.msrb.mxu3 %v8898_v33  ;;  %v9999_v33 = vld [vmem:[#allocation4 + $0x6cc] sm:$0xf]  ;;  %v9234_v40 = vor.u32 %v10177_v24, %v9233_v29  ;;  %v9873_v59 = vld [vmem:[#allocation4 + $0x2dc] sm:$0xf]  ;;  %v8031_v62 = vld [vmem:[#allocation4 + $0x2f4] sm:$0xf0] }
 0x361   :  { %5664 = vmatpush.bf16.msra.mxu0 %v9122_v36  ;;  %v9010_v36 = vor.u32 %v10121_v26, %v9009_v18  ;;  %v8538_v43 = vor.u32 %v9999_v33, %v8535_v34  ;;  %v9929_v61 = vld [vmem:[#allocation4 + $0x49c] sm:$0xf]  ;;  %v8255_v0 = vld [vmem:[#allocation4 + $0x4b4] sm:$0xf0]  ;;  %v8034_v50 = vor.u32 %v9873_v59, %v8031_v62  ;;  %v9866_v9 = vld [vmem:[#allocation4 + $0x2a4] sm:$0xf] }
 0x362   :  { %v8479_v5 = vld [vmem:[#allocation4 + $0x674] sm:$0xf0]  ;;  %v8003_v10 = vld [vmem:[#allocation4 + $0x2bc] sm:$0xf0]  ;;  %v9922_v63 = vld [vmem:[#allocation4 + $0x464] sm:$0xf] }
 0x363   :  { %5677 = vmatpush.bf16.msra.mxu1 %v9346_v39  ;;  %5639 = vmatpush.bf16.msrb.mxu2 %v8646_v42  ;;  %v8314_v39 = vor.u32 %v9943_v23, %v8311_v28  ;;  %v8059_v42 = vld [vmem:[#allocation4 + $0x32c] sm:$0xf0]  ;;  %v8227_v12 = vld [vmem:[#allocation4 + $0x47c] sm:$0xf0]  ;;  %v8006_v17 = vor.u32 %v9866_v9, %v8003_v10  ;;  %v9803_v19 = vld [vmem:[#allocation4 + $0xac] sm:$0xf] }
 0x364   :  { %5652 = vmatpush.bf16.msrb.mxu3 %v8870_v47  ;;  %v8283_v47 = vld [vmem:[#allocation4 + $0x4ec] sm:$0xf0]  ;;  %v8451_v16 = vld [vmem:[#allocation4 + $0x63c] sm:$0xf0]  ;;  %v8230_v45 = vor.u32 %v9922_v63, %v8227_v12  ;;  %v9859_v21 = vld [vmem:[#allocation4 + $0x26c] sm:$0xf] }
 0x365   :  { %5665 = vmatpush.bf16.msra.mxu0 %v9094_v51  ;;  %v9992_v51 = vld [vmem:[#allocation4 + $0x694] sm:$0xf]  ;;  %v8286_v14 = vor.u32 %v9936_v46, %v8283_v47  ;;  %v7975_v22 = vld [vmem:[#allocation4 + $0x284] sm:$0xf0]  ;;  %v9915_v18 = vld [vmem:[#allocation4 + $0x42c] sm:$0xf] }
 0x366   :  { %v8510_v31 = vor.u32 %v9992_v51, %v8507_v52  ;;  %v8199_v26 = vld [vmem:[#allocation4 + $0x444] sm:$0xf0]  ;;  %v7978_v29 = vor.u32 %v9859_v21, %v7975_v22  ;;  %v9796_v24 = vld [vmem:[#allocation4 + $0x74] sm:$0xf]  ;;  %v7947_v34 = vld [vmem:[#allocation4 + $0x24c] sm:$0xf0] }
 0x367   :  { %5678 = vmatpush.bf16.msra.mxu1 %v9318_v54  ;;  %5640 = vmatpush.bf16.msrb.mxu2 %v8618_v58  ;;  %v8062_v54 = vor.u32 %v9880_v41, %v8059_v42  ;;  %v10735_v58 = vpack.c.bf16 %v10700_v15, %v10700_v15  ;;  %v9985_v15 = vld [vmem:[#allocation4 + $0x65c] sm:$0xf]  ;;  %v8423_v28 = vld [vmem:[#allocation4 + $0x604] sm:$0xf0]  ;;  %v9852_v33 = vld [vmem:[#allocation4 + $0x234] sm:$0xf] }
 0x368   :  { %5653 = vmatpush.bf16.msrb.mxu3 %v8842_v3  ;;  %v10739_v3 = vpack.c.bf16 %v10703_v2, %v10703_v2  ;;  %v8258_v2 = vor.u32 %v9929_v61, %v8255_v0  ;;  %v8171_v37 = vld [vmem:[#allocation4 + $0x40c] sm:$0xf0]  ;;  %v7950_v41 = vor.u32 %v9852_v33, %v7947_v34  ;;  %v9789_v42 = vld [vmem:[#allocation4 + $0x3c] sm:$0xf]  ;;  %v8367_v62 = vld [vmem:[#allocation4 + $0x594] sm:$0xf0] }
 0x369   :  { %5666 = vmatpush.bf16.msra.mxu0 %v9066_v4  ;;  %v7810_v4 = vor.u32 %v9817_v56, %v7807_v57  ;;  %v9845_v47 = vld [vmem:[#allocation4 + $0x1fc] sm:$0xf]  ;;  %v9782_v56 = vld [vmem:[#allocation4 + $0x4] sm:$0xf]  ;;  %v7891_v0 = vld [vmem:[#allocation4 + $0x1dc] sm:$0xf0] }
 0x36a   :  { %v9901_v52 = vld [vmem:[#allocation4 + $0x3bc] sm:$0xf]  ;;  %v9838_v61 = vld [vmem:[#allocation4 + $0x1c4] sm:$0xf]  ;;  %v8115_v9 = vld [vmem:[#allocation4 + $0x39c] sm:$0xf0] }
 0x36b   :  { %5679 = vmatpush.bf16.msra.mxu1 %v9290_v7  ;;  %5641 = vmatpush.bf16.msrb.mxu2 %v8590_v1  ;;  %v9810_v7 = vld [vmem:[#allocation4 + $0xe4] sm:$0xf]  ;;  %v8482_v1 = vor.u32 %v9985_v15, %v8479_v5  ;;  %v9957_v59 = vld [vmem:[#allocation4 + $0x57c] sm:$0xf]  ;;  %v8759_v5 = vld [vmem:[#allocation4 + $0x8a4] sm:$0xf0] }
 0x36c   :  { %5654 = vmatpush.bf16.msrb.mxu3 %v8814_v55  ;;  %v7782_v60 = vor.u32 %v9810_v7, %v7779_v8  ;;  %v9978_v55 = vld [vmem:[#allocation4 + $0x624] sm:$0xf]  ;;  %v8983_v7 = vld [vmem:[#allocation4 + $0xa64] sm:$0xf0]  ;;  %v8370_v8 = vor.u32 %v9957_v59, %v8367_v62  ;;  %v10167_v10 = vld [vmem:[#allocation4 + $0xc0c] sm:$0xf] }
 0x36d   :  { %5667 = vmatpush.bf16.msra.mxu0 %v9038_v20  ;;  %v7751_v20 = vld [vmem:[#allocation4 + $0xc4] sm:$0xf0]  ;;  %v9950_v12 = vld [vmem:[#allocation4 + $0x544] sm:$0xf]  ;;  %v10048_v21 = vld [vmem:[#allocation4 + $0x854] sm:$0xf] }
 0x36e   :  { %v7754_v23 = vor.u32 %v9803_v19, %v7751_v20  ;;  %v9207_v63 = vld [vmem:[#allocation4 + $0xc24] sm:$0xf0]  ;;  %v8731_v22 = vld [vmem:[#allocation4 + $0x86c] sm:$0xf0]  ;;  %v10041_v34 = vld [vmem:[#allocation4 + $0x81c] sm:$0xf] }
 0x36f   :  { %5680 = vmatpush.bf16.msra.mxu1 %v9262_v25  ;;  %5642 = vmatpush.bf16.msrb.mxu2 %v8562_v27  ;;  %v8454_v25 = vor.u32 %v9978_v55, %v8451_v16  ;;  %v9971_v27 = vld [vmem:[#allocation4 + $0x5ec] sm:$0xf]  ;;  %v7894_v55 = vor.u32 %v9838_v61, %v7891_v0  ;;  %v9431_v19 = vld [vmem:[#allocation4 + $0xde4] sm:$0xf0]  ;;  %v9123_v59 = vld [vmem:[#allocation4 + $0xb7c] sm:$0xf0] }
 0x370   :  { %5655 = vmatpush.bf16.msrb.mxu3 %v8786_v30  ;;  %v7723_v30 = vld [vmem:[#allocation4 + $0x8c] sm:$0xf0]  ;;  %v9347_v61 = vld [vmem:[#allocation4 + $0xd3c] sm:$0xf0]  ;;  %s10525_s5 = smov [#allocation17]   ;;  %s6332_s28 = sshll.u32 %s10872_s9, 4  ;;  %s6333_s28 = int_to_ptr.hbm [resolvable:$true] %s6332_s28 }
 0x371   :  { %5668 = vmatpush.bf16.msra.mxu0 %v9010_v36  ;;  %v9908_v36 = vld [vmem:[#allocation4 + $0x3f4] sm:$0xf]  ;;  %v7726_v38 = vor.u32 %v9796_v24, %v7723_v30  ;;  %v8734_v24 = vor.u32 %v10048_v21, %v8731_v22  ;;  %v9067_v21 = vld [vmem:[#allocation4 + $0xb0c] sm:$0xf0]  ;;  %s6330_s7 = sshll.u32 %s10525_s5, 4  ;;  %s6331_s7 = int_to_ptr.vmem [resolvable:$true] %s6330_s7 }
 0x372   :  { %5643 = vmatmul.bf16.vlgmr.msrb.gmra.mxu2 %v10727_v48  ;;  %v8174_v46 = vor.u32 %v9908_v36, %v8171_v37  ;;  %v10216_v30 = vld [vmem:[#allocation4 + $0xd94] sm:$0xf]  ;;  %v10097_v37 = vld [vmem:[#allocation4 + $0x9dc] sm:$0xf] }
 0x373   :  { %5687 = vmatpush.bf16.msra.mxu2 %v7866_v32  ;;  %5681 = vmatpush.bf16.msra.mxu1 %v9234_v40  ;;  %v8202_v32 = vor.u32 %v9915_v18, %v8199_v26  ;;  %v8395_v40 = vld [vmem:[#allocation4 + $0x5cc] sm:$0xf0]  ;;  %v10104_v26 = vld [vmem:[#allocation4 + $0xa14] sm:$0xf] }
 0x374   :  { %5700 = vmatpush.bf16.msra.mxu3 %v8090_v35  ;;  %5669 = vmatmul.bf16.vlgmr.msra.gmra.mxu0 %v10735_v58  ;;  %v8426_v35 = vor.u32 %v9971_v27, %v8423_v28  ;;  %v10160_v28 = vld [vmem:[#allocation4 + $0xbd4] sm:$0xf] }
 0x375   :  { %5713 = vmatpush.bf16.msrb.mxu0 %v8314_v39  ;;  %5656 = vmatmul.bf16.vlgmr.msrb.gmra.mxu3 %v10731_v53  ;;  %v9964_v39 = vld [vmem:[#allocation4 + $0x5b4] sm:$0xf] }
 0x376   :  { %5682 = vmatmul.bf16.vlgmr.msra.gmra.mxu1 %v10739_v3  ;;  %v8398_v51 = vor.u32 %v9964_v39, %v8395_v40  ;;  %v10153_v40 = vld [vmem:[#allocation4 + $0xb9c] sm:$0xf] }
 0x377   :  { %5726 = vmatpush.bf16.msrb.mxu1 %v8538_v43  ;;  %5688 = vmatpush.bf16.msra.mxu2 %v7838_v49  ;;  %v7695_v43 = vld [vmem:[#allocation4 + $0x54] sm:$0xf0] }
 0x378   :  { %5701 = vmatpush.bf16.msra.mxu3 %v8062_v54  ;;  %v7919_v49 = vld [vmem:[#allocation4 + $0x214] sm:$0xf0]  ;;  %v7698_v57 = vor.u32 %v9789_v42, %v7695_v43  ;;  %v10209_v43 = vld [vmem:[#allocation4 + $0xd5c] sm:$0xf] }
 0x379   :  { %5714 = vmatpush.bf16.msrb.mxu0 %v8286_v14  ;;  %v8143_v54 = vld [vmem:[#allocation4 + $0x3d4] sm:$0xf0]  ;;  %v7667_v14 = vld [vmem:[#allocation4 + $0x1c] sm:$0xf0] }
 0x37a   :  { %v8146_v15 = vor.u32 %v9901_v52, %v8143_v54  ;;  %v10090_v54 = vld [vmem:[#allocation4 + $0x9a4] sm:$0xf] }
 0x37b   :  { %5727 = vmatpush.bf16.msrb.mxu1 %v8510_v31  ;;  %5689 = vmatpush.bf16.msra.mxu2 %v7810_v4  ;;  %v7922_v31 = vor.u32 %v9845_v47, %v7919_v49  ;;  %v10055_v4 = vld [vmem:[#allocation4 + $0x88c] sm:$0xf]  ;;  %v10034_v49 = vld [vmem:[#allocation4 + $0x7e4] sm:$0xf] }
 0x37c   :  { %5702 = vmatpush.bf16.msra.mxu3 %v8034_v50  ;;  %v10111_v50 = vld [vmem:[#allocation4 + $0xa4c] sm:$0xf]  ;;  %v8762_v16 = vor.u32 %v10055_v4, %v8759_v5 }
 0x37d   :  { %5715 = vmatpush.bf16.msrb.mxu0 %v8258_v2  ;;  %v9894_v2 = vld [vmem:[#allocation4 + $0x384] sm:$0xf]  ;;  %v8986_v20 = vor.u32 %v10111_v50, %v8983_v7  ;;  %v10027_v4 = vld [vmem:[#allocation4 + $0x7ac] sm:$0xf]  ;;  %v8871_v7 = vld [vmem:[#allocation4 + $0x984] sm:$0xf0] }
 0x37e   :  { %v10083_v50 = vld [vmem:[#allocation4 + $0x96c] sm:$0xf] }
 0x37f   :  { %5728 = vmatpush.bf16.msrb.mxu1 %v8482_v1  ;;  %5690 = vmatpush.bf16.msra.mxu2 %v7782_v60  ;;  %v7670_v1 = vor.u32 %v9782_v56, %v7667_v14  ;;  %v8339_v60 = vld [vmem:[#allocation4 + $0x55c] sm:$0xf0]  ;;  %v10146_v14 = vld [vmem:[#allocation4 + $0xb64] sm:$0xf] }
 0x380   :  { %5703 = vmatpush.bf16.msra.mxu3 %v8006_v17  ;;  %v10223_v17 = vld [vmem:[#allocation4 + $0xdcc] sm:$0xf]  ;;  %v8342_v18 = vor.u32 %v9950_v12, %v8339_v60  ;;  %v8899_v56 = vld [vmem:[#allocation4 + $0x9bc] sm:$0xf0]  ;;  %v9126_v5 = vor.u32 %v10146_v14, %v9123_v59  ;;  %v8874_v12 = vor.u32 %v10083_v50, %v8871_v7  ;;  %v10020_v60 = vld [vmem:[#allocation4 + $0x774] sm:$0xf] }
 0x381   :  { %5716 = vmatpush.bf16.msrb.mxu0 %v8230_v45  ;;  %v8118_v45 = vor.u32 %v9894_v2, %v8115_v9  ;;  %v9434_v27 = vor.u32 %v10223_v17, %v9431_v19  ;;  %v8902_v0 = vor.u32 %v10090_v54, %v8899_v56  ;;  %v10139_v2 = vld [vmem:[#allocation4 + $0xb2c] sm:$0xf]  ;;  %v9095_v9 = vld [vmem:[#allocation4 + $0xb44] sm:$0xf0]  ;;  %v10076_v17 = vld [vmem:[#allocation4 + $0x934] sm:$0xf] }
 0x382   :  { %v8843_v19 = vld [vmem:[#allocation4 + $0x94c] sm:$0xf0]  ;;  %v9011_v54 = vld [vmem:[#allocation4 + $0xa9c] sm:$0xf0]  ;;  %v9947_v14 = vld [vmem:[#allocation4 + $0x528] sm:$0xf0] }
 0x383   :  { %5729 = vmatpush.bf16.msrb.mxu1 %v8454_v25  ;;  %5691 = vmatpush.bf16.msra.mxu2 %v7754_v23  ;;  %v9210_v25 = vor.u32 %v10167_v10, %v9207_v63  ;;  %v8955_v23 = vld [vmem:[#allocation4 + $0xa2c] sm:$0xf0]  ;;  %v9319_v63 = vld [vmem:[#allocation4 + $0xd04] sm:$0xf0]  ;;  %v10174_v59 = vld [vmem:[#allocation4 + $0xc44] sm:$0xf] }
 0x384   :  { %5704 = vmatpush.bf16.msra.mxu3 %v7978_v29  ;;  %v9179_v29 = vld [vmem:[#allocation4 + $0xbec] sm:$0xf0]  ;;  %v8958_v33 = vor.u32 %v10104_v26, %v8955_v23  ;;  %v8846_v26 = vor.u32 %v10076_v17, %v8843_v19  ;;  %v10013_v23 = vld [vmem:[#allocation4 + $0x73c] sm:$0xf]  ;;  %v7841_v50 = vld [vmem:[#allocation4 + $0x158] sm:$0xf] }
 0x385   :  { %5717 = vmatpush.bf16.msrb.mxu0 %v8202_v32  ;;  %v9403_v32 = vld [vmem:[#allocation4 + $0xdac] sm:$0xf0]  ;;  %v9182_v36 = vor.u32 %v10160_v28, %v9179_v29  ;;  %v10069_v29 = vld [vmem:[#allocation4 + $0x8fc] sm:$0xf]  ;;  %v9828_v7 = vld [vmem:[#allocation4 + $0x170] sm:$0xf0] }
 0x386   :  { %v9406_v39 = vor.u32 %v10216_v30, %v9403_v32  ;;  %v10125_v32 = vld [vmem:[#allocation4 + $0xabc] sm:$0xf]  ;;  %v8317_v56 = vld [vmem:[#allocation4 + $0x510] sm:$0xf]  ;;  %v7813_v19 = vld [vmem:[#allocation4 + $0x120] sm:$0xf] }
 0x387   :  { %5730 = vmatpush.bf16.msrb.mxu1 %v8426_v35  ;;  %5692 = vmatpush.bf16.msra.mxu2 %v7726_v38  ;;  %v8703_v35 = vld [vmem:[#allocation4 + $0x834] sm:$0xf0] }
 0x388   :  { %5705 = vmatpush.bf16.msra.mxu3 %v7950_v41  ;;  %v8927_v38 = vld [vmem:[#allocation4 + $0x9f4] sm:$0xf0]  ;;  %v8706_v42 = vor.u32 %v10041_v34, %v8703_v35  ;;  %v10006_v34 = vld [vmem:[#allocation4 + $0x704] sm:$0xf] }
 0x389   :  { %5718 = vmatpush.bf16.msrb.mxu0 %v8174_v46  ;;  %v9151_v41 = vld [vmem:[#allocation4 + $0xbb4] sm:$0xf0]  ;;  %v8930_v47 = vor.u32 %v10097_v37, %v8927_v38  ;;  %v10181_v37 = vld [vmem:[#allocation4 + $0xc7c] sm:$0xf] }
 0x38a   :  { %v9375_v46 = vld [vmem:[#allocation4 + $0xd74] sm:$0xf0]  ;;  %v9154_v52 = vor.u32 %v10153_v40, %v9151_v41  ;;  %v10062_v40 = vld [vmem:[#allocation4 + $0x8c4] sm:$0xf]  ;;  %v8787_v41 = vld [vmem:[#allocation4 + $0x8dc] sm:$0xf0] }
 0x38b   :  { %5731 = vmatpush.bf16.msrb.mxu1 %v8398_v51  ;;  %5693 = vmatpush.bf16.msra.mxu2 %v7698_v57  ;;  %v8675_v51 = vld [vmem:[#allocation4 + $0x7fc] sm:$0xf0]  ;;  %v9378_v57 = vor.u32 %v10209_v43, %v9375_v46  ;;  %v9263_v38 = vld [vmem:[#allocation4 + $0xc94] sm:$0xf0]  ;;  %v9835_v46 = vld [vmem:[#allocation4 + $0x1a8] sm:$0xf0] }
 0x38c   :  { %5706 = vmatpush.bf16.msra.mxu3 %v7922_v31  ;;  %v8678_v62 = vor.u32 %v10034_v49, %v8675_v51  ;;  %v10202_v31 = vld [vmem:[#allocation4 + $0xd24] sm:$0xf]  ;;  %v9891_v49 = vld [vmem:[#allocation4 + $0x368] sm:$0xf0]  ;;  %v9266_v51 = vor.u32 %v10181_v37, %v9263_v38 }
 0x38d   :  { %5719 = vmatpush.bf16.msrb.mxu0 %v8146_v15  ;;  %v8647_v15 = vld [vmem:[#allocation4 + $0x7c4] sm:$0xf0]  ;;  %v9926_v37 = vld [vmem:[#allocation4 + $0x480] sm:$0xf0] }
 0x38e   :  { %v8650_v10 = vor.u32 %v10027_v4, %v8647_v15  ;;  %v10003_v4 = vld [vmem:[#allocation4 + $0x6e8] sm:$0xf0] }
 0x38f   :  { %5732 = vmatpush.bf16.msrb.mxu1 %v8370_v8  ;;  %5694 = vmatpush.bf16.msra.mxu2 %v7670_v1  ;;  %v9350_v8 = vor.u32 %v10202_v31, %v9347_v61  ;;  %v10195_v1 = vld [vmem:[#allocation4 + $0xcec] sm:$0xf]  ;;  %v8790_v31 = vor.u32 %v10062_v40, %v8787_v41  ;;  %v9982_v40 = vld [vmem:[#allocation4 + $0x640] sm:$0xf0] }
 0x390   :  { %5707 = vmatpush.bf16.msra.mxu3 %v7894_v55  ;;  %v8619_v55 = vld [vmem:[#allocation4 + $0x78c] sm:$0xf0] }
 0x391   :  { %5720 = vmatpush.bf16.msrb.mxu0 %v8118_v45  ;;  %v10132_v45 = vld [vmem:[#allocation4 + $0xaf4] sm:$0xf]  ;;  %v8622_v22 = vor.u32 %v10020_v60, %v8619_v55  ;;  %v7842_v60 = vor.u32 %v9828_v7, %v7841_v50  ;;  %v8513_v55 = vld [vmem:[#allocation4 + $0x698] sm:$0xf] }
 0x392   :  { %5695 = vmatmul.bf16.vlgmr.msra.gmra.mxu2 %v10707_v6  ;;  %v9070_v28 = vor.u32 %v10132_v45, %v9067_v21  ;;  %v8037_v21 = vld [vmem:[#allocation4 + $0x2e0] sm:$0xf]  ;;  %v9912_v50 = vld [vmem:[#allocation4 + $0x410] sm:$0xf0] }
 0x393   :  { %5739 = vmatpush.bf16.msrb.mxu2 %v8762_v16  ;;  %5733 = vmatpush.bf16.msrb.mxu1 %v8342_v18  ;;  %v9098_v16 = vor.u32 %v10139_v2, %v9095_v9  ;;  %v9291_v18 = vld [vmem:[#allocation4 + $0xccc] sm:$0xf0]  ;;  %v8065_v9 = vld [vmem:[#allocation4 + $0x318] sm:$0xf] }
 0x394   :  { %5752 = vmatpush.bf16.msrb.mxu3 %v8986_v20  ;;  %5721 = vmatmul.bf16.vlgmr.msrb.gmra.mxu0 %v10715_v11  ;;  %v9322_v20 = vor.u32 %v10195_v1, %v9319_v63  ;;  %v8289_v63 = vld [vmem:[#allocation4 + $0x4d8] sm:$0xf] }
 0x395   :  { %5765 = vmatpush.bf16.msra.mxu0 %v9210_v25  ;;  %5708 = vmatmul.bf16.vlgmr.msra.gmra.mxu3 %v10711_v44  ;;  %v10188_v25 = vld [vmem:[#allocation4 + $0xcb4] sm:$0xf] }
 0x396   :  { %5734 = vmatmul.bf16.vlgmr.msrb.gmra.mxu1 %v10719_v13  ;;  %v9294_v30 = vor.u32 %v10188_v25, %v9291_v18  ;;  %v8261_v18 = vld [vmem:[#allocation4 + $0x4a0] sm:$0xf] }
 0x397   :  { %5778 = vmatpush.bf16.msra.mxu1 %v9434_v27  ;;  %5740 = vmatpush.bf16.msrb.mxu2 %v8734_v24  ;;  %v8591_v27 = vld [vmem:[#allocation4 + $0x754] sm:$0xf0] }
 0x398   :  { %5753 = vmatpush.bf16.msrb.mxu3 %v8958_v33  ;;  %v8815_v24 = vld [vmem:[#allocation4 + $0x914] sm:$0xf0]  ;;  %v8594_v35 = vor.u32 %v10013_v23, %v8591_v27  ;;  %v8485_v27 = vld [vmem:[#allocation4 + $0x660] sm:$0xf] }
 0x399   :  { %5766 = vmatpush.bf16.msra.mxu0 %v9182_v36  ;;  %v9039_v33 = vld [vmem:[#allocation4 + $0xad4] sm:$0xf0]  ;;  %v8563_v36 = vld [vmem:[#allocation4 + $0x71c] sm:$0xf0] }
 0x39a   :  { %v9042_v43 = vor.u32 %v10125_v32, %v9039_v33  ;;  %v8009_v33 = vld [vmem:[#allocation4 + $0x2a8] sm:$0xf] }
 0x39b   :  { %5779 = vmatpush.bf16.msra.mxu1 %v9406_v39  ;;  %5741 = vmatpush.bf16.msrb.mxu2 %v8706_v42  ;;  %v8818_v39 = vor.u32 %v10069_v29, %v8815_v24  ;;  %v7869_v42 = vld [vmem:[#allocation4 + $0x190] sm:$0xf]  ;;  %v7785_v24 = vld [vmem:[#allocation4 + $0xe8] sm:$0xf] }
 0x39c   :  { %5754 = vmatpush.bf16.msrb.mxu3 %v8930_v47  ;;  %v8093_v47 = vld [vmem:[#allocation4 + $0x350] sm:$0xf]  ;;  %v7870_v61 = vor.u32 %v9835_v46, %v7869_v42 }
 0x39d   :  { %5767 = vmatpush.bf16.msra.mxu0 %v9154_v52  ;;  %v10118_v52 = vld [vmem:[#allocation4 + $0xa84] sm:$0xf]  ;;  %v8094_v15 = vor.u32 %v9891_v49, %v8093_v47  ;;  %v7757_v42 = vld [vmem:[#allocation4 + $0xb0] sm:$0xf]  ;;  %v9863_v49 = vld [vmem:[#allocation4 + $0x288] sm:$0xf0] }
 0x39e   :  { %v7981_v47 = vld [vmem:[#allocation4 + $0x270] sm:$0xf] }
 0x39f   :  { %5780 = vmatpush.bf16.msra.mxu1 %v9378_v57  ;;  %5742 = vmatpush.bf16.msrb.mxu2 %v8678_v62  ;;  %v8566_v57 = vor.u32 %v10006_v34, %v8563_v36  ;;  %v9235_v62 = vld [vmem:[#allocation4 + $0xc5c] sm:$0xf0]  ;;  %v9870_v34 = vld [vmem:[#allocation4 + $0x2c0] sm:$0xf0]  ;;  %v8233_v36 = vld [vmem:[#allocation4 + $0x468] sm:$0xf] }
 0x3a0   :  { %5755 = vmatpush.bf16.msrb.mxu3 %v8902_v0  ;;  %v8541_v0 = vld [vmem:[#allocation4 + $0x6d0] sm:$0xf]  ;;  %v9238_v2 = vor.u32 %v10174_v59, %v9235_v62  ;;  %v8010_v41 = vor.u32 %v9870_v34, %v8009_v33  ;;  %v8234_v46 = vor.u32 %v9926_v37, %v8233_v36  ;;  %v7982_v59 = vor.u32 %v9863_v49, %v7981_v47  ;;  %v7729_v62 = vld [vmem:[#allocation4 + $0x78] sm:$0xf]  ;;  %v9898_v33 = vld [vmem:[#allocation4 + $0x3a0] sm:$0xf0] }
 0x3a1   :  { %5768 = vmatpush.bf16.msra.mxu0 %v9126_v5  ;;  %v9014_v5 = vor.u32 %v10118_v52, %v9011_v54  ;;  %v8542_v1 = vor.u32 %v10003_v4, %v8541_v0  ;;  %v8205_v52 = vld [vmem:[#allocation4 + $0x430] sm:$0xf]  ;;  %v9919_v54 = vld [vmem:[#allocation4 + $0x448] sm:$0xf0]  ;;  %v7953_v0 = vld [vmem:[#allocation4 + $0x238] sm:$0xf] }
 0x3a2   :  { %v9856_v4 = vld [vmem:[#allocation4 + $0x250] sm:$0xf0]  ;;  %v9213_v34 = vld [vmem:[#allocation4 + $0xc10] sm:$0xf]  ;;  %v10171_v36 = vld [vmem:[#allocation4 + $0xc28] sm:$0xf0] }
 0x3a3   :  { %5781 = vmatpush.bf16.msra.mxu1 %v9350_v8  ;;  %5743 = vmatpush.bf16.msrb.mxu2 %v8650_v10  ;;  %v8318_v8 = vor.u32 %v9947_v14, %v8317_v56  ;;  %v9884_v10 = vld [vmem:[#allocation4 + $0x330] sm:$0xf0]  ;;  %v9975_v14 = vld [vmem:[#allocation4 + $0x608] sm:$0xf0]  ;;  %v8345_v37 = vld [vmem:[#allocation4 + $0x548] sm:$0xf] }
 0x3a4   :  { %5756 = vmatpush.bf16.msrb.mxu3 %v8874_v12  ;;  %v9940_v12 = vld [vmem:[#allocation4 + $0x4f0] sm:$0xf0]  ;;  %v8066_v17 = vor.u32 %v9884_v10, %v8065_v9  ;;  %v7954_v9 = vor.u32 %v9856_v4, %v7953_v0  ;;  %v7701_v10 = vld [vmem:[#allocation4 + $0x40] sm:$0xf]  ;;  %v8737_v47 = vld [vmem:[#allocation4 + $0x858] sm:$0xf] }
 0x3a5   :  { %5769 = vmatpush.bf16.msra.mxu0 %v9098_v16  ;;  %v9996_v16 = vld [vmem:[#allocation4 + $0x6b0] sm:$0xf0]  ;;  %v8290_v45 = vor.u32 %v9940_v12, %v8289_v63  ;;  %v7925_v12 = vld [vmem:[#allocation4 + $0x200] sm:$0xf] }
 0x3a6   :  { %v8514_v25 = vor.u32 %v9996_v16, %v8513_v55  ;;  %v8149_v16 = vld [vmem:[#allocation4 + $0x3c0] sm:$0xf]  ;;  %v10052_v49 = vld [vmem:[#allocation4 + $0x870] sm:$0xf0] }
 0x3a7   :  { %5782 = vmatpush.bf16.msra.mxu1 %v9322_v20  ;;  %5744 = vmatpush.bf16.msrb.mxu2 %v8622_v22  ;;  %v9821_v20 = vld [vmem:[#allocation4 + $0x138] sm:$0xf0]  ;;  %v8709_v4 = vld [vmem:[#allocation4 + $0x820] sm:$0xf] }
 0x3a8   :  { %5757 = vmatpush.bf16.msrb.mxu3 %v8846_v26  ;;  %v9877_v22 = vld [vmem:[#allocation4 + $0x2f8] sm:$0xf0]  ;;  %v7814_v23 = vor.u32 %v9821_v20, %v7813_v19  ;;  %v7673_v19 = vld [vmem:[#allocation4 + $0x8] sm:$0xf] }
 0x3a9   :  { %5770 = vmatpush.bf16.msra.mxu0 %v9070_v28  ;;  %v9933_v26 = vld [vmem:[#allocation4 + $0x4b8] sm:$0xf0]  ;;  %v8038_v29 = vor.u32 %v9877_v22, %v8037_v21  ;;  %v8373_v21 = vld [vmem:[#allocation4 + $0x580] sm:$0xf] }
 0x3aa   :  { %v9989_v28 = vld [vmem:[#allocation4 + $0x678] sm:$0xf0]  ;;  %v8262_v32 = vor.u32 %v9933_v26, %v8261_v18  ;;  %v7897_v18 = vld [vmem:[#allocation4 + $0x1c8] sm:$0xf]  ;;  %v9842_v26 = vld [vmem:[#allocation4 + $0x1e0] sm:$0xf0] }
 0x3ab   :  { %5783 = vmatpush.bf16.msra.mxu1 %v9294_v30  ;;  %5745 = vmatpush.bf16.msrb.mxu2 %v8594_v35  ;;  %v9814_v30 = vld [vmem:[#allocation4 + $0x100] sm:$0xf0]  ;;  %v8486_v35 = vor.u32 %v9989_v28, %v8485_v27  ;;  %v9961_v22 = vld [vmem:[#allocation4 + $0x598] sm:$0xf0]  ;;  %v10059_v28 = vld [vmem:[#allocation4 + $0x8a8] sm:$0xf0] }
 0x3ac   :  { %5758 = vmatpush.bf16.msrb.mxu3 %v8818_v39  ;;  %v7786_v38 = vor.u32 %v9814_v30, %v7785_v24  ;;  %v8457_v39 = vld [vmem:[#allocation4 + $0x628] sm:$0xf]  ;;  %v10115_v24 = vld [vmem:[#allocation4 + $0xa68] sm:$0xf0]  ;;  %v8374_v30 = vor.u32 %v9961_v22, %v8373_v21  ;;  %v10150_v21 = vld [vmem:[#allocation4 + $0xb80] sm:$0xf0] }
 0x3ad   :  { %5771 = vmatpush.bf16.msra.mxu0 %v9042_v43  ;;  %v9807_v43 = vld [vmem:[#allocation4 + $0xc8] sm:$0xf0] }
 0x3ae   :  { %v7758_v56 = vor.u32 %v9807_v43, %v7757_v42  ;;  %v10227_v42 = vld [vmem:[#allocation4 + $0xde8] sm:$0xf0] }
 0x3af   :  { %5784 = vmatpush.bf16.msra.mxu1 %v9266_v51  ;;  %5746 = vmatpush.bf16.msrb.mxu2 %v8566_v57  ;;  %v8458_v51 = vor.u32 %v9982_v40, %v8457_v39  ;;  %v8429_v57 = vld [vmem:[#allocation4 + $0x5f0] sm:$0xf]  ;;  %v7898_v39 = vor.u32 %v9842_v26, %v7897_v18  ;;  %v10206_v18 = vld [vmem:[#allocation4 + $0xd40] sm:$0xf0] }
 0x3b0   :  { %5759 = vmatpush.bf16.msrb.mxu3 %v8790_v31  ;;  %v9800_v31 = vld [vmem:[#allocation4 + $0x90] sm:$0xf0] }
 0x3b1   :  { %5772 = vmatpush.bf16.msra.mxu0 %v9014_v5  ;;  %v8177_v5 = vld [vmem:[#allocation4 + $0x3f8] sm:$0xf]  ;;  %v7730_v7 = vor.u32 %v9800_v31, %v7729_v62  ;;  %v8738_v62 = vor.u32 %v10052_v49, %v8737_v47  ;;  %v10136_v49 = vld [vmem:[#allocation4 + $0xb10] sm:$0xf0] }
 0x3b2   :  { %5747 = vmatmul.bf16.vlgmr.msrb.gmra.mxu2 %v10727_v48  ;;  %v8178_v63 = vor.u32 %v9912_v50, %v8177_v5  ;;  %v9409_v31 = vld [vmem:[#allocation4 + $0xd98] sm:$0xf]  ;;  %v8933_v50 = vld [vmem:[#allocation4 + $0x9e0] sm:$0xf] }
 0x3b3   :  { %5791 = vmatpush.bf16.msra.mxu2 %v7870_v61  ;;  %5785 = vmatpush.bf16.msra.mxu1 %v9238_v2  ;;  %v8206_v61 = vor.u32 %v9919_v54, %v8205_v52  ;;  %v9968_v2 = vld [vmem:[#allocation4 + $0x5d0] sm:$0xf0]  ;;  %v8961_v54 = vld [vmem:[#allocation4 + $0xa18] sm:$0xf] }
 0x3b4   :  { %5804 = vmatpush.bf16.msra.mxu3 %v8094_v15  ;;  %5773 = vmatmul.bf16.vlgmr.msra.gmra.mxu0 %v10735_v58  ;;  %v8430_v15 = vor.u32 %v9975_v14, %v8429_v57  ;;  %v9185_v14 = vld [vmem:[#allocation4 + $0xbd8] sm:$0xf] }
 0x3b5   :  { %5817 = vmatpush.bf16.msrb.mxu0 %v8318_v8  ;;  %5760 = vmatmul.bf16.vlgmr.msrb.gmra.mxu3 %v10731_v53  ;;  %v8401_v8 = vld [vmem:[#allocation4 + $0x5b8] sm:$0xf] }
 0x3b6   :  { %5786 = vmatmul.bf16.vlgmr.msra.gmra.mxu1 %v10739_v3  ;;  %v8402_v55 = vor.u32 %v9968_v2, %v8401_v8  ;;  %v9157_v2 = vld [vmem:[#allocation4 + $0xba0] sm:$0xf]  ;;  %v9073_v47 = vld [vmem:[#allocation4 + $0xaf8] sm:$0xf] }
 0x3b7   :  { %5830 = vmatpush.bf16.msrb.mxu1 %v8542_v1  ;;  %5792 = vmatpush.bf16.msra.mxu2 %v7842_v60  ;;  %v9793_v1 = vld [vmem:[#allocation4 + $0x58] sm:$0xf0] }
 0x3b8   :  { %5805 = vmatpush.bf16.msra.mxu3 %v8066_v17  ;;  %v9849_v60 = vld [vmem:[#allocation4 + $0x218] sm:$0xf0]  ;;  %v7702_v20 = vor.u32 %v9793_v1, %v7701_v10  ;;  %v9381_v1 = vld [vmem:[#allocation4 + $0xd60] sm:$0xf] }
 0x3b9   :  { %5818 = vmatpush.bf16.msrb.mxu0 %v8290_v45  ;;  %v9905_v17 = vld [vmem:[#allocation4 + $0x3d8] sm:$0xf0]  ;;  %v9786_v45 = vld [vmem:[#allocation4 + $0x20] sm:$0xf0] }
 0x3ba   :  { %v8150_v27 = vor.u32 %v9905_v17, %v8149_v16  ;;  %v8905_v17 = vld [vmem:[#allocation4 + $0x9a8] sm:$0xf] }
 0x3bb   :  { %5831 = vmatpush.bf16.msrb.mxu1 %v8514_v25  ;;  %5793 = vmatpush.bf16.msra.mxu2 %v7814_v23  ;;  %v7926_v25 = vor.u32 %v9849_v60, %v7925_v12  ;;  %v8765_v23 = vld [vmem:[#allocation4 + $0x890] sm:$0xf]  ;;  %v8681_v60 = vld [vmem:[#allocation4 + $0x7e8] sm:$0xf] }
 0x3bc   :  { %5806 = vmatpush.bf16.msra.mxu3 %v8038_v29  ;;  %v8989_v29 = vld [vmem:[#allocation4 + $0xa50] sm:$0xf]  ;;  %v8766_v40 = vor.u32 %v10059_v28, %v8765_v23 }
 0x3bd   :  { %5819 = vmatpush.bf16.msrb.mxu0 %v8262_v32  ;;  %v8121_v32 = vld [vmem:[#allocation4 + $0x388] sm:$0xf]  ;;  %v8990_v43 = vor.u32 %v10115_v24, %v8989_v29  ;;  %v8653_v23 = vld [vmem:[#allocation4 + $0x7b0] sm:$0xf]  ;;  %v10087_v24 = vld [vmem:[#allocation4 + $0x988] sm:$0xf0] }
 0x3be   :  { %v8877_v29 = vld [vmem:[#allocation4 + $0x970] sm:$0xf] }
 0x3bf   :  { %5832 = vmatpush.bf16.msrb.mxu1 %v8486_v35  ;;  %5794 = vmatpush.bf16.msra.mxu2 %v7786_v38  ;;  %v7674_v35 = vor.u32 %v9786_v45, %v7673_v19  ;;  %v9954_v38 = vld [vmem:[#allocation4 + $0x560] sm:$0xf0]  ;;  %v9129_v45 = vld [vmem:[#allocation4 + $0xb68] sm:$0xf] }
 0x3c0   :  { %5807 = vmatpush.bf16.msra.mxu3 %v8010_v41  ;;  %v9437_v41 = vld [vmem:[#allocation4 + $0xdd0] sm:$0xf]  ;;  %v8346_v52 = vor.u32 %v9954_v38, %v8345_v37  ;;  %v10094_v19 = vld [vmem:[#allocation4 + $0x9c0] sm:$0xf0]  ;;  %v9130_v28 = vor.u32 %v10150_v21, %v9129_v45  ;;  %v8878_v37 = vor.u32 %v10087_v24, %v8877_v29  ;;  %v8625_v38 = vld [vmem:[#allocation4 + $0x778] sm:$0xf] }
 0x3c1   :  { %5820 = vmatpush.bf16.msrb.mxu0 %v8234_v46  ;;  %v8122_v46 = vor.u32 %v9898_v33, %v8121_v32  ;;  %v9438_v57 = vor.u32 %v10227_v42, %v9437_v41  ;;  %v8906_v26 = vor.u32 %v10094_v19, %v8905_v17  ;;  %v9101_v32 = vld [vmem:[#allocation4 + $0xb30] sm:$0xf]  ;;  %v10143_v33 = vld [vmem:[#allocation4 + $0xb48] sm:$0xf0]  ;;  %v8849_v41 = vld [vmem:[#allocation4 + $0x938] sm:$0xf] }
 0x3c2   :  { %v10080_v42 = vld [vmem:[#allocation4 + $0x950] sm:$0xf0]  ;;  %v8095_v19 = vld [vmem:[#allocation4 + $0x36c] sm:$0xf0]  ;;  %v9017_v21 = vld [vmem:[#allocation4 + $0xa88] sm:$0xf] }
 0x3c3   :  { %5833 = vmatpush.bf16.msrb.mxu1 %v8458_v51  ;;  %5795 = vmatpush.bf16.msra.mxu2 %v7758_v56  ;;  %v9214_v51 = vor.u32 %v10171_v36, %v9213_v34  ;;  %v10108_v56 = vld [vmem:[#allocation4 + $0xa30] sm:$0xf0]  ;;  %v10199_v36 = vld [vmem:[#allocation4 + $0xd08] sm:$0xf0] }
 0x3c4   :  { %5808 = vmatpush.bf16.msra.mxu3 %v7982_v59  ;;  %v10164_v59 = vld [vmem:[#allocation4 + $0xbf0] sm:$0xf0]  ;;  %v8962_v0 = vor.u32 %v10108_v56, %v8961_v54  ;;  %v9297_v54 = vld [vmem:[#allocation4 + $0xcb8] sm:$0xf] }
 0x3c5   :  { %5821 = vmatpush.bf16.msrb.mxu0 %v8206_v61  ;;  %v10220_v61 = vld [vmem:[#allocation4 + $0xdb0] sm:$0xf0]  ;;  %v9186_v5 = vor.u32 %v10164_v59, %v9185_v14  ;;  %v8597_v14 = vld [vmem:[#allocation4 + $0x740] sm:$0xf]  ;;  %v10017_v59 = vld [vmem:[#allocation4 + $0x758] sm:$0xf0] }
 0x3c6   :  { %v9410_v8 = vor.u32 %v10220_v61, %v9409_v31  ;;  %v10192_v56 = vld [vmem:[#allocation4 + $0xcd0] sm:$0xf0]  ;;  %v8821_v31 = vld [vmem:[#allocation4 + $0x900] sm:$0xf]  ;;  %v10073_v61 = vld [vmem:[#allocation4 + $0x918] sm:$0xf0] }
 0x3c7   :  { %5834 = vmatpush.bf16.msrb.mxu1 %v8430_v15  ;;  %5796 = vmatpush.bf16.msra.mxu2 %v7730_v7  ;;  %v10045_v15 = vld [vmem:[#allocation4 + $0x838] sm:$0xf0]  ;;  %v9888_v17 = vld [vmem:[#allocation4 + $0x354] sm:$0xf] }
 0x3c8   :  { %5809 = vmatpush.bf16.msra.mxu3 %v7954_v9  ;;  %v10101_v7 = vld [vmem:[#allocation4 + $0x9f8] sm:$0xf0]  ;;  %v8710_v10 = vor.u32 %v10045_v15, %v8709_v4  ;;  %v9298_v4 = vor.u32 %v10192_v56, %v9297_v54  ;;  %v9045_v15 = vld [vmem:[#allocation4 + $0xac0] sm:$0xf] }
 0x3c9   :  { %5822 = vmatpush.bf16.msrb.mxu0 %v8178_v63  ;;  %v10157_v9 = vld [vmem:[#allocation4 + $0xbb8] sm:$0xf0]  ;;  %v8934_v12 = vor.u32 %v10101_v7, %v8933_v50  ;;  %v8569_v50 = vld [vmem:[#allocation4 + $0x708] sm:$0xf] }
 0x3ca   :  { %v10213_v63 = vld [vmem:[#allocation4 + $0xd78] sm:$0xf0]  ;;  %v9158_v16 = vor.u32 %v10157_v9, %v9157_v2  ;;  %v10010_v2 = vld [vmem:[#allocation4 + $0x720] sm:$0xf0]  ;;  %v9269_v9 = vld [vmem:[#allocation4 + $0xc80] sm:$0xf] }
 0x3cb   :  { %5835 = vmatpush.bf16.msrb.mxu1 %v8402_v55  ;;  %5797 = vmatpush.bf16.msra.mxu2 %v7702_v20  ;;  %v10038_v55 = vld [vmem:[#allocation4 + $0x800] sm:$0xf0]  ;;  %v9382_v20 = vor.u32 %v10213_v63, %v9381_v1  ;;  %v8822_v1 = vor.u32 %v10073_v61, %v8821_v31  ;;  %v8793_v63 = vld [vmem:[#allocation4 + $0x8c8] sm:$0xf]  ;;  %v7815_v31 = vld [vmem:[#allocation4 + $0x13c] sm:$0xf0] }
 0x3cc   :  { %5810 = vmatpush.bf16.msra.mxu3 %v7926_v25  ;;  %v8682_v22 = vor.u32 %v10038_v55, %v8681_v60  ;;  %v9353_v25 = vld [vmem:[#allocation4 + $0xd28] sm:$0xf]  ;;  %v9832_v60 = vld [vmem:[#allocation4 + $0x194] sm:$0xf] }
 0x3cd   :  { %5823 = vmatpush.bf16.msrb.mxu0 %v8150_v27  ;;  %v10031_v27 = vld [vmem:[#allocation4 + $0x7c8] sm:$0xf0] }
 0x3ce   :  { %v8654_v34 = vor.u32 %v10031_v27, %v8653_v23  ;;  %v8319_v23 = vld [vmem:[#allocation4 + $0x52c] sm:$0xf0]  ;;  %v9241_v27 = vld [vmem:[#allocation4 + $0xc48] sm:$0xf] }
 0x3cf   :  { %5836 = vmatpush.bf16.msrb.mxu1 %v8374_v30  ;;  %5798 = vmatpush.bf16.msra.mxu2 %v7674_v35  ;;  %v9354_v30 = vor.u32 %v10206_v18, %v9353_v25  ;;  %v9325_v35 = vld [vmem:[#allocation4 + $0xcf0] sm:$0xf]  ;;  %v9944_v25 = vld [vmem:[#allocation4 + $0x514] sm:$0xf] }
 0x3d0   :  { %5811 = vmatpush.bf16.msra.mxu3 %v7898_v39  ;;  %v10024_v39 = vld [vmem:[#allocation4 + $0x790] sm:$0xf0] }
 0x3d1   :  { %5824 = vmatpush.bf16.msrb.mxu0 %v8122_v46  ;;  %v9326_v46 = vor.u32 %v10199_v36, %v9325_v35  ;;  %v9825_v36 = vld [vmem:[#allocation4 + $0x15c] sm:$0xf] }
 0x3d2   :  { %5799 = vmatmul.bf16.vlgmr.msra.gmra.mxu2 %v10707_v6 }
 0x3d3   :  { %5843 = vmatpush.bf16.msrb.mxu2 %v8766_v40  ;;  %5837 = vmatpush.bf16.msrb.mxu1 %v8346_v52  ;;  %v9102_v40 = vor.u32 %v10143_v33, %v9101_v32  ;;  %v8626_v52 = vor.u32 %v10024_v39, %v8625_v38  ;;  %v8543_v32 = vld [vmem:[#allocation4 + $0x6ec] sm:$0xf0]  ;;  %v10765_v33 = vld [vmem:[#allocation15] sm:$0xff]  ;;  %v8322_v39 = vor.u32 %v9944_v25, %v8319_v23  ;;  %v8459_v25 = vld [vmem:[#allocation4 + $0x644] sm:$0xf0] }
 0x3d4   :  { %5856 = vmatpush.bf16.msrb.mxu3 %v8990_v43  ;;  %5825 = vmatmul.bf16.vlgmr.msrb.gmra.mxu0 %v10715_v11  ;;  %v10757_v43 = vpop.f32.mrf.mxu0  ;;  %v3265_v54 = vperm.slane %v10765_v33, 0  ;;  %v7759_v23 = vld [vmem:[#allocation4 + $0xcc] sm:$0xf0] }
 0x3d5   :  { %5869 = vmatpush.bf16.msra.mxu0 %v9214_v51  ;;  %5812 = vmatmul.bf16.vlgmr.msra.gmra.mxu3 %v10711_v44  ;;  %v10759_v51 = vpop.f32.mrf.mxu1 }
 0x3d6   :  { %5838 = vmatmul.bf16.vlgmr.msrb.gmra.mxu1 %v10719_v13 }
 0x3d7   :  { %5882 = vmatpush.bf16.msra.mxu1 %v9438_v57  ;;  %5844 = vmatpush.bf16.msrb.mxu2 %v8738_v62  ;;  %v8850_v57 = vor.u32 %v10080_v42, %v8849_v41  ;;  %v9074_v62 = vor.u32 %v10136_v49, %v9073_v47  ;;  %v9881_v41 = vld [vmem:[#allocation4 + $0x31c] sm:$0xf]  ;;  %v8067_v42 = vld [vmem:[#allocation4 + $0x334] sm:$0xf0] }
 0x3d8   :  { %5857 = vmatpush.bf16.msrb.mxu3 %v8962_v0  ;;  %v10761_v0 = vpop.f32.mrf.mxu2  ;;  %v10763_v7 = vpop.f32.mrf.mxu3  ;;  %v9937_v49 = vld [vmem:[#allocation4 + $0x4dc] sm:$0xf] }
 0x3d9   :  { %5870 = vmatpush.bf16.msra.mxu0 %v9186_v5  ;;  %v10129_v5 = vld [vmem:[#allocation4 + $0xad8] sm:$0xf0] }
 0x3da   :  { %v9046_v55 = vor.u32 %v10129_v5, %v9045_v15  ;;  %v8039_v15 = vld [vmem:[#allocation4 + $0x2fc] sm:$0xf0]  ;;  %v5593_v5 = vadd.f32 %v10761_v0, %v3265_v54  ;;  %v9867_v0 = vld [vmem:[#allocation4 + $0x2ac] sm:$0xf] }
 0x3db   :  { %5883 = vmatpush.bf16.msra.mxu1 %v9410_v8  ;;  %5845 = vmatpush.bf16.msrb.mxu2 %v8710_v10  ;;  %v8598_v8 = vor.u32 %v10017_v59, %v8597_v14  ;;  %v10185_v10 = vld [vmem:[#allocation4 + $0xc98] sm:$0xf0]  ;;  %v8515_v14 = vld [vmem:[#allocation4 + $0x6b4] sm:$0xf0]  ;;  %v8070_v59 = vor.u32 %v9881_v41, %v8067_v42 }
 0x3dc   :  { %5858 = vmatpush.bf16.msrb.mxu3 %v8934_v12  ;;  %v10066_v12 = vld [vmem:[#allocation4 + $0x8e0] sm:$0xf0]  ;;  %v9270_v45 = vor.u32 %v10185_v10, %v9269_v9  ;;  %v9853_v41 = vld [vmem:[#allocation4 + $0x23c] sm:$0xf]  ;;  %v7955_v42 = vld [vmem:[#allocation4 + $0x254] sm:$0xf0] }
 0x3dd   :  { %5871 = vmatpush.bf16.msra.mxu0 %v9158_v16  ;;  %v7871_v16 = vld [vmem:[#allocation4 + $0x1ac] sm:$0xf0]  ;;  %v5633_v18 = vpop.f32.mrf.mxu1  ;;  %v8794_v29 = vor.u32 %v10066_v12, %v8793_v63  ;;  %v9986_v10 = vld [vmem:[#allocation4 + $0x664] sm:$0xf]  ;;  %v9811_v12 = vld [vmem:[#allocation4 + $0xec] sm:$0xf] }
 0x3de   :  { %v7874_v24 = vor.u32 %v9832_v60, %v7871_v16  ;;  %v7787_v60 = vld [vmem:[#allocation4 + $0x104] sm:$0xf0] }
 0x3df   :  { %5884 = vmatpush.bf16.msra.mxu1 %v9382_v20  ;;  %5846 = vmatpush.bf16.msrb.mxu2 %v8682_v22  ;;  %v5620_v20 = vpop.f32.mrf.mxu0  ;;  %v10122_v22 = vld [vmem:[#allocation4 + $0xaa0] sm:$0xf0]  ;;  %v8011_v16 = vld [vmem:[#allocation4 + $0x2c4] sm:$0xf0] }
 0x3e0   :  { %5859 = vmatpush.bf16.msrb.mxu3 %v8906_v26  ;;  %v8570_v26 = vor.u32 %v10010_v2, %v8569_v50  ;;  %v9018_v35 = vor.u32 %v10122_v22, %v9017_v21  ;;  %v5594_v38 = vpop.f32.mrf.mxu2  ;;  %v8263_v2 = vld [vmem:[#allocation4 + $0x4bc] sm:$0xf0]  ;;  %v9923_v20 = vld [vmem:[#allocation4 + $0x46c] sm:$0xf]  ;;  %v7790_v21 = vor.u32 %v9811_v12, %v7787_v60  ;;  %v8014_v18 = vor.u32 %v9867_v0, %v8011_v16  ;;  %v9958_v12 = vld [vmem:[#allocation4 + $0x584] sm:$0xf] }
 0x3e1   :  { %5872 = vmatpush.bf16.msra.mxu0 %v9130_v28  ;;  %v10178_v28 = vld [vmem:[#allocation4 + $0xc60] sm:$0xf0]  ;;  %v9979_v22 = vld [vmem:[#allocation4 + $0x62c] sm:$0xf]  ;;  %v9797_v38 = vld [vmem:[#allocation4 + $0x7c] sm:$0xf] }
 0x3e2   :  { %v8375_v60 = vld [vmem:[#allocation4 + $0x59c] sm:$0xf0]  ;;  %v9839_v16 = vld [vmem:[#allocation4 + $0x1cc] sm:$0xf] }
 0x3e3   :  { %5885 = vmatpush.bf16.msra.mxu1 %v9354_v30  ;;  %5847 = vmatpush.bf16.msrb.mxu2 %v8654_v34  ;;  %v10000_v30 = vld [vmem:[#allocation4 + $0x6d4] sm:$0xf]  ;;  %v8098_v34 = vor.u32 %v9888_v17, %v8095_v19  ;;  %v5606_v17 = vadd.f32 %v10763_v7, %v5593_v5  ;;  %v7927_v5 = vld [vmem:[#allocation4 + $0x21c] sm:$0xf0] }
 0x3e4   :  { %5860 = vmatpush.bf16.msrb.mxu3 %v8878_v37  ;;  %v7843_v37 = vld [vmem:[#allocation4 + $0x174] sm:$0xf0]  ;;  %v8546_v47 = vor.u32 %v10000_v30, %v8543_v32  ;;  %v8462_v30 = vor.u32 %v9979_v22, %v8459_v25  ;;  %v9916_v7 = vld [vmem:[#allocation4 + $0x434] sm:$0xf]  ;;  %v8207_v32 = vld [vmem:[#allocation4 + $0x44c] sm:$0xf0] }
 0x3e5   :  { %5873 = vmatpush.bf16.msra.mxu0 %v9102_v40  ;;  %v9242_v40 = vor.u32 %v10178_v28, %v9241_v27  ;;  %v7846_v56 = vor.u32 %v9825_v36, %v7843_v37  ;;  %v9860_v28 = vld [vmem:[#allocation4 + $0x274] sm:$0xf]  ;;  %v8431_v36 = vld [vmem:[#allocation4 + $0x60c] sm:$0xf0] }
 0x3e6   :  { %v8991_v22 = vld [vmem:[#allocation4 + $0xa6c] sm:$0xf0] }
 0x3e7   :  { %5886 = vmatpush.bf16.msra.mxu1 %v9326_v46  ;;  %5848 = vmatpush.bf16.msrb.mxu2 %v8626_v52  ;;  %v5607_v46 = vpop.f32.mrf.mxu3  ;;  %v8291_v52 = vld [vmem:[#allocation4 + $0x4f4] sm:$0xf0] }
 0x3e8   :  { %5861 = vmatpush.bf16.msrb.mxu3 %v8850_v57  ;;  %v9993_v57 = vld [vmem:[#allocation4 + $0x69c] sm:$0xf]  ;;  %v8294_v61 = vor.u32 %v9937_v49, %v8291_v52  ;;  %v8179_v52 = vld [vmem:[#allocation4 + $0x414] sm:$0xf0] }
 0x3e9   :  { %5874 = vmatpush.bf16.msra.mxu0 %v9074_v62  ;;  %v9818_v62 = vld [vmem:[#allocation4 + $0x124] sm:$0xf]  ;;  %v8518_v50 = vor.u32 %v9993_v57, %v8515_v14  ;;  %v9909_v49 = vld [vmem:[#allocation4 + $0x3fc] sm:$0xf]  ;;  %v8403_v14 = vld [vmem:[#allocation4 + $0x5d4] sm:$0xf0] }
 0x3ea   :  { %v7818_v9 = vor.u32 %v9818_v62, %v7815_v31  ;;  %v9965_v57 = vld [vmem:[#allocation4 + $0x5bc] sm:$0xf]  ;;  %v9790_v62 = vld [vmem:[#allocation4 + $0x44] sm:$0xf]  ;;  %v7703_v31 = vld [vmem:[#allocation4 + $0x5c] sm:$0xf0] }
 0x3eb   :  { %5887 = vmatpush.bf16.msra.mxu1 %v9298_v4  ;;  %5849 = vmatpush.bf16.msrb.mxu2 %v8598_v8  ;;  %v9874_v4 = vld [vmem:[#allocation4 + $0x2e4] sm:$0xf] }
 0x3ec   :  { %5862 = vmatpush.bf16.msrb.mxu3 %v8822_v1  ;;  %v9930_v8 = vld [vmem:[#allocation4 + $0x4a4] sm:$0xf]  ;;  %v8487_v1 = vld [vmem:[#allocation4 + $0x67c] sm:$0xf0]  ;;  %v8042_v63 = vor.u32 %v9874_v4, %v8039_v15 }
 0x3ed   :  { %5875 = vmatpush.bf16.msra.mxu0 %v9046_v55  ;;  %v8266_v55 = vor.u32 %v9930_v8, %v8263_v2  ;;  %v8490_v19 = vor.u32 %v9986_v10, %v8487_v1  ;;  %v9846_v15 = vld [vmem:[#allocation4 + $0x204] sm:$0xf]  ;;  %v9783_v10 = vld [vmem:[#allocation4 + $0xc] sm:$0xf]  ;;  %v7706_v1 = vor.u32 %v9790_v62, %v7703_v31  ;;  %v10217_v62 = vld [vmem:[#allocation4 + $0xd9c] sm:$0xf] }
 0x3ee   :  { %v9902_v2 = vld [vmem:[#allocation4 + $0x3c4] sm:$0xf]  ;;  %v9411_v31 = vld [vmem:[#allocation4 + $0xdb4] sm:$0xf0] }
 0x3ef   :  { %5888 = vmatpush.bf16.msra.mxu1 %v9270_v45  ;;  %5850 = vmatpush.bf16.msrb.mxu2 %v8570_v26  ;;  %v8235_v45 = vld [vmem:[#allocation4 + $0x484] sm:$0xf0]  ;;  %v9804_v26 = vld [vmem:[#allocation4 + $0xb4] sm:$0xf] }
 0x3f0   :  { %5863 = vmatpush.bf16.msrb.mxu3 %v8794_v29  ;;  %v8238_v27 = vor.u32 %v9923_v20, %v8235_v45  ;;  %v7983_v29 = vld [vmem:[#allocation4 + $0x28c] sm:$0xf0] }
 0x3f1   :  { %5876 = vmatpush.bf16.msra.mxu0 %v9018_v35  ;;  %v9972_v35 = vld [vmem:[#allocation4 + $0x5f4] sm:$0xf]  ;;  %v7986_v37 = vor.u32 %v9860_v28, %v7983_v29  ;;  %v5670_v46 = vpop.f32.mrf.mxu0  ;;  %v8767_v45 = vld [vmem:[#allocation4 + $0x8ac] sm:$0xf0] }
 0x3f2   :  { %5851 = vmatmul.bf16.vlgmr.msrb.gmra.mxu2 %v10727_v48  ;;  %v10168_v28 = vld [vmem:[#allocation4 + $0xc14] sm:$0xf] }
 0x3f3   :  { %5895 = vmatpush.bf16.msra.mxu2 %v7874_v24  ;;  %5889 = vmatpush.bf16.msra.mxu1 %v9242_v40  ;;  %v5619_v24 = vadd.f32 %v10757_v43, %v5606_v17  ;;  %v8210_v40 = vor.u32 %v9916_v7, %v8207_v32  ;;  %v8434_v43 = vor.u32 %v9972_v35, %v8431_v36  ;;  %v5683_v54 = vpop.f32.mrf.mxu1  ;;  %v7899_v17 = vld [vmem:[#allocation4 + $0x1e4] sm:$0xf0]  ;;  %v9951_v7 = vld [vmem:[#allocation4 + $0x54c] sm:$0xf] }
 0x3f4   :  { %5908 = vmatpush.bf16.msra.mxu3 %v8098_v34  ;;  %5877 = vmatmul.bf16.vlgmr.msra.gmra.mxu0 %v10735_v58  ;;  %v7762_v34 = vor.u32 %v9804_v26, %v7759_v23  ;;  %v8378_v26 = vor.u32 %v9958_v12, %v8375_v60  ;;  %v9895_v23 = vld [vmem:[#allocation4 + $0x38c] sm:$0xf]  ;;  %v8347_v32 = vld [vmem:[#allocation4 + $0x564] sm:$0xf0]  ;;  %v9383_v12 = vld [vmem:[#allocation4 + $0xd7c] sm:$0xf0] }
 0x3f5   :  { %5921 = vmatpush.bf16.msrb.mxu0 %v8322_v39  ;;  %5864 = vmatmul.bf16.vlgmr.msrb.gmra.mxu3 %v10731_v53  ;;  %v7731_v39 = vld [vmem:[#allocation4 + $0x94] sm:$0xf0]  ;;  %v5644_v4 = vpop.f32.mrf.mxu2 }
 0x3f6   :  { %5890 = vmatmul.bf16.vlgmr.msra.gmra.mxu1 %v10739_v3 }
 0x3f7   :  { %5934 = vmatpush.bf16.msrb.mxu1 %v8546_v47  ;;  %5896 = vmatpush.bf16.msra.mxu2 %v7846_v56  ;;  %v5632_v47 = vadd.f32 %v10759_v51, %v5619_v24  ;;  %v7734_v56 = vor.u32 %v9797_v38, %v7731_v39  ;;  %v9439_v38 = vld [vmem:[#allocation4 + $0xdec] sm:$0xf0] }
 0x3f8   :  { %5909 = vmatpush.bf16.msra.mxu3 %v8070_v59  ;;  %v7958_v59 = vor.u32 %v9853_v41, %v7955_v42  ;;  %v5657_v8 = vpop.f32.mrf.mxu3  ;;  %v10049_v41 = vld [vmem:[#allocation4 + $0x85c] sm:$0xf]  ;;  %v8739_v42 = vld [vmem:[#allocation4 + $0x874] sm:$0xf0] }
 0x3f9   :  { %5922 = vmatpush.bf16.msrb.mxu0 %v8294_v61  ;;  %v8182_v61 = vor.u32 %v9909_v49, %v8179_v52  ;;  %v5645_v51 = vadd.f32 %v5644_v4, %v5632_v47  ;;  %v5672_v25 = vpop.f32.mrf.mxu0  ;;  %v10105_v49 = vld [vmem:[#allocation4 + $0xa1c] sm:$0xf]  ;;  %v8963_v52 = vld [vmem:[#allocation4 + $0xa34] sm:$0xf0]  ;;  %v10042_v4 = vld [vmem:[#allocation4 + $0x824] sm:$0xf] }
 0x3fa   :  { %v10203_v25 = vld [vmem:[#allocation4 + $0xd2c] sm:$0xf] }
 0x3fb   :  { %5935 = vmatpush.bf16.msrb.mxu1 %v8518_v50  ;;  %5897 = vmatpush.bf16.msra.mxu2 %v7818_v9  ;;  %v8406_v50 = vor.u32 %v9965_v57, %v8403_v14  ;;  %v8151_v9 = vld [vmem:[#allocation4 + $0x3dc] sm:$0xf0]  ;;  %v5658_v0 = vadd.f32 %v5657_v8, %v5645_v51  ;;  %v5685_v29 = vpop.f32.mrf.mxu1  ;;  %v10161_v14 = vld [vmem:[#allocation4 + $0xbdc] sm:$0xf]  ;;  %v10098_v51 = vld [vmem:[#allocation4 + $0x9e4] sm:$0xf]  ;;  %v9414_v8 = vor.u32 %v10217_v62, %v9411_v31 }
 0x3fc   :  { %5910 = vmatpush.bf16.msra.mxu3 %v8042_v63  ;;  %v7675_v63 = vld [vmem:[#allocation4 + $0x24] sm:$0xf0]  ;;  %v8154_v20 = vor.u32 %v9902_v2, %v8151_v9  ;;  %v10154_v2 = vld [vmem:[#allocation4 + $0xba4] sm:$0xf]  ;;  %v9159_v9 = vld [vmem:[#allocation4 + $0xbbc] sm:$0xf0] }
 0x3fd   :  { %5923 = vmatpush.bf16.msrb.mxu0 %v8266_v55  ;;  %v7930_v55 = vor.u32 %v9846_v15, %v7927_v5  ;;  %v7678_v24 = vor.u32 %v9783_v10, %v7675_v63  ;;  %v8711_v15 = vld [vmem:[#allocation4 + $0x83c] sm:$0xf0]  ;;  %v10210_v63 = vld [vmem:[#allocation4 + $0xd64] sm:$0xf]  ;;  %v10084_v29 = vld [vmem:[#allocation4 + $0x974] sm:$0xf] }
 0x3fe   :  { %v8599_v62 = vld [vmem:[#allocation4 + $0x75c] sm:$0xf0] }
 0x3ff   :  { %5936 = vmatpush.bf16.msrb.mxu1 %v8490_v19  ;;  %5898 = vmatpush.bf16.msra.mxu2 %v7790_v21  ;;  %v10056_v19 = vld [vmem:[#allocation4 + $0x894] sm:$0xf] }
 0x400   :  { %5911 = vmatpush.bf16.msra.mxu3 %v8014_v18  ;;  %v10112_v21 = vld [vmem:[#allocation4 + $0xa54] sm:$0xf]  ;;  %v5671_v18 = vadd.f32 %v5670_v46, %v5658_v0  ;;  %v8770_v36 = vor.u32 %v10056_v19, %v8767_v45  ;;  %v5646_v46 = vpop.f32.mrf.mxu2  ;;  %v8683_v0 = vld [vmem:[#allocation4 + $0x804] sm:$0xf0]  ;;  %v10147_v45 = vld [vmem:[#allocation4 + $0xb6c] sm:$0xf] }
 0x401   :  { %5924 = vmatpush.bf16.msrb.mxu0 %v8238_v27  ;;  %v8123_v27 = vld [vmem:[#allocation4 + $0x3a4] sm:$0xf0]  ;;  %v8994_v39 = vor.u32 %v10112_v21, %v8991_v22 }
 0x402   :  { %v5684_v35 = vadd.f32 %v5683_v54, %v5671_v18  ;;  %v9187_v54 = vld [vmem:[#allocation4 + $0xbf4] sm:$0xf0]  ;;  %v8907_v19 = vld [vmem:[#allocation4 + $0x9c4] sm:$0xf0] }
 0x403   :  { %5937 = vmatpush.bf16.msrb.mxu1 %v8462_v30  ;;  %5899 = vmatpush.bf16.msra.mxu2 %v7762_v34  ;;  %v9215_v30 = vld [vmem:[#allocation4 + $0xc2c] sm:$0xf0]  ;;  %v7902_v34 = vor.u32 %v9839_v16, %v7899_v17  ;;  %v9190_v5 = vor.u32 %v10161_v14, %v9187_v54  ;;  %v9162_v16 = vor.u32 %v10154_v2, %v9159_v9  ;;  %v10091_v17 = vld [vmem:[#allocation4 + $0x9ac] sm:$0xf]  ;;  %v9131_v21 = vld [vmem:[#allocation4 + $0xb84] sm:$0xf0] }
 0x404   :  { %5912 = vmatpush.bf16.msra.mxu3 %v7986_v37  ;;  %v10224_v37 = vld [vmem:[#allocation4 + $0xdd4] sm:$0xf]  ;;  %10242 = vtanh.f32 %v5684_v35  ;;  %v9218_v47 = vor.u32 %v10168_v28, %v9215_v30  ;;  %v9355_v18 = vld [vmem:[#allocation4 + $0xd44] sm:$0xf0]  ;;  %v9134_v28 = vor.u32 %v10147_v45, %v9131_v21  ;;  %v9299_v14 = vld [vmem:[#allocation4 + $0xcd4] sm:$0xf0] }
 0x405   :  { %5925 = vmatpush.bf16.msrb.mxu0 %v8210_v40  ;;  %v8126_v40 = vor.u32 %v9895_v23, %v8123_v27  ;;  %v9442_v57 = vor.u32 %v10224_v37, %v9439_v38  ;;  %v10028_v23 = vld [vmem:[#allocation4 + $0x7b4] sm:$0xf]  ;;  %v8655_v27 = vld [vmem:[#allocation4 + $0x7cc] sm:$0xf0]  ;;  %v9358_v30 = vor.u32 %v10203_v25, %v9355_v18  ;;  %v10021_v38 = vld [vmem:[#allocation4 + $0x77c] sm:$0xf] }
 0x406   :  { %v10196_v35 = vld [vmem:[#allocation4 + $0xcf4] sm:$0xf]  ;;  %v9019_v25 = vld [vmem:[#allocation4 + $0xaa4] sm:$0xf0]  ;;  %v8325_v18 = vld [vmem:[#allocation4 + $0x518] sm:$0xf] }
 0x407   :  { %5938 = vmatpush.bf16.msrb.mxu1 %v8434_v43  ;;  %5900 = vmatpush.bf16.msra.mxu2 %v7734_v56  ;;  %v8350_v43 = vor.u32 %v9951_v7, %v8347_v32  ;;  %v5659_v56 = vpop.f32.mrf.mxu3  ;;  %v10140_v7 = vld [vmem:[#allocation4 + $0xb34] sm:$0xf]  ;;  %v9103_v32 = vld [vmem:[#allocation4 + $0xb4c] sm:$0xf0] }
 0x408   :  { %5913 = vmatpush.bf16.msra.mxu3 %v7958_v59  ;;  %v8742_v59 = vor.u32 %v10049_v41, %v8739_v42  ;;  %v10077_v41 = vld [vmem:[#allocation4 + $0x93c] sm:$0xf]  ;;  %v8851_v42 = vld [vmem:[#allocation4 + $0x954] sm:$0xf0] }
 0x409   :  { %5926 = vmatpush.bf16.msrb.mxu0 %v8182_v61  ;;  %v8966_v61 = vor.u32 %v10105_v49, %v8963_v52  ;;  %v9075_v49 = vld [vmem:[#allocation4 + $0xb14] sm:$0xf0]  ;;  %v8854_v54 = vor.u32 %v10077_v41, %v8851_v42  ;;  %v8073_v41 = vld [vmem:[#allocation4 + $0x320] sm:$0xf]  ;;  %v9885_v42 = vld [vmem:[#allocation4 + $0x338] sm:$0xf0] }
 0x40a   :  { %v10243_v10 = vpop.eup %10242 }
 0x40b   :  { %5939 = vmatpush.bf16.msrb.mxu1 %v8406_v50  ;;  %5901 = vmatpush.bf16.msra.mxu2 %v7706_v1  ;;  %v8935_v50 = vld [vmem:[#allocation4 + $0x9fc] sm:$0xf0]  ;;  %v8714_v1 = vor.u32 %v10042_v4, %v8711_v15  ;;  %6318 = vst [vmem:[#allocation17] sm:$0xff] %v10243_v10  ;;  %v8571_v10 = vld [vmem:[#allocation4 + $0x724] sm:$0xf0] }
 0x40c   :  { %5914 = vmatpush.bf16.msra.mxu3 %v7930_v55  ;;  %v8938_v60 = vor.u32 %v10098_v51, %v8935_v50  ;;  %v10035_v55 = vld [vmem:[#allocation4 + $0x7ec] sm:$0xf]  ;;  %v8823_v4 = vld [vmem:[#allocation4 + $0x91c] sm:$0xf0]  ;;  %v10126_v51 = vld [vmem:[#allocation4 + $0xac4] sm:$0xf] }
 0x40d   :  { %5927 = vmatpush.bf16.msrb.mxu0 %v8154_v20  ;;  %v9386_v20 = vor.u32 %v10210_v63, %v9383_v12  ;;  %v8686_v22 = vor.u32 %v10035_v55, %v8683_v0  ;;  %v9047_v50 = vld [vmem:[#allocation4 + $0xadc] sm:$0xf0]  ;;  %v8795_v55 = vld [vmem:[#allocation4 + $0x8e4] sm:$0xf0]  ;;  %v7877_v0 = vld [vmem:[#allocation4 + $0x198] sm:$0xf] }
 0x40e   :  { %v9271_v63 = vld [vmem:[#allocation4 + $0xc9c] sm:$0xf0] }
 0x40f   :  { %5940 = vmatpush.bf16.msrb.mxu1 %v8378_v26  ;;  %5902 = vmatpush.bf16.msra.mxu2 %v7678_v24  ;;  %v8910_v26 = vor.u32 %v10091_v17, %v8907_v19  ;;  %v8879_v24 = vld [vmem:[#allocation4 + $0x98c] sm:$0xf0]  ;;  %v9836_v17 = vld [vmem:[#allocation4 + $0x1b0] sm:$0xf0]  ;;  %v8101_v19 = vld [vmem:[#allocation4 + $0x358] sm:$0xf] }
 0x410   :  { %5915 = vmatpush.bf16.msra.mxu3 %v7902_v34  ;;  %v8658_v34 = vor.u32 %v10028_v23, %v8655_v27  ;;  %v8882_v37 = vor.u32 %v10084_v29, %v8879_v24  ;;  %v9948_v27 = vld [vmem:[#allocation4 + $0x530] sm:$0xf0]  ;;  %v9243_v29 = vld [vmem:[#allocation4 + $0xc64] sm:$0xf0] }
 0x411   :  { %5928 = vmatpush.bf16.msrb.mxu0 %v8126_v40  ;;  %v9106_v40 = vor.u32 %v10140_v7, %v9103_v32  ;;  %v10780_v46 = vpop.f32.mrf.mxu0  ;;  %v8549_v7 = vld [vmem:[#allocation4 + $0x6d8] sm:$0xf]  ;;  %v10004_v32 = vld [vmem:[#allocation4 + $0x6f0] sm:$0xf0] }
 0x412   :  { %5903 = vmatmul.bf16.vlgmr.msra.gmra.mxu2 %v10707_v6 }
 0x413   :  { %5947 = vmatpush.bf16.msrb.mxu2 %v8770_v36  ;;  %5941 = vmatpush.bf16.msrb.mxu1 %v8350_v43  ;;  %v9327_v36 = vld [vmem:[#allocation4 + $0xd0c] sm:$0xf0]  ;;  %v10133_v43 = vld [vmem:[#allocation4 + $0xafc] sm:$0xf]  ;;  %v10782_v52 = vpop.f32.mrf.mxu1 }
 0x414   :  { %5960 = vmatpush.bf16.msrb.mxu3 %v8994_v39  ;;  %5929 = vmatmul.bf16.vlgmr.msrb.gmra.mxu0 %v10715_v11  ;;  %v8627_v39 = vld [vmem:[#allocation4 + $0x794] sm:$0xf0]  ;;  %v9078_v31 = vor.u32 %v10133_v43, %v9075_v49  ;;  %v8550_v43 = vor.u32 %v10004_v32, %v8549_v7  ;;  %v8297_v49 = vld [vmem:[#allocation4 + $0x4e0] sm:$0xf]  ;;  %v9920_v7 = vld [vmem:[#allocation4 + $0x450] sm:$0xf0] }
 0x415   :  { %5973 = vmatpush.bf16.msra.mxu0 %v9218_v47  ;;  %5916 = vmatmul.bf16.vlgmr.msra.gmra.mxu3 %v10711_v44  ;;  %v9330_v47 = vor.u32 %v10196_v35, %v9327_v36  ;;  %v8630_v56 = vor.u32 %v10021_v38, %v8627_v39  ;;  %v10784_v15 = vpop.f32.mrf.mxu2  ;;  %v7849_v36 = vld [vmem:[#allocation4 + $0x160] sm:$0xf]  ;;  %v8326_v39 = vor.u32 %v9948_v27, %v8325_v18 }
 0x416   :  { %5942 = vmatmul.bf16.vlgmr.msrb.gmra.mxu1 %v10719_v13 }
 0x417   :  { %5986 = vmatpush.bf16.msra.mxu1 %v9442_v57  ;;  %5948 = vmatpush.bf16.msrb.mxu2 %v8742_v59  ;;  %v10189_v57 = vld [vmem:[#allocation4 + $0xcbc] sm:$0xf]  ;;  %v10014_v59 = vld [vmem:[#allocation4 + $0x744] sm:$0xf] }
 0x418   :  { %5961 = vmatpush.bf16.msrb.mxu3 %v8966_v61  ;;  %v10070_v61 = vld [vmem:[#allocation4 + $0x904] sm:$0xf]  ;;  %v10786_v2 = vpop.f32.mrf.mxu3  ;;  %v8602_v9 = vor.u32 %v10014_v59, %v8599_v62  ;;  %v9997_v59 = vld [vmem:[#allocation4 + $0x6b8] sm:$0xf0]  ;;  %v8074_v62 = vor.u32 %v9885_v42, %v8073_v41 }
 0x419   :  { %5974 = vmatpush.bf16.msra.mxu0 %v9190_v5  ;;  %v9302_v5 = vor.u32 %v10189_v57, %v9299_v14  ;;  %v8826_v12 = vor.u32 %v10070_v61, %v8823_v4  ;;  %v5724_v45 = vpop.f32.mrf.mxu0  ;;  %v3266_v57 = vperm.slane %v10765_v33, 1  ;;  %v9822_v61 = vld [vmem:[#allocation4 + $0x140] sm:$0xf0]  ;;  %v9857_v41 = vld [vmem:[#allocation4 + $0x258] sm:$0xf0] }
 0x41a   :  { %v9927_v45 = vld [vmem:[#allocation4 + $0x488] sm:$0xf0] }
 0x41b   :  { %5987 = vmatpush.bf16.msra.mxu1 %v9414_v8  ;;  %5949 = vmatpush.bf16.msrb.mxu2 %v8714_v1  ;;  %v10007_v8 = vld [vmem:[#allocation4 + $0x70c] sm:$0xf]  ;;  %v10182_v1 = vld [vmem:[#allocation4 + $0xc84] sm:$0xf] }
 0x41c   :  { %5962 = vmatpush.bf16.msrb.mxu3 %v8938_v60  ;;  %v10063_v60 = vld [vmem:[#allocation4 + $0x8cc] sm:$0xf]  ;;  %v9274_v21 = vor.u32 %v10182_v1, %v9271_v63  ;;  %v8574_v23 = vor.u32 %v10007_v8, %v8571_v10  ;;  %v8269_v8 = vld [vmem:[#allocation4 + $0x4a8] sm:$0xf]  ;;  %v9990_v63 = vld [vmem:[#allocation4 + $0x680] sm:$0xf0] }
 0x41d   :  { %5975 = vmatpush.bf16.msra.mxu0 %v9162_v16  ;;  %v9050_v16 = vor.u32 %v10126_v51, %v9047_v50  ;;  %v8798_v24 = vor.u32 %v10063_v60, %v8795_v55  ;;  %v5698_v38 = vpop.f32.mrf.mxu2  ;;  %v9878_v51 = vld [vmem:[#allocation4 + $0x300] sm:$0xf0]  ;;  %v5697_v50 = vadd.f32 %v10784_v15, %v3266_v57  ;;  %v8493_v1 = vld [vmem:[#allocation4 + $0x668] sm:$0xf]  ;;  %v7793_v60 = vld [vmem:[#allocation4 + $0xf0] sm:$0xf] }
 0x41e   :  { %v9815_v55 = vld [vmem:[#allocation4 + $0x108] sm:$0xf0]  ;;  %v8017_v15 = vld [vmem:[#allocation4 + $0x2b0] sm:$0xf]  ;;  %v9801_v38 = vld [vmem:[#allocation4 + $0x98] sm:$0xf0] }
 0x41f   :  { %5988 = vmatpush.bf16.msra.mxu1 %v9386_v20  ;;  %5950 = vmatpush.bf16.msrb.mxu2 %v8686_v22  ;;  %v9892_v20 = vld [vmem:[#allocation4 + $0x370] sm:$0xf0]  ;;  %v10119_v22 = vld [vmem:[#allocation4 + $0xa8c] sm:$0xf] }
 0x420   :  { %5963 = vmatpush.bf16.msrb.mxu3 %v8910_v26  ;;  %v5737_v26 = vpop.f32.mrf.mxu1  ;;  %v9022_v35 = vor.u32 %v10119_v22, %v9019_v25  ;;  %v8465_v22 = vld [vmem:[#allocation4 + $0x630] sm:$0xf]  ;;  %v9983_v25 = vld [vmem:[#allocation4 + $0x648] sm:$0xf0] }
 0x421   :  { %5976 = vmatpush.bf16.msra.mxu0 %v9134_v28  ;;  %v10175_v28 = vld [vmem:[#allocation4 + $0xc4c] sm:$0xf]  ;;  %v7765_v26 = vld [vmem:[#allocation4 + $0xb8] sm:$0xf] }
 0x423   :  { %5989 = vmatpush.bf16.msra.mxu1 %v9358_v30  ;;  %5951 = vmatpush.bf16.msrb.mxu2 %v8658_v34  ;;  %v7878_v30 = vor.u32 %v9836_v17, %v7877_v0  ;;  %v8102_v34 = vor.u32 %v9892_v20, %v8101_v19  ;;  %v5710_v17 = vadd.f32 %v10786_v2, %v5697_v50  ;;  %v8241_v20 = vld [vmem:[#allocation4 + $0x470] sm:$0xf]  ;;  %v8213_v2 = vld [vmem:[#allocation4 + $0x438] sm:$0xf] }
 0x424   :  { %5964 = vmatpush.bf16.msrb.mxu3 %v8882_v37  ;;  %v9829_v37 = vld [vmem:[#allocation4 + $0x178] sm:$0xf0]  ;;  %v8494_v19 = vor.u32 %v9990_v63, %v8493_v1  ;;  %v8242_v27 = vor.u32 %v9927_v45, %v8241_v20  ;;  %v9787_v63 = vld [vmem:[#allocation4 + $0x28] sm:$0xf0]  ;;  %v10060_v20 = vld [vmem:[#allocation4 + $0x8b0] sm:$0xf0] }
 0x425   :  { %5977 = vmatpush.bf16.msra.mxu0 %v9106_v40  ;;  %v9246_v40 = vor.u32 %v10175_v28, %v9243_v29  ;;  %v7850_v14 = vor.u32 %v9829_v37, %v7849_v36  ;;  %v7989_v28 = vld [vmem:[#allocation4 + $0x278] sm:$0xf]  ;;  %v9864_v29 = vld [vmem:[#allocation4 + $0x290] sm:$0xf0]  ;;  %v7737_v37 = vld [vmem:[#allocation4 + $0x80] sm:$0xf] }
 0x426   :  { %v7990_v36 = vor.u32 %v9864_v29, %v7989_v28  ;;  %v7738_v57 = vor.u32 %v9801_v38, %v7737_v37  ;;  %v8997_v45 = vld [vmem:[#allocation4 + $0xa58] sm:$0xf] }
 0x427   :  { %5990 = vmatpush.bf16.msra.mxu1 %v9330_v47  ;;  %5952 = vmatpush.bf16.msrb.mxu2 %v8630_v56  ;;  %v5711_v47 = vpop.f32.mrf.mxu3  ;;  %v9941_v56 = vld [vmem:[#allocation4 + $0x4f8] sm:$0xf0] }
 0x428   :  { %5965 = vmatpush.bf16.msrb.mxu3 %v8854_v54  ;;  %v8521_v54 = vld [vmem:[#allocation4 + $0x6a0] sm:$0xf]  ;;  %v8298_v4 = vor.u32 %v9941_v56, %v8297_v49  ;;  %v9913_v49 = vld [vmem:[#allocation4 + $0x418] sm:$0xf0] }
 0x429   :  { %5978 = vmatpush.bf16.msra.mxu0 %v9078_v31  ;;  %v7821_v31 = vld [vmem:[#allocation4 + $0x128] sm:$0xf]  ;;  %v8522_v33 = vor.u32 %v9997_v59, %v8521_v54  ;;  %v9969_v54 = vld [vmem:[#allocation4 + $0x5d8] sm:$0xf0] }
 0x42a   :  { %v7822_v10 = vor.u32 %v9822_v61, %v7821_v31  ;;  %v9794_v31 = vld [vmem:[#allocation4 + $0x60] sm:$0xf0] }
 0x42b   :  { %5991 = vmatpush.bf16.msra.mxu1 %v9302_v5  ;;  %5953 = vmatpush.bf16.msrb.mxu2 %v8602_v9  ;;  %v8045_v5 = vld [vmem:[#allocation4 + $0x2e8] sm:$0xf]  ;;  %v9934_v9 = vld [vmem:[#allocation4 + $0x4c0] sm:$0xf0] }
 0x42c   :  { %5966 = vmatpush.bf16.msrb.mxu3 %v8826_v12  ;;  %v8046_v12 = vor.u32 %v9878_v51, %v8045_v5  ;;  %v8270_v0 = vor.u32 %v9934_v9, %v8269_v8  ;;  %v7933_v5 = vld [vmem:[#allocation4 + $0x208] sm:$0xf]  ;;  %v9850_v51 = vld [vmem:[#allocation4 + $0x220] sm:$0xf0] }
 0x42d   :  { %5979 = vmatpush.bf16.msra.mxu0 %v9050_v16  ;;  %v9871_v16 = vld [vmem:[#allocation4 + $0x2c8] sm:$0xf0]  ;;  %v8157_v8 = vld [vmem:[#allocation4 + $0x3c8] sm:$0xf]  ;;  %v9906_v9 = vld [vmem:[#allocation4 + $0x3e0] sm:$0xf0] }
 0x42e   :  { %v8018_v18 = vor.u32 %v9871_v16, %v8017_v15  ;;  %v7905_v15 = vld [vmem:[#allocation4 + $0x1d0] sm:$0xf]  ;;  %v9843_v16 = vld [vmem:[#allocation4 + $0x1e8] sm:$0xf0] }
 0x42f   :  { %5992 = vmatpush.bf16.msra.mxu1 %v9274_v21  ;;  %5954 = vmatpush.bf16.msrb.mxu2 %v8574_v23  ;;  %v7794_v21 = vor.u32 %v9815_v55, %v7793_v60  ;;  %v9808_v23 = vld [vmem:[#allocation4 + $0xd0] sm:$0xf0]  ;;  %v9962_v60 = vld [vmem:[#allocation4 + $0x5a0] sm:$0xf0]  ;;  %v7934_v55 = vor.u32 %v9850_v51, %v7933_v5  ;;  %v8941_v51 = vld [vmem:[#allocation4 + $0x9e8] sm:$0xf] }
 0x430   :  { %5967 = vmatpush.bf16.msrb.mxu3 %v8798_v24  ;;  %v5723_v24 = vadd.f32 %v10780_v46, %v5710_v17  ;;  %v7766_v32 = vor.u32 %v9808_v23, %v7765_v26  ;;  %v8773_v17 = vld [vmem:[#allocation4 + $0x898] sm:$0xf]  ;;  %v8129_v26 = vld [vmem:[#allocation4 + $0x390] sm:$0xf]  ;;  %v9899_v23 = vld [vmem:[#allocation4 + $0x3a8] sm:$0xf0] }
 0x431   :  { %5980 = vmatpush.bf16.msra.mxu0 %v9022_v35  ;;  %v9976_v35 = vld [vmem:[#allocation4 + $0x610] sm:$0xf0]  ;;  %v5774_v42 = vpop.f32.mrf.mxu0  ;;  %v8130_v38 = vor.u32 %v9899_v23, %v8129_v26 }
 0x432   :  { %5955 = vmatmul.bf16.vlgmr.msrb.gmra.mxu2 %v10727_v48  ;;  %v5736_v47 = vadd.f32 %v10782_v52, %v5723_v24  ;;  %v10172_v24 = vld [vmem:[#allocation4 + $0xc30] sm:$0xf0] }
 0x433   :  { %5999 = vmatpush.bf16.msra.mxu2 %v7878_v30  ;;  %5993 = vmatpush.bf16.msra.mxu1 %v9246_v40  ;;  %v8466_v30 = vor.u32 %v9983_v25, %v8465_v22  ;;  %v7961_v40 = vld [vmem:[#allocation4 + $0x240] sm:$0xf]  ;;  %v5787_v56 = vpop.f32.mrf.mxu1  ;;  %v10032_v26 = vld [vmem:[#allocation4 + $0x7d0] sm:$0xf0] }
 0x434   :  { %6012 = vmatpush.bf16.msra.mxu3 %v8102_v34  ;;  %5981 = vmatmul.bf16.vlgmr.msra.gmra.mxu0 %v10735_v58  ;;  %v8437_v34 = vld [vmem:[#allocation4 + $0x5f8] sm:$0xf]  ;;  %v7962_v59 = vor.u32 %v9857_v41, %v7961_v40  ;;  %v10053_v40 = vld [vmem:[#allocation4 + $0x878] sm:$0xf0] }
 0x435   :  { %6025 = vmatpush.bf16.msrb.mxu0 %v8326_v39  ;;  %5968 = vmatmul.bf16.vlgmr.msrb.gmra.mxu3 %v10731_v53  ;;  %v8214_v39 = vor.u32 %v9920_v7, %v8213_v2  ;;  %v8438_v46 = vor.u32 %v9976_v35, %v8437_v34  ;;  %v9955_v2 = vld [vmem:[#allocation4 + $0x568] sm:$0xf0]  ;;  %v7906_v7 = vor.u32 %v9843_v16, %v7905_v15  ;;  %v9445_v35 = vld [vmem:[#allocation4 + $0xdd8] sm:$0xf]  ;;  %v8913_v15 = vld [vmem:[#allocation4 + $0x9b0] sm:$0xf] }
 0x436   :  { %5994 = vmatmul.bf16.vlgmr.msra.gmra.mxu1 %v10739_v3  ;;  %v8774_v34 = vor.u32 %v10060_v20, %v8773_v17  ;;  %v10095_v16 = vld [vmem:[#allocation4 + $0x9c8] sm:$0xf0] }
 0x437   :  { %6038 = vmatpush.bf16.msrb.mxu1 %v8550_v43  ;;  %6000 = vmatpush.bf16.msra.mxu2 %v7850_v14  ;;  %v8185_v43 = vld [vmem:[#allocation4 + $0x400] sm:$0xf]  ;;  %v10151_v20 = vld [vmem:[#allocation4 + $0xb88] sm:$0xf0] }
 0x438   :  { %6013 = vmatpush.bf16.msra.mxu3 %v8074_v62  ;;  %v8409_v14 = vld [vmem:[#allocation4 + $0x5c0] sm:$0xf]  ;;  %v7709_v62 = vld [vmem:[#allocation4 + $0x48] sm:$0xf]  ;;  %v8186_v61 = vor.u32 %v9913_v49, %v8185_v43  ;;  %v10109_v43 = vld [vmem:[#allocation4 + $0xa38] sm:$0xf0] }
 0x439   :  { %6026 = vmatpush.bf16.msrb.mxu0 %v8298_v4  ;;  %v5748_v4 = vpop.f32.mrf.mxu2  ;;  %v8410_v50 = vor.u32 %v9969_v54, %v8409_v14  ;;  %v7710_v1 = vor.u32 %v9794_v31, %v7709_v62  ;;  %v5776_v22 = vpop.f32.mrf.mxu0  ;;  %v9193_v14 = vld [vmem:[#allocation4 + $0xbe0] sm:$0xf]  ;;  %v10221_v62 = vld [vmem:[#allocation4 + $0xdb8] sm:$0xf0] }
 0x43a   :  { %v5749_v52 = vadd.f32 %v5748_v4, %v5736_v47  ;;  %v10046_v4 = vld [vmem:[#allocation4 + $0x840] sm:$0xf0]  ;;  %v10207_v22 = vld [vmem:[#allocation4 + $0xd48] sm:$0xf0] }
 0x43b   :  { %6039 = vmatpush.bf16.msrb.mxu1 %v8522_v33  ;;  %6001 = vmatpush.bf16.msra.mxu2 %v7822_v10  ;;  %v5761_v33 = vpop.f32.mrf.mxu3  ;;  %v7681_v10 = vld [vmem:[#allocation4 + $0x10] sm:$0xf]  ;;  %v5789_v28 = vpop.f32.mrf.mxu1 }
 0x43c   :  { %6014 = vmatpush.bf16.msra.mxu3 %v8046_v12  ;;  %v8381_v12 = vld [vmem:[#allocation4 + $0x588] sm:$0xf]  ;;  %v7682_v29 = vor.u32 %v9787_v63, %v7681_v10  ;;  %v10214_v63 = vld [vmem:[#allocation4 + $0xd80] sm:$0xf0]  ;;  %v10088_v28 = vld [vmem:[#allocation4 + $0x990] sm:$0xf0] }
 0x43d   :  { %6027 = vmatpush.bf16.msrb.mxu0 %v8270_v0  ;;  %v5762_v0 = vadd.f32 %v5761_v33, %v5749_v52  ;;  %v10102_v52 = vld [vmem:[#allocation4 + $0xa00] sm:$0xf0]  ;;  %v9165_v33 = vld [vmem:[#allocation4 + $0xba8] sm:$0xf] }
 0x43f   :  { %6040 = vmatpush.bf16.msrb.mxu1 %v8494_v19  ;;  %6002 = vmatpush.bf16.msra.mxu2 %v7794_v21  ;;  %v8158_v19 = vor.u32 %v9906_v9, %v8157_v8  ;;  %v10116_v21 = vld [vmem:[#allocation4 + $0xa70] sm:$0xf0]  ;;  %v5775_v25 = vadd.f32 %v5774_v42, %v5762_v0  ;;  %v10158_v8 = vld [vmem:[#allocation4 + $0xbc0] sm:$0xf0] }
 0x440   :  { %6015 = vmatpush.bf16.msra.mxu3 %v8018_v18  ;;  %v8382_v18 = vor.u32 %v9962_v60, %v8381_v12  ;;  %v8998_v37 = vor.u32 %v10116_v21, %v8997_v45  ;;  %v8942_v12 = vor.u32 %v10102_v52, %v8941_v51  ;;  %v8689_v60 = vld [vmem:[#allocation4 + $0x7f0] sm:$0xf]  ;;  %v9166_v0 = vor.u32 %v10158_v8, %v9165_v33  ;;  %v10130_v51 = vld [vmem:[#allocation4 + $0xae0] sm:$0xf0]  ;;  %v10011_v8 = vld [vmem:[#allocation4 + $0x728] sm:$0xf0] }
 0x441   :  { %6028 = vmatpush.bf16.msrb.mxu0 %v8242_v27  ;;  %v9221_v27 = vld [vmem:[#allocation4 + $0xc18] sm:$0xf]  ;;  %v5750_v41 = vpop.f32.mrf.mxu2  ;;  %v9361_v21 = vld [vmem:[#allocation4 + $0xd30] sm:$0xf] }
 0x442   :  { %v9222_v42 = vor.u32 %v10172_v24, %v9221_v27  ;;  %v8885_v27 = vld [vmem:[#allocation4 + $0x978] sm:$0xf]  ;;  %v8577_v52 = vld [vmem:[#allocation4 + $0x710] sm:$0xf] }
 0x443   :  { %6041 = vmatpush.bf16.msrb.mxu1 %v8466_v30  ;;  %6003 = vmatpush.bf16.msra.mxu2 %v7766_v32  ;;  %v8353_v30 = vld [vmem:[#allocation4 + $0x550] sm:$0xf]  ;;  %v5788_v32 = vadd.f32 %v5787_v56, %v5775_v25  ;;  %v5763_v49 = vpop.f32.mrf.mxu3  ;;  %v10165_v56 = vld [vmem:[#allocation4 + $0xbf8] sm:$0xf0]  ;;  %v8914_v25 = vor.u32 %v10095_v16, %v8913_v15  ;;  %v9109_v24 = vld [vmem:[#allocation4 + $0xb38] sm:$0xf] }
 0x444   :  { %6016 = vmatpush.bf16.msra.mxu3 %v7990_v36  ;;  %v10228_v36 = vld [vmem:[#allocation4 + $0xdf0] sm:$0xf0]  ;;  %v8354_v47 = vor.u32 %v9955_v2, %v8353_v30  ;;  %v9194_v5 = vor.u32 %v10165_v56, %v9193_v14  ;;  %v9305_v49 = vld [vmem:[#allocation4 + $0xcc0] sm:$0xf]  ;;  %v8605_v56 = vld [vmem:[#allocation4 + $0x748] sm:$0xf] }
 0x445   :  { %6029 = vmatpush.bf16.msrb.mxu0 %v8214_v39  ;;  %v8745_v39 = vld [vmem:[#allocation4 + $0x860] sm:$0xf]  ;;  %10244 = vtanh.f32 %v5788_v32  ;;  %v10144_v30 = vld [vmem:[#allocation4 + $0xb50] sm:$0xf0]  ;;  %v9889_v15 = vld [vmem:[#allocation4 + $0x35c] sm:$0xf] }
 0x446   :  { %v8746_v54 = vor.u32 %v10053_v40, %v8745_v39  ;;  %v10200_v32 = vld [vmem:[#allocation4 + $0xd10] sm:$0xf0]  ;;  %v10081_v39 = vld [vmem:[#allocation4 + $0x958] sm:$0xf0]  ;;  %v8103_v16 = vld [vmem:[#allocation4 + $0x374] sm:$0xf0] }
 0x447   :  { %6042 = vmatpush.bf16.msrb.mxu1 %v8438_v46  ;;  %6004 = vmatpush.bf16.msra.mxu2 %v7738_v57  ;;  %v8969_v46 = vld [vmem:[#allocation4 + $0xa20] sm:$0xf]  ;;  %v9446_v57 = vor.u32 %v10228_v36, %v9445_v35  ;;  %v10025_v36 = vld [vmem:[#allocation4 + $0x798] sm:$0xf0] }
 0x448   :  { %6017 = vmatpush.bf16.msra.mxu3 %v7962_v59  ;;  %v9417_v59 = vld [vmem:[#allocation4 + $0xda0] sm:$0xf]  ;;  %v8970_v31 = vor.u32 %v10109_v43, %v8969_v46 }
 0x449   :  { %6030 = vmatpush.bf16.msrb.mxu0 %v8186_v61  ;;  %v8717_v61 = vld [vmem:[#allocation4 + $0x828] sm:$0xf]  ;;  %v8633_v35 = vld [vmem:[#allocation4 + $0x780] sm:$0xf] }
 0x44a   :  { %v8718_v10 = vor.u32 %v10046_v4, %v8717_v61  ;;  %v8634_v43 = vor.u32 %v10025_v36, %v8633_v35 }
 0x44b   :  { %6043 = vmatpush.bf16.msrb.mxu1 %v8410_v50  ;;  %6005 = vmatpush.bf16.msra.mxu2 %v7710_v1  ;;  %v9418_v50 = vor.u32 %v10221_v62, %v9417_v59  ;;  %v10245_v9 = vpop.eup %10244  ;;  %v9389_v1 = vld [vmem:[#allocation4 + $0xd68] sm:$0xf] }
 0x44c   :  { %6018 = vmatpush.bf16.msra.mxu3 %v7934_v55  ;;  %6319 = vst [vmem:[#allocation17 + $0x8] sm:$0xff] %v10245_v9  ;;  %v10039_v55 = vld [vmem:[#allocation4 + $0x808] sm:$0xf0]  ;;  %v9390_v17 = vor.u32 %v10214_v63, %v9389_v1  ;;  %v8829_v62 = vld [vmem:[#allocation4 + $0x908] sm:$0xf] }
 0x44d   :  { %6031 = vmatpush.bf16.msrb.mxu0 %v8158_v19  ;;  %v9137_v19 = vld [vmem:[#allocation4 + $0xb70] sm:$0xf]  ;;  %v8690_v45 = vor.u32 %v10039_v55, %v8689_v60  ;;  %v9277_v9 = vld [vmem:[#allocation4 + $0xc88] sm:$0xf]  ;;  %v9833_v60 = vld [vmem:[#allocation4 + $0x19c] sm:$0xf] }
 0x44e   :  { %v9138_v23 = vor.u32 %v10151_v20, %v9137_v19  ;;  %v8801_v63 = vld [vmem:[#allocation4 + $0x8d0] sm:$0xf] }
 0x44f   :  { %6044 = vmatpush.bf16.msrb.mxu1 %v8382_v18  ;;  %6006 = vmatpush.bf16.msra.mxu2 %v7682_v29  ;;  %v8661_v18 = vld [vmem:[#allocation4 + $0x7b8] sm:$0xf]  ;;  %v9362_v29 = vor.u32 %v10207_v22, %v9361_v21  ;;  %v9025_v20 = vld [vmem:[#allocation4 + $0xa90] sm:$0xf]  ;;  %v9945_v21 = vld [vmem:[#allocation4 + $0x51c] sm:$0xf] }
 0x450   :  { %6019 = vmatpush.bf16.msra.mxu3 %v7906_v7  ;;  %v8662_v2 = vor.u32 %v10032_v26, %v8661_v18  ;;  %v9333_v7 = vld [vmem:[#allocation4 + $0xcf8] sm:$0xf]  ;;  %v9249_v26 = vld [vmem:[#allocation4 + $0xc50] sm:$0xf] }
 0x451   :  { %6032 = vmatpush.bf16.msrb.mxu0 %v8130_v38  ;;  %v8857_v38 = vld [vmem:[#allocation4 + $0x940] sm:$0xf]  ;;  %v10801_v40 = vpop.f32.mrf.mxu0  ;;  %v9334_v41 = vor.u32 %v10200_v32, %v9333_v7  ;;  %v8327_v18 = vld [vmem:[#allocation4 + $0x534] sm:$0xf0]  ;;  %v9826_v7 = vld [vmem:[#allocation4 + $0x164] sm:$0xf] }
 0x452   :  { %6007 = vmatmul.bf16.vlgmr.msra.gmra.mxu2 %v10707_v6  ;;  %v8858_v14 = vor.u32 %v10081_v39, %v8857_v38  ;;  %v7851_v32 = vld [vmem:[#allocation4 + $0x17c] sm:$0xf0]  ;;  %v8330_v35 = vor.u32 %v9945_v21, %v8327_v18  ;;  %v8467_v21 = vld [vmem:[#allocation4 + $0x64c] sm:$0xf0]  ;;  %v7767_v18 = vld [vmem:[#allocation4 + $0xd4] sm:$0xf0] }
 0x453   :  { %6051 = vmatpush.bf16.msrb.mxu2 %v8774_v34  ;;  %6045 = vmatpush.bf16.msrb.mxu1 %v8354_v47  ;;  %v8886_v34 = vor.u32 %v10088_v28, %v8885_v27  ;;  %v10137_v47 = vld [vmem:[#allocation4 + $0xb18] sm:$0xf0]  ;;  %v10803_v46 = vpop.f32.mrf.mxu1  ;;  %v8075_v38 = vld [vmem:[#allocation4 + $0x33c] sm:$0xf0] }
 0x454   :  { %6064 = vmatpush.bf16.msrb.mxu3 %v8998_v37  ;;  %6033 = vmatmul.bf16.vlgmr.msrb.gmra.mxu0 %v10715_v11  ;;  %v9110_v37 = vor.u32 %v10144_v30, %v9109_v24  ;;  %v8551_v24 = vld [vmem:[#allocation4 + $0x6f4] sm:$0xf0]  ;;  %v8106_v30 = vor.u32 %v9889_v15, %v8103_v16 }
 0x455   :  { %6077 = vmatpush.bf16.msra.mxu0 %v9222_v42  ;;  %6020 = vmatmul.bf16.vlgmr.msra.gmra.mxu3 %v10711_v44  ;;  %v9081_v42 = vld [vmem:[#allocation4 + $0xb00] sm:$0xf]  ;;  %v10805_v61 = vpop.f32.mrf.mxu2 }
 0x456   :  { %6046 = vmatmul.bf16.vlgmr.msrb.gmra.mxu1 %v10719_v13  ;;  %v9082_v59 = vor.u32 %v10137_v47, %v9081_v42  ;;  %v9938_v42 = vld [vmem:[#allocation4 + $0x4e4] sm:$0xf]  ;;  %v8299_v47 = vld [vmem:[#allocation4 + $0x4fc] sm:$0xf0] }
 0x457   :  { %6090 = vmatpush.bf16.msra.mxu1 %v9446_v57  ;;  %6052 = vmatpush.bf16.msrb.mxu2 %v8746_v54  ;;  %v10193_v57 = vld [vmem:[#allocation4 + $0xcd8] sm:$0xf0]  ;;  %v10018_v54 = vld [vmem:[#allocation4 + $0x760] sm:$0xf0] }
 0x458   :  { %6065 = vmatpush.bf16.msrb.mxu3 %v8970_v31  ;;  %v10074_v31 = vld [vmem:[#allocation4 + $0x920] sm:$0xf0]  ;;  %v9306_v4 = vor.u32 %v10193_v57, %v9305_v49  ;;  %v8606_v33 = vor.u32 %v10018_v54, %v8605_v56  ;;  %v7854_v57 = vor.u32 %v9826_v7, %v7851_v32  ;;  %v8523_v56 = vld [vmem:[#allocation4 + $0x6bc] sm:$0xf0]  ;;  %v8439_v7 = vld [vmem:[#allocation4 + $0x614] sm:$0xf0] }
 0x459   :  { %6078 = vmatpush.bf16.msra.mxu0 %v9194_v5  ;;  %v9053_v5 = vld [vmem:[#allocation4 + $0xac8] sm:$0xf]  ;;  %v8830_v1 = vor.u32 %v10074_v31, %v8829_v62  ;;  %v8302_v31 = vor.u32 %v9938_v42, %v8299_v47  ;;  %v9910_v42 = vld [vmem:[#allocation4 + $0x404] sm:$0xf]  ;;  %v8187_v47 = vld [vmem:[#allocation4 + $0x41c] sm:$0xf0] }
 0x45a   :  { %v9054_v55 = vor.u32 %v10130_v51, %v9053_v5  ;;  %v7823_v62 = vld [vmem:[#allocation4 + $0x144] sm:$0xf0] }
 0x45b   :  { %6091 = vmatpush.bf16.msra.mxu1 %v9418_v50  ;;  %6053 = vmatpush.bf16.msrb.mxu2 %v8718_v10  ;;  %v10807_v50 = vpop.f32.mrf.mxu3  ;;  %v10186_v10 = vld [vmem:[#allocation4 + $0xca0] sm:$0xf0]  ;;  %v5841_v22 = vpop.f32.mrf.mxu1  ;;  %v8047_v5 = vld [vmem:[#allocation4 + $0x304] sm:$0xf0] }
 0x45c   :  { %6066 = vmatpush.bf16.msrb.mxu3 %v8942_v12  ;;  %v10067_v12 = vld [vmem:[#allocation4 + $0x8e8] sm:$0xf0]  ;;  %v9278_v19 = vor.u32 %v10186_v10, %v9277_v9 }
 0x45d   :  { %6079 = vmatpush.bf16.msra.mxu0 %v9166_v0  ;;  %v7879_v0 = vld [vmem:[#allocation4 + $0x1b4] sm:$0xf0]  ;;  %v8802_v27 = vor.u32 %v10067_v12, %v8801_v63  ;;  %v9987_v10 = vld [vmem:[#allocation4 + $0x66c] sm:$0xf]  ;;  %v9812_v12 = vld [vmem:[#allocation4 + $0xf4] sm:$0xf] }
 0x45e   :  { %v7882_v28 = vor.u32 %v9833_v60, %v7879_v0  ;;  %v7795_v60 = vld [vmem:[#allocation4 + $0x10c] sm:$0xf0] }
 0x45f   :  { %6092 = vmatpush.bf16.msra.mxu1 %v9390_v17  ;;  %6054 = vmatpush.bf16.msrb.mxu2 %v8690_v45  ;;  %v5828_v17 = vpop.f32.mrf.mxu0  ;;  %v10123_v45 = vld [vmem:[#allocation4 + $0xaa8] sm:$0xf0]  ;;  %v8019_v0 = vld [vmem:[#allocation4 + $0x2cc] sm:$0xf0] }
 0x460   :  { %6067 = vmatpush.bf16.msrb.mxu3 %v8914_v25  ;;  %v8578_v25 = vor.u32 %v10011_v8, %v8577_v52  ;;  %v8271_v8 = vld [vmem:[#allocation4 + $0x4c4] sm:$0xf0]  ;;  %v9924_v17 = vld [vmem:[#allocation4 + $0x474] sm:$0xf] }
 0x461   :  { %6080 = vmatpush.bf16.msra.mxu0 %v9138_v23  ;;  %v10179_v23 = vld [vmem:[#allocation4 + $0xc68] sm:$0xf0] }
 0x462   :  { %v9250_v36 = vor.u32 %v10179_v23, %v9249_v26  ;;  %v9861_v23 = vld [vmem:[#allocation4 + $0x27c] sm:$0xf] }
 0x463   :  { %6093 = vmatpush.bf16.msra.mxu1 %v9362_v29  ;;  %6055 = vmatpush.bf16.msrb.mxu2 %v8662_v2  ;;  %v10001_v29 = vld [vmem:[#allocation4 + $0x6dc] sm:$0xf]  ;;  %v9026_v2 = vor.u32 %v10123_v45, %v9025_v20  ;;  %v5815_v39 = vpop.f32.mrf.mxu3  ;;  %v7798_v20 = vor.u32 %v9812_v12, %v7795_v60  ;;  %v9980_v45 = vld [vmem:[#allocation4 + $0x634] sm:$0xf]  ;;  %v9959_v12 = vld [vmem:[#allocation4 + $0x58c] sm:$0xf] }
 0x464   :  { %6068 = vmatpush.bf16.msrb.mxu3 %v8886_v34  ;;  %v5802_v34 = vpop.f32.mrf.mxu2  ;;  %v8383_v60 = vld [vmem:[#allocation4 + $0x5a4] sm:$0xf0] }
 0x465   :  { %6081 = vmatpush.bf16.msra.mxu0 %v9110_v37  ;;  %v9882_v37 = vld [vmem:[#allocation4 + $0x324] sm:$0xf] }
 0x466   :  { %v8078_v54 = vor.u32 %v9882_v37, %v8075_v38  ;;  %v9798_v34 = vld [vmem:[#allocation4 + $0x84] sm:$0xf]  ;;  %v7963_v38 = vld [vmem:[#allocation4 + $0x25c] sm:$0xf0] }
 0x467   :  { %6094 = vmatpush.bf16.msra.mxu1 %v9334_v41  ;;  %6056 = vmatpush.bf16.msrb.mxu2 %v8634_v43  ;;  %v8554_v41 = vor.u32 %v10001_v29, %v8551_v24  ;;  %v10809_v43 = vld [vmem:[#allocation15] sm:$0xff]  ;;  %v8470_v29 = vor.u32 %v9980_v45, %v8467_v21  ;;  %v9854_v37 = vld [vmem:[#allocation4 + $0x244] sm:$0xf] }
 0x468   :  { %6069 = vmatpush.bf16.msrb.mxu3 %v8858_v14  ;;  %v3267_v49 = vperm.slane %v10809_v43, 2  ;;  %v9994_v14 = vld [vmem:[#allocation4 + $0x6a4] sm:$0xf]  ;;  %v8215_v24 = vld [vmem:[#allocation4 + $0x454] sm:$0xf0] }
 0x469   :  { %6082 = vmatpush.bf16.msra.mxu0 %v9082_v59  ;;  %v9819_v59 = vld [vmem:[#allocation4 + $0x12c] sm:$0xf]  ;;  %v8526_v52 = vor.u32 %v9994_v14, %v8523_v56  ;;  %v9966_v14 = vld [vmem:[#allocation4 + $0x5c4] sm:$0xf]  ;;  %v8411_v56 = vld [vmem:[#allocation4 + $0x5dc] sm:$0xf0] }
 0x46a   :  { %v5801_v51 = vadd.f32 %v10805_v61, %v3267_v49  ;;  %v7826_v9 = vor.u32 %v9819_v59, %v7823_v62  ;;  %v9868_v61 = vld [vmem:[#allocation4 + $0x2b4] sm:$0xf]  ;;  %v9791_v59 = vld [vmem:[#allocation4 + $0x4c] sm:$0xf]  ;;  %v7711_v62 = vld [vmem:[#allocation4 + $0x64] sm:$0xf0] }
 0x46b   :  { %6095 = vmatpush.bf16.msra.mxu1 %v9306_v4  ;;  %6057 = vmatpush.bf16.msrb.mxu2 %v8606_v33  ;;  %v9875_v4 = vld [vmem:[#allocation4 + $0x2ec] sm:$0xf]  ;;  %v8022_v22 = vor.u32 %v9868_v61, %v8019_v0  ;;  %v9840_v0 = vld [vmem:[#allocation4 + $0x1d4] sm:$0xf]  ;;  %v8999_v45 = vld [vmem:[#allocation4 + $0xa74] sm:$0xf0] }
 0x46c   :  { %6070 = vmatpush.bf16.msrb.mxu3 %v8830_v1  ;;  %v9931_v33 = vld [vmem:[#allocation4 + $0x4ac] sm:$0xf]  ;;  %v8495_v1 = vld [vmem:[#allocation4 + $0x684] sm:$0xf0]  ;;  %v8050_v63 = vor.u32 %v9875_v4, %v8047_v5  ;;  %v5814_v15 = vadd.f32 %v10807_v50, %v5801_v51  ;;  %v9917_v50 = vld [vmem:[#allocation4 + $0x43c] sm:$0xf] }
 0x46d   :  { %6083 = vmatpush.bf16.msra.mxu0 %v9054_v55  ;;  %v8274_v55 = vor.u32 %v9931_v33, %v8271_v8  ;;  %v8498_v16 = vor.u32 %v9987_v10, %v8495_v1  ;;  %v9847_v5 = vld [vmem:[#allocation4 + $0x20c] sm:$0xf]  ;;  %v7935_v51 = vld [vmem:[#allocation4 + $0x224] sm:$0xf0]  ;;  %v9784_v10 = vld [vmem:[#allocation4 + $0x14] sm:$0xf]  ;;  %v7714_v1 = vor.u32 %v9791_v59, %v7711_v62 }
 0x46e   :  { %v9903_v8 = vld [vmem:[#allocation4 + $0x3cc] sm:$0xf]  ;;  %v10218_v59 = vld [vmem:[#allocation4 + $0xda4] sm:$0xf]  ;;  %v9419_v62 = vld [vmem:[#allocation4 + $0xdbc] sm:$0xf0] }
 0x46f   :  { %6096 = vmatpush.bf16.msra.mxu1 %v9278_v19  ;;  %6058 = vmatpush.bf16.msrb.mxu2 %v8578_v25  ;;  %v8243_v19 = vld [vmem:[#allocation4 + $0x48c] sm:$0xf0]  ;;  %v9805_v25 = vld [vmem:[#allocation4 + $0xbc] sm:$0xf] }
 0x470   :  { %6071 = vmatpush.bf16.msrb.mxu3 %v8802_v27  ;;  %v8246_v26 = vor.u32 %v9924_v17, %v8243_v19  ;;  %v7991_v27 = vld [vmem:[#allocation4 + $0x294] sm:$0xf0] }
 0x471   :  { %6084 = vmatpush.bf16.msra.mxu0 %v9026_v2  ;;  %v9973_v2 = vld [vmem:[#allocation4 + $0x5fc] sm:$0xf]  ;;  %v7994_v32 = vor.u32 %v9861_v23, %v7991_v27  ;;  %v5878_v39 = vpop.f32.mrf.mxu0  ;;  %v8775_v19 = vld [vmem:[#allocation4 + $0x8b4] sm:$0xf0] }
 0x472   :  { %6059 = vmatmul.bf16.vlgmr.msrb.gmra.mxu2 %v10727_v48  ;;  %v10169_v23 = vld [vmem:[#allocation4 + $0xc1c] sm:$0xf] }
 0x473   :  { %6103 = vmatpush.bf16.msra.mxu2 %v7882_v28  ;;  %6097 = vmatpush.bf16.msra.mxu1 %v9250_v36  ;;  %v5827_v28 = vadd.f32 %v10801_v40, %v5814_v15  ;;  %v8218_v36 = vor.u32 %v9917_v50, %v8215_v24  ;;  %v8442_v40 = vor.u32 %v9973_v2, %v8439_v7  ;;  %v5891_v49 = vpop.f32.mrf.mxu1  ;;  %v7907_v15 = vld [vmem:[#allocation4 + $0x1ec] sm:$0xf0]  ;;  %v9952_v50 = vld [vmem:[#allocation4 + $0x554] sm:$0xf] }
 0x474   :  { %6116 = vmatpush.bf16.msra.mxu3 %v8106_v30  ;;  %6085 = vmatmul.bf16.vlgmr.msra.gmra.mxu0 %v10735_v58  ;;  %v7770_v30 = vor.u32 %v9805_v25, %v7767_v18  ;;  %v8386_v25 = vor.u32 %v9959_v12, %v8383_v60  ;;  %v9896_v18 = vld [vmem:[#allocation4 + $0x394] sm:$0xf]  ;;  %v8355_v24 = vld [vmem:[#allocation4 + $0x56c] sm:$0xf0]  ;;  %v9391_v12 = vld [vmem:[#allocation4 + $0xd84] sm:$0xf0] }
 0x475   :  { %6129 = vmatpush.bf16.msrb.mxu0 %v8330_v35  ;;  %6072 = vmatmul.bf16.vlgmr.msrb.gmra.mxu3 %v10731_v53  ;;  %v7739_v35 = vld [vmem:[#allocation4 + $0x9c] sm:$0xf0]  ;;  %v5852_v4 = vpop.f32.mrf.mxu2 }
 0x476   :  { %6098 = vmatmul.bf16.vlgmr.msra.gmra.mxu1 %v10739_v3 }
 0x477   :  { %6142 = vmatpush.bf16.msrb.mxu1 %v8554_v41  ;;  %6104 = vmatpush.bf16.msra.mxu2 %v7854_v57  ;;  %v5840_v41 = vadd.f32 %v10803_v46, %v5827_v28  ;;  %v7742_v57 = vor.u32 %v9798_v34, %v7739_v35  ;;  %v9447_v34 = vld [vmem:[#allocation4 + $0xdf4] sm:$0xf0] }
 0x478   :  { %6117 = vmatpush.bf16.msra.mxu3 %v8078_v54  ;;  %v7966_v54 = vor.u32 %v9854_v37, %v7963_v38  ;;  %v5865_v33 = vpop.f32.mrf.mxu3  ;;  %v10050_v37 = vld [vmem:[#allocation4 + $0x864] sm:$0xf]  ;;  %v8747_v38 = vld [vmem:[#allocation4 + $0x87c] sm:$0xf0] }
 0x479   :  { %6130 = vmatpush.bf16.msrb.mxu0 %v8302_v31  ;;  %v8190_v31 = vor.u32 %v9910_v42, %v8187_v47  ;;  %v5853_v46 = vadd.f32 %v5852_v4, %v5840_v41  ;;  %v5880_v21 = vpop.f32.mrf.mxu0  ;;  %v10106_v42 = vld [vmem:[#allocation4 + $0xa24] sm:$0xf]  ;;  %v8971_v47 = vld [vmem:[#allocation4 + $0xa3c] sm:$0xf0]  ;;  %v10043_v4 = vld [vmem:[#allocation4 + $0x82c] sm:$0xf] }
 0x47a   :  { %v10204_v21 = vld [vmem:[#allocation4 + $0xd34] sm:$0xf] }
 0x47b   :  { %6143 = vmatpush.bf16.msrb.mxu1 %v8526_v52  ;;  %6105 = vmatpush.bf16.msra.mxu2 %v7826_v9  ;;  %v8414_v52 = vor.u32 %v9966_v14, %v8411_v56  ;;  %v8159_v9 = vld [vmem:[#allocation4 + $0x3e4] sm:$0xf0]  ;;  %v5866_v61 = vadd.f32 %v5865_v33, %v5853_v46  ;;  %v5893_v27 = vpop.f32.mrf.mxu1  ;;  %v10162_v56 = vld [vmem:[#allocation4 + $0xbe4] sm:$0xf]  ;;  %v10099_v46 = vld [vmem:[#allocation4 + $0x9ec] sm:$0xf]  ;;  %v9422_v33 = vor.u32 %v10218_v59, %v9419_v62 }
 0x47c   :  { %6118 = vmatpush.bf16.msra.mxu3 %v8050_v63  ;;  %v7683_v63 = vld [vmem:[#allocation4 + $0x2c] sm:$0xf0]  ;;  %v8162_v17 = vor.u32 %v9903_v8, %v8159_v9  ;;  %v10155_v8 = vld [vmem:[#allocation4 + $0xbac] sm:$0xf]  ;;  %v9167_v9 = vld [vmem:[#allocation4 + $0xbc4] sm:$0xf0] }
 0x47d   :  { %6131 = vmatpush.bf16.msrb.mxu0 %v8274_v55  ;;  %v7938_v55 = vor.u32 %v9847_v5, %v7935_v51  ;;  %v7686_v28 = vor.u32 %v9784_v10, %v7683_v63  ;;  %v8719_v5 = vld [vmem:[#allocation4 + $0x844] sm:$0xf0]  ;;  %v10211_v63 = vld [vmem:[#allocation4 + $0xd6c] sm:$0xf]  ;;  %v10085_v27 = vld [vmem:[#allocation4 + $0x97c] sm:$0xf] }
 0x47e   :  { %v8607_v59 = vld [vmem:[#allocation4 + $0x764] sm:$0xf0] }
 0x47f   :  { %6144 = vmatpush.bf16.msrb.mxu1 %v8498_v16  ;;  %6106 = vmatpush.bf16.msra.mxu2 %v7798_v20  ;;  %v10057_v16 = vld [vmem:[#allocation4 + $0x89c] sm:$0xf] }
 0x480   :  { %6119 = vmatpush.bf16.msra.mxu3 %v8022_v22  ;;  %v10113_v20 = vld [vmem:[#allocation4 + $0xa5c] sm:$0xf]  ;;  %v5879_v22 = vadd.f32 %v5878_v39, %v5866_v61  ;;  %v8778_v7 = vor.u32 %v10057_v16, %v8775_v19  ;;  %v5854_v39 = vpop.f32.mrf.mxu2  ;;  %v8691_v61 = vld [vmem:[#allocation4 + $0x80c] sm:$0xf0]  ;;  %v10148_v19 = vld [vmem:[#allocation4 + $0xb74] sm:$0xf] }
 0x481   :  { %6132 = vmatpush.bf16.msrb.mxu0 %v8246_v26  ;;  %v8131_v26 = vld [vmem:[#allocation4 + $0x3ac] sm:$0xf0]  ;;  %v9002_v35 = vor.u32 %v10113_v20, %v8999_v45 }
 0x482   :  { %v5892_v2 = vadd.f32 %v5891_v49, %v5879_v22  ;;  %v9195_v49 = vld [vmem:[#allocation4 + $0xbfc] sm:$0xf0]  ;;  %v8915_v16 = vld [vmem:[#allocation4 + $0x9cc] sm:$0xf0] }
 0x483   :  { %6145 = vmatpush.bf16.msrb.mxu1 %v8470_v29  ;;  %6107 = vmatpush.bf16.msra.mxu2 %v7770_v30  ;;  %v9223_v29 = vld [vmem:[#allocation4 + $0xc34] sm:$0xf0]  ;;  %v7910_v30 = vor.u32 %v9840_v0, %v7907_v15  ;;  %v9198_v51 = vor.u32 %v10162_v56, %v9195_v49  ;;  %v9170_v0 = vor.u32 %v10155_v8, %v9167_v9  ;;  %v10092_v15 = vld [vmem:[#allocation4 + $0x9b4] sm:$0xf]  ;;  %v9139_v20 = vld [vmem:[#allocation4 + $0xb8c] sm:$0xf0] }
 0x484   :  { %6120 = vmatpush.bf16.msra.mxu3 %v7994_v32  ;;  %v10225_v32 = vld [vmem:[#allocation4 + $0xddc] sm:$0xf]  ;;  %10246 = vtanh.f32 %v5892_v2  ;;  %v9226_v41 = vor.u32 %v10169_v23, %v9223_v29  ;;  %v9363_v22 = vld [vmem:[#allocation4 + $0xd4c] sm:$0xf0]  ;;  %v9142_v23 = vor.u32 %v10148_v19, %v9139_v20  ;;  %v9307_v56 = vld [vmem:[#allocation4 + $0xcdc] sm:$0xf0] }
 0x485   :  { %6133 = vmatpush.bf16.msrb.mxu0 %v8218_v36  ;;  %v8134_v36 = vor.u32 %v9896_v18, %v8131_v26  ;;  %v9450_v14 = vor.u32 %v10225_v32, %v9447_v34  ;;  %v10029_v18 = vld [vmem:[#allocation4 + $0x7bc] sm:$0xf]  ;;  %v8663_v26 = vld [vmem:[#allocation4 + $0x7d4] sm:$0xf0]  ;;  %v9366_v29 = vor.u32 %v10204_v21, %v9363_v22  ;;  %v10022_v34 = vld [vmem:[#allocation4 + $0x784] sm:$0xf] }
 0x486   :  { %v10197_v2 = vld [vmem:[#allocation4 + $0xcfc] sm:$0xf]  ;;  %v9027_v21 = vld [vmem:[#allocation4 + $0xaac] sm:$0xf0]  ;;  %v8333_v22 = vld [vmem:[#allocation4 + $0x520] sm:$0xf] }
 0x487   :  { %6146 = vmatpush.bf16.msrb.mxu1 %v8442_v40  ;;  %6108 = vmatpush.bf16.msra.mxu2 %v7742_v57  ;;  %v8358_v40 = vor.u32 %v9952_v50, %v8355_v24  ;;  %v5867_v57 = vpop.f32.mrf.mxu3  ;;  %v10141_v50 = vld [vmem:[#allocation4 + $0xb3c] sm:$0xf]  ;;  %v9111_v24 = vld [vmem:[#allocation4 + $0xb54] sm:$0xf0] }
 0x488   :  { %6121 = vmatpush.bf16.msra.mxu3 %v7966_v54  ;;  %v8750_v54 = vor.u32 %v10050_v37, %v8747_v38  ;;  %v10078_v37 = vld [vmem:[#allocation4 + $0x944] sm:$0xf]  ;;  %v8859_v38 = vld [vmem:[#allocation4 + $0x95c] sm:$0xf0] }
 0x489   :  { %6134 = vmatpush.bf16.msrb.mxu0 %v8190_v31  ;;  %v8974_v31 = vor.u32 %v10106_v42, %v8971_v47  ;;  %v9083_v42 = vld [vmem:[#allocation4 + $0xb1c] sm:$0xf0]  ;;  %v8862_v49 = vor.u32 %v10078_v37, %v8859_v38  ;;  %v8081_v37 = vld [vmem:[#allocation4 + $0x328] sm:$0xf]  ;;  %v9886_v38 = vld [vmem:[#allocation4 + $0x340] sm:$0xf0] }
 0x48a   :  { %v10247_v10 = vpop.eup %10246 }
 0x48b   :  { %6147 = vmatpush.bf16.msrb.mxu1 %v8414_v52  ;;  %6109 = vmatpush.bf16.msra.mxu2 %v7714_v1  ;;  %v8943_v52 = vld [vmem:[#allocation4 + $0xa04] sm:$0xf0]  ;;  %v8722_v1 = vor.u32 %v10043_v4, %v8719_v5  ;;  %6320 = vst [vmem:[#allocation17 + $0x10] sm:$0xff] %v10247_v10  ;;  %v8579_v10 = vld [vmem:[#allocation4 + $0x72c] sm:$0xf0] }
 0x48c   :  { %6122 = vmatpush.bf16.msra.mxu3 %v7938_v55  ;;  %v8946_v60 = vor.u32 %v10099_v46, %v8943_v52  ;;  %v10036_v55 = vld [vmem:[#allocation4 + $0x7f4] sm:$0xf]  ;;  %v8831_v4 = vld [vmem:[#allocation4 + $0x924] sm:$0xf0]  ;;  %v10127_v46 = vld [vmem:[#allocation4 + $0xacc] sm:$0xf] }
 0x48d   :  { %6135 = vmatpush.bf16.msrb.mxu0 %v8162_v17  ;;  %v9394_v17 = vor.u32 %v10211_v63, %v9391_v12  ;;  %v8694_v45 = vor.u32 %v10036_v55, %v8691_v61  ;;  %v9055_v52 = vld [vmem:[#allocation4 + $0xae4] sm:$0xf0]  ;;  %v8803_v55 = vld [vmem:[#allocation4 + $0x8ec] sm:$0xf0]  ;;  %v7885_v61 = vld [vmem:[#allocation4 + $0x1a0] sm:$0xf] }
 0x48e   :  { %v9279_v63 = vld [vmem:[#allocation4 + $0xca4] sm:$0xf0] }
 0x48f   :  { %6148 = vmatpush.bf16.msrb.mxu1 %v8386_v25  ;;  %6110 = vmatpush.bf16.msra.mxu2 %v7686_v28  ;;  %v8918_v25 = vor.u32 %v10092_v15, %v8915_v16  ;;  %v8887_v28 = vld [vmem:[#allocation4 + $0x994] sm:$0xf0]  ;;  %v9837_v15 = vld [vmem:[#allocation4 + $0x1b8] sm:$0xf0]  ;;  %v8109_v16 = vld [vmem:[#allocation4 + $0x360] sm:$0xf] }
 0x490   :  { %6123 = vmatpush.bf16.msra.mxu3 %v7910_v30  ;;  %v8666_v30 = vor.u32 %v10029_v18, %v8663_v26  ;;  %v8890_v32 = vor.u32 %v10085_v27, %v8887_v28  ;;  %v9949_v26 = vld [vmem:[#allocation4 + $0x538] sm:$0xf0]  ;;  %v9251_v27 = vld [vmem:[#allocation4 + $0xc6c] sm:$0xf0] }
 0x491   :  { %6136 = vmatpush.bf16.msrb.mxu0 %v8134_v36  ;;  %v9114_v36 = vor.u32 %v10141_v50, %v9111_v24  ;;  %v10824_v39 = vpop.f32.mrf.mxu0  ;;  %v8557_v50 = vld [vmem:[#allocation4 + $0x6e0] sm:$0xf]  ;;  %v10005_v24 = vld [vmem:[#allocation4 + $0x6f8] sm:$0xf0] }
 0x492   :  { %6111 = vmatmul.bf16.vlgmr.msra.gmra.mxu2 %v10707_v6 }
 0x493   :  { %6155 = vmatpush.bf16.msrb.mxu2 %v8778_v7  ;;  %6149 = vmatpush.bf16.msrb.mxu1 %v8358_v40  ;;  %v9335_v7 = vld [vmem:[#allocation4 + $0xd14] sm:$0xf0]  ;;  %v10134_v40 = vld [vmem:[#allocation4 + $0xb04] sm:$0xf]  ;;  %v10826_v47 = vpop.f32.mrf.mxu1 }
 0x494   :  { %6168 = vmatpush.bf16.msrb.mxu3 %v9002_v35  ;;  %6137 = vmatmul.bf16.vlgmr.msrb.gmra.mxu0 %v10715_v11  ;;  %v8635_v35 = vld [vmem:[#allocation4 + $0x79c] sm:$0xf0]  ;;  %v9086_v62 = vor.u32 %v10134_v40, %v9083_v42  ;;  %v8558_v40 = vor.u32 %v10005_v24, %v8557_v50  ;;  %v8305_v42 = vld [vmem:[#allocation4 + $0x4e8] sm:$0xf]  ;;  %v9921_v50 = vld [vmem:[#allocation4 + $0x458] sm:$0xf0] }
 0x495   :  { %6181 = vmatpush.bf16.msra.mxu0 %v9226_v41  ;;  %6124 = vmatmul.bf16.vlgmr.msra.gmra.mxu3 %v10711_v44  ;;  %v9338_v41 = vor.u32 %v10197_v2, %v9335_v7  ;;  %v8638_v57 = vor.u32 %v10022_v34, %v8635_v35  ;;  %v10828_v5 = vpop.f32.mrf.mxu2  ;;  %v7857_v7 = vld [vmem:[#allocation4 + $0x168] sm:$0xf]  ;;  %v8334_v35 = vor.u32 %v9949_v26, %v8333_v22 }
 0x496   :  { %6150 = vmatmul.bf16.vlgmr.msrb.gmra.mxu1 %v10719_v13 }
 0x497   :  { %6194 = vmatpush.bf16.msra.mxu1 %v9450_v14  ;;  %6156 = vmatpush.bf16.msrb.mxu2 %v8750_v54  ;;  %v10190_v14 = vld [vmem:[#allocation4 + $0xcc4] sm:$0xf]  ;;  %v10015_v54 = vld [vmem:[#allocation4 + $0x74c] sm:$0xf] }
 0x498   :  { %6169 = vmatpush.bf16.msrb.mxu3 %v8974_v31  ;;  %v10071_v31 = vld [vmem:[#allocation4 + $0x90c] sm:$0xf]  ;;  %v10830_v8 = vpop.f32.mrf.mxu3  ;;  %v8610_v9 = vor.u32 %v10015_v54, %v8607_v59  ;;  %v9998_v54 = vld [vmem:[#allocation4 + $0x6c0] sm:$0xf0]  ;;  %v8082_v59 = vor.u32 %v9886_v38, %v8081_v37 }
 0x499   :  { %6182 = vmatpush.bf16.msra.mxu0 %v9198_v51  ;;  %v9310_v51 = vor.u32 %v10190_v14, %v9307_v56  ;;  %v8834_v12 = vor.u32 %v10071_v31, %v8831_v4  ;;  %v5932_v19 = vpop.f32.mrf.mxu0  ;;  %v3268_v14 = vperm.slane %v10809_v43, 3  ;;  %v9823_v31 = vld [vmem:[#allocation4 + $0x148] sm:$0xf0]  ;;  %v9858_v37 = vld [vmem:[#allocation4 + $0x260] sm:$0xf0] }
 0x49a   :  { %v9928_v19 = vld [vmem:[#allocation4 + $0x490] sm:$0xf0] }
 0x49b   :  { %6195 = vmatpush.bf16.msra.mxu1 %v9422_v33  ;;  %6157 = vmatpush.bf16.msrb.mxu2 %v8722_v1  ;;  %v10008_v33 = vld [vmem:[#allocation4 + $0x714] sm:$0xf]  ;;  %v10183_v1 = vld [vmem:[#allocation4 + $0xc8c] sm:$0xf] }
 0x49c   :  { %6170 = vmatpush.bf16.msrb.mxu3 %v8946_v60  ;;  %v10064_v60 = vld [vmem:[#allocation4 + $0x8d4] sm:$0xf]  ;;  %v9282_v20 = vor.u32 %v10183_v1, %v9279_v63  ;;  %v8582_v18 = vor.u32 %v10008_v33, %v8579_v10  ;;  %v8277_v33 = vld [vmem:[#allocation4 + $0x4b0] sm:$0xf]  ;;  %v9991_v63 = vld [vmem:[#allocation4 + $0x688] sm:$0xf0] }
 0x49d   :  { %6183 = vmatpush.bf16.msra.mxu0 %v9170_v0  ;;  %v9058_v0 = vor.u32 %v10127_v46, %v9055_v52  ;;  %v8806_v28 = vor.u32 %v10064_v60, %v8803_v55  ;;  %v5906_v34 = vpop.f32.mrf.mxu2  ;;  %v9879_v46 = vld [vmem:[#allocation4 + $0x308] sm:$0xf0]  ;;  %v5905_v52 = vadd.f32 %v10828_v5, %v3268_v14  ;;  %v8501_v1 = vld [vmem:[#allocation4 + $0x670] sm:$0xf]  ;;  %v7801_v60 = vld [vmem:[#allocation4 + $0xf8] sm:$0xf] }
 0x49e   :  { %v9816_v55 = vld [vmem:[#allocation4 + $0x110] sm:$0xf0]  ;;  %v8025_v5 = vld [vmem:[#allocation4 + $0x2b8] sm:$0xf]  ;;  %v9802_v34 = vld [vmem:[#allocation4 + $0xa0] sm:$0xf0] }
 0x49f   :  { %6196 = vmatpush.bf16.msra.mxu1 %v9394_v17  ;;  %6158 = vmatpush.bf16.msrb.mxu2 %v8694_v45  ;;  %v9893_v17 = vld [vmem:[#allocation4 + $0x378] sm:$0xf0]  ;;  %v10120_v45 = vld [vmem:[#allocation4 + $0xa94] sm:$0xf] }
 0x4a0   :  { %6171 = vmatpush.bf16.msrb.mxu3 %v8918_v25  ;;  %v5945_v25 = vpop.f32.mrf.mxu1  ;;  %v9030_v2 = vor.u32 %v10120_v45, %v9027_v21  ;;  %v8473_v45 = vld [vmem:[#allocation4 + $0x638] sm:$0xf]  ;;  %v9984_v21 = vld [vmem:[#allocation4 + $0x650] sm:$0xf0] }
 0x4a1   :  { %6184 = vmatpush.bf16.msra.mxu0 %v9142_v23  ;;  %v10176_v23 = vld [vmem:[#allocation4 + $0xc54] sm:$0xf]  ;;  %v7773_v25 = vld [vmem:[#allocation4 + $0xc0] sm:$0xf] }
 0x4a3   :  { %6197 = vmatpush.bf16.msra.mxu1 %v9366_v29  ;;  %6159 = vmatpush.bf16.msrb.mxu2 %v8666_v30  ;;  %v7886_v29 = vor.u32 %v9837_v15, %v7885_v61  ;;  %v8110_v30 = vor.u32 %v9893_v17, %v8109_v16  ;;  %v5918_v15 = vadd.f32 %v10830_v8, %v5905_v52  ;;  %v8249_v17 = vld [vmem:[#allocation4 + $0x478] sm:$0xf]  ;;  %v8221_v8 = vld [vmem:[#allocation4 + $0x440] sm:$0xf] }
 0x4a4   :  { %6172 = vmatpush.bf16.msrb.mxu3 %v8890_v32  ;;  %v9830_v32 = vld [vmem:[#allocation4 + $0x180] sm:$0xf0]  ;;  %v8502_v16 = vor.u32 %v9991_v63, %v8501_v1  ;;  %v8250_v26 = vor.u32 %v9928_v19, %v8249_v17  ;;  %v9788_v63 = vld [vmem:[#allocation4 + $0x30] sm:$0xf0]  ;;  %v10061_v17 = vld [vmem:[#allocation4 + $0x8b8] sm:$0xf0] }
 0x4a5   :  { %6185 = vmatpush.bf16.msra.mxu0 %v9114_v36  ;;  %v9254_v36 = vor.u32 %v10176_v23, %v9251_v27  ;;  %v7858_v56 = vor.u32 %v9830_v32, %v7857_v7  ;;  %v7997_v23 = vld [vmem:[#allocation4 + $0x280] sm:$0xf]  ;;  %v9865_v27 = vld [vmem:[#allocation4 + $0x298] sm:$0xf0]  ;;  %v7745_v32 = vld [vmem:[#allocation4 + $0x88] sm:$0xf] }
 0x4a6   :  { %v7998_v7 = vor.u32 %v9865_v27, %v7997_v23  ;;  %v7746_v14 = vor.u32 %v9802_v34, %v7745_v32  ;;  %v9005_v19 = vld [vmem:[#allocation4 + $0xa60] sm:$0xf] }
 0x4a7   :  { %6198 = vmatpush.bf16.msra.mxu1 %v9338_v41  ;;  %6160 = vmatpush.bf16.msrb.mxu2 %v8638_v57  ;;  %v5919_v41 = vpop.f32.mrf.mxu3  ;;  %v9942_v57 = vld [vmem:[#allocation4 + $0x500] sm:$0xf0] }
 0x4a8   :  { %6173 = vmatpush.bf16.msrb.mxu3 %v8862_v49  ;;  %v8529_v49 = vld [vmem:[#allocation4 + $0x6a8] sm:$0xf]  ;;  %v8306_v4 = vor.u32 %v9942_v57, %v8305_v42  ;;  %v9914_v42 = vld [vmem:[#allocation4 + $0x420] sm:$0xf0] }
 0x4a9   :  { %6186 = vmatpush.bf16.msra.mxu0 %v9086_v62  ;;  %v7829_v62 = vld [vmem:[#allocation4 + $0x130] sm:$0xf]  ;;  %v8530_v43 = vor.u32 %v9998_v54, %v8529_v49  ;;  %v9970_v49 = vld [vmem:[#allocation4 + $0x5e0] sm:$0xf0] }
 0x4aa   :  { %v7830_v10 = vor.u32 %v9823_v31, %v7829_v62  ;;  %v9795_v62 = vld [vmem:[#allocation4 + $0x68] sm:$0xf0] }
 0x4ab   :  { %6199 = vmatpush.bf16.msra.mxu1 %v9310_v51  ;;  %6161 = vmatpush.bf16.msrb.mxu2 %v8610_v9  ;;  %v8053_v51 = vld [vmem:[#allocation4 + $0x2f0] sm:$0xf]  ;;  %v9935_v9 = vld [vmem:[#allocation4 + $0x4c8] sm:$0xf0] }
 0x4ac   :  { %6174 = vmatpush.bf16.msrb.mxu3 %v8834_v12  ;;  %v8054_v12 = vor.u32 %v9879_v46, %v8053_v51  ;;  %v8278_v61 = vor.u32 %v9935_v9, %v8277_v33  ;;  %v7941_v51 = vld [vmem:[#allocation4 + $0x210] sm:$0xf]  ;;  %v9851_v46 = vld [vmem:[#allocation4 + $0x228] sm:$0xf0] }
 0x4ad   :  { %6187 = vmatpush.bf16.msra.mxu0 %v9058_v0  ;;  %v9872_v0 = vld [vmem:[#allocation4 + $0x2d0] sm:$0xf0]  ;;  %v8165_v33 = vld [vmem:[#allocation4 + $0x3d0] sm:$0xf]  ;;  %v9907_v9 = vld [vmem:[#allocation4 + $0x3e8] sm:$0xf0] }
 0x4ae   :  { %v8026_v22 = vor.u32 %v9872_v0, %v8025_v5  ;;  %v7913_v5 = vld [vmem:[#allocation4 + $0x1d8] sm:$0xf]  ;;  %v9844_v0 = vld [vmem:[#allocation4 + $0x1f0] sm:$0xf0] }
 0x4af   :  { %6200 = vmatpush.bf16.msra.mxu1 %v9282_v20  ;;  %6162 = vmatpush.bf16.msrb.mxu2 %v8582_v18  ;;  %v7802_v20 = vor.u32 %v9816_v55, %v7801_v60  ;;  %v9809_v18 = vld [vmem:[#allocation4 + $0xd8] sm:$0xf0]  ;;  %v9963_v60 = vld [vmem:[#allocation4 + $0x5a8] sm:$0xf0]  ;;  %v7942_v55 = vor.u32 %v9851_v46, %v7941_v51  ;;  %v8949_v46 = vld [vmem:[#allocation4 + $0x9f0] sm:$0xf] }
 0x4b0   :  { %6175 = vmatpush.bf16.msrb.mxu3 %v8806_v28  ;;  %v5931_v28 = vadd.f32 %v10824_v39, %v5918_v15  ;;  %v7774_v24 = vor.u32 %v9809_v18, %v7773_v25  ;;  %v8781_v15 = vld [vmem:[#allocation4 + $0x8a0] sm:$0xf]  ;;  %v8137_v25 = vld [vmem:[#allocation4 + $0x398] sm:$0xf]  ;;  %v9900_v18 = vld [vmem:[#allocation4 + $0x3b0] sm:$0xf0] }
 0x4b1   :  { %6188 = vmatpush.bf16.msra.mxu0 %v9030_v2  ;;  %v9977_v2 = vld [vmem:[#allocation4 + $0x618] sm:$0xf0]  ;;  %v5982_v38 = vpop.f32.mrf.mxu0  ;;  %v8138_v34 = vor.u32 %v9900_v18, %v8137_v25 }
 0x4b2   :  { %6163 = vmatmul.bf16.vlgmr.msrb.gmra.mxu2 %v10727_v48  ;;  %v5944_v41 = vadd.f32 %v10826_v47, %v5931_v28  ;;  %v10173_v28 = vld [vmem:[#allocation4 + $0xc38] sm:$0xf0] }
 0x4b3   :  { %6207 = vmatpush.bf16.msra.mxu2 %v7886_v29  ;;  %6201 = vmatpush.bf16.msra.mxu1 %v9254_v36  ;;  %v8474_v29 = vor.u32 %v9984_v21, %v8473_v45  ;;  %v7969_v36 = vld [vmem:[#allocation4 + $0x248] sm:$0xf]  ;;  %v5995_v57 = vpop.f32.mrf.mxu1  ;;  %v10089_v25 = vld [vmem:[#allocation4 + $0x998] sm:$0xf0] }
 0x4b4   :  { %6220 = vmatpush.bf16.msra.mxu3 %v8110_v30  ;;  %6189 = vmatmul.bf16.vlgmr.msra.gmra.mxu0 %v10735_v58  ;;  %v8445_v30 = vld [vmem:[#allocation4 + $0x600] sm:$0xf]  ;;  %v7970_v54 = vor.u32 %v9858_v37, %v7969_v36  ;;  %v10054_v36 = vld [vmem:[#allocation4 + $0x880] sm:$0xf0] }
 0x4b5   :  { %6233 = vmatpush.bf16.msrb.mxu0 %v8334_v35  ;;  %6176 = vmatmul.bf16.vlgmr.msrb.gmra.mxu3 %v10731_v53  ;;  %v8222_v35 = vor.u32 %v9921_v50, %v8221_v8  ;;  %v8446_v39 = vor.u32 %v9977_v2, %v8445_v30  ;;  %v9956_v8 = vld [vmem:[#allocation4 + $0x570] sm:$0xf0]  ;;  %v7914_v50 = vor.u32 %v9844_v0, %v7913_v5  ;;  %v9453_v2 = vld [vmem:[#allocation4 + $0xde0] sm:$0xf] }
 0x4b6   :  { %6202 = vmatmul.bf16.vlgmr.msra.gmra.mxu1 %v10739_v3  ;;  %v8782_v30 = vor.u32 %v10061_v17, %v8781_v15  ;;  %v10096_v5 = vld [vmem:[#allocation4 + $0x9d0] sm:$0xf0]  ;;  %v9145_v15 = vld [vmem:[#allocation4 + $0xb78] sm:$0xf] }
 0x4b7   :  { %6246 = vmatpush.bf16.msrb.mxu1 %v8558_v40  ;;  %6208 = vmatpush.bf16.msra.mxu2 %v7858_v56  ;;  %v8193_v40 = vld [vmem:[#allocation4 + $0x408] sm:$0xf]  ;;  %v9369_v17 = vld [vmem:[#allocation4 + $0xd38] sm:$0xf] }
 0x4b8   :  { %6221 = vmatpush.bf16.msra.mxu3 %v8082_v59  ;;  %v8417_v56 = vld [vmem:[#allocation4 + $0x5c8] sm:$0xf]  ;;  %v7717_v59 = vld [vmem:[#allocation4 + $0x50] sm:$0xf]  ;;  %v8194_v31 = vor.u32 %v9914_v42, %v8193_v40  ;;  %v10110_v40 = vld [vmem:[#allocation4 + $0xa40] sm:$0xf0] }
 0x4b9   :  { %6234 = vmatpush.bf16.msrb.mxu0 %v8306_v4  ;;  %v5956_v4 = vpop.f32.mrf.mxu2  ;;  %v8418_v52 = vor.u32 %v9970_v49, %v8417_v56  ;;  %v7718_v1 = vor.u32 %v9795_v62, %v7717_v59  ;;  %v5984_v45 = vpop.f32.mrf.mxu0  ;;  %v9201_v56 = vld [vmem:[#allocation4 + $0xbe8] sm:$0xf]  ;;  %v10222_v59 = vld [vmem:[#allocation4 + $0xdc0] sm:$0xf0] }
 0x4ba   :  { %v5957_v47 = vadd.f32 %v5956_v4, %v5944_v41  ;;  %v10047_v4 = vld [vmem:[#allocation4 + $0x848] sm:$0xf0]  ;;  %v8669_v45 = vld [vmem:[#allocation4 + $0x7c0] sm:$0xf] }
 0x4bb   :  { %6247 = vmatpush.bf16.msrb.mxu1 %v8530_v43  ;;  %6209 = vmatpush.bf16.msra.mxu2 %v7830_v10  ;;  %v5969_v43 = vpop.f32.mrf.mxu3  ;;  %v7689_v10 = vld [vmem:[#allocation4 + $0x18] sm:$0xf]  ;;  %v5997_v23 = vpop.f32.mrf.mxu1 }
 0x4bc   :  { %6222 = vmatpush.bf16.msra.mxu3 %v8054_v12  ;;  %v8389_v12 = vld [vmem:[#allocation4 + $0x590] sm:$0xf]  ;;  %v7690_v27 = vor.u32 %v9788_v63, %v7689_v10  ;;  %v10215_v63 = vld [vmem:[#allocation4 + $0xd88] sm:$0xf0] }
 0x4bd   :  { %6235 = vmatpush.bf16.msrb.mxu0 %v8278_v61  ;;  %v5970_v61 = vadd.f32 %v5969_v43, %v5957_v47  ;;  %v10103_v47 = vld [vmem:[#allocation4 + $0xa08] sm:$0xf0]  ;;  %v9173_v43 = vld [vmem:[#allocation4 + $0xbb0] sm:$0xf] }
 0x4bf   :  { %6248 = vmatpush.bf16.msrb.mxu1 %v8502_v16  ;;  %6210 = vmatpush.bf16.msra.mxu2 %v7802_v20  ;;  %v8166_v16 = vor.u32 %v9907_v9, %v8165_v33  ;;  %v10117_v20 = vld [vmem:[#allocation4 + $0xa78] sm:$0xf0]  ;;  %v5983_v21 = vadd.f32 %v5982_v38, %v5970_v61  ;;  %v10159_v33 = vld [vmem:[#allocation4 + $0xbc8] sm:$0xf0] }
 0x4c0   :  { %6223 = vmatpush.bf16.msra.mxu3 %v8026_v22  ;;  %v8390_v22 = vor.u32 %v9963_v60, %v8389_v12  ;;  %v9006_v32 = vor.u32 %v10117_v20, %v9005_v19  ;;  %v8950_v12 = vor.u32 %v10103_v47, %v8949_v46  ;;  %v8697_v60 = vld [vmem:[#allocation4 + $0x7f8] sm:$0xf]  ;;  %v9174_v61 = vor.u32 %v10159_v33, %v9173_v43  ;;  %v10208_v19 = vld [vmem:[#allocation4 + $0xd50] sm:$0xf0]  ;;  %v10187_v46 = vld [vmem:[#allocation4 + $0xca8] sm:$0xf0] }
 0x4c1   :  { %6236 = vmatpush.bf16.msrb.mxu0 %v8250_v26  ;;  %v9229_v26 = vld [vmem:[#allocation4 + $0xc20] sm:$0xf]  ;;  %v5958_v37 = vpop.f32.mrf.mxu2  ;;  %v9370_v18 = vor.u32 %v10208_v19, %v9369_v17  ;;  %v10012_v43 = vld [vmem:[#allocation4 + $0x730] sm:$0xf0] }
 0x4c2   :  { %v9230_v38 = vor.u32 %v10173_v28, %v9229_v26  ;;  %v9117_v26 = vld [vmem:[#allocation4 + $0xb40] sm:$0xf]  ;;  %v10201_v28 = vld [vmem:[#allocation4 + $0xd18] sm:$0xf0] }
 0x4c3   :  { %6249 = vmatpush.bf16.msrb.mxu1 %v8474_v29  ;;  %6211 = vmatpush.bf16.msra.mxu2 %v7774_v24  ;;  %v8361_v29 = vld [vmem:[#allocation4 + $0x558] sm:$0xf]  ;;  %v5996_v24 = vadd.f32 %v5995_v57, %v5983_v21  ;;  %v5971_v42 = vpop.f32.mrf.mxu3  ;;  %v10166_v57 = vld [vmem:[#allocation4 + $0xc00] sm:$0xf0]  ;;  %v10033_v21 = vld [vmem:[#allocation4 + $0x7d8] sm:$0xf0] }
 0x4c4   :  { %6224 = vmatpush.bf16.msra.mxu3 %v7998_v7  ;;  %v10229_v7 = vld [vmem:[#allocation4 + $0xdf8] sm:$0xf0]  ;;  %v8362_v41 = vor.u32 %v9956_v8, %v8361_v29  ;;  %v9202_v51 = vor.u32 %v10166_v57, %v9201_v56  ;;  %v8670_v23 = vor.u32 %v10033_v21, %v8669_v45  ;;  %v8641_v8 = vld [vmem:[#allocation4 + $0x788] sm:$0xf]  ;;  %v10019_v42 = vld [vmem:[#allocation4 + $0x768] sm:$0xf0] }
 0x4c5   :  { %6237 = vmatpush.bf16.msrb.mxu0 %v8222_v35  ;;  %v8753_v35 = vld [vmem:[#allocation4 + $0x868] sm:$0xf]  ;;  %10248 = vtanh.f32 %v5996_v24  ;;  %v8837_v56 = vld [vmem:[#allocation4 + $0x910] sm:$0xf]  ;;  %v10075_v57 = vld [vmem:[#allocation4 + $0x928] sm:$0xf0] }
 0x4c6   :  { %v8754_v49 = vor.u32 %v10054_v36, %v8753_v35  ;;  %v10138_v35 = vld [vmem:[#allocation4 + $0xb20] sm:$0xf0]  ;;  %v8838_v47 = vor.u32 %v10075_v57, %v8837_v56  ;;  %v10849_v19 = vld [vmem:[#allocation15] sm:$0xff] }
 0x4c7   :  { %6250 = vmatpush.bf16.msrb.mxu1 %v8446_v39  ;;  %6212 = vmatpush.bf16.msra.mxu2 %v7746_v14  ;;  %v8977_v39 = vld [vmem:[#allocation4 + $0xa28] sm:$0xf]  ;;  %v9454_v14 = vor.u32 %v10229_v7, %v9453_v2  ;;  %v10082_v2 = vld [vmem:[#allocation4 + $0x960] sm:$0xf0] }
 0x4c8   :  { %6225 = vmatpush.bf16.msra.mxu3 %v7970_v54  ;;  %v9425_v54 = vld [vmem:[#allocation4 + $0xda8] sm:$0xf]  ;;  %v8978_v62 = vor.u32 %v10110_v40, %v8977_v39  ;;  %v8613_v40 = vld [vmem:[#allocation4 + $0x750] sm:$0xf] }
 0x4c9   :  { %6238 = vmatpush.bf16.msrb.mxu0 %v8194_v31  ;;  %v8725_v31 = vld [vmem:[#allocation4 + $0x830] sm:$0xf] }
 0x4ca   :  { %v8726_v10 = vor.u32 %v10047_v4, %v8725_v31  ;;  %v8614_v4 = vor.u32 %v10019_v42, %v8613_v40 }
 0x4cb   :  { %6251 = vmatpush.bf16.msrb.mxu1 %v8418_v52  ;;  %6213 = vmatpush.bf16.msra.mxu2 %v7718_v1  ;;  %v9426_v52 = vor.u32 %v10222_v59, %v9425_v54  ;;  %v10249_v9 = vpop.eup %10248  ;;  %v9397_v1 = vld [vmem:[#allocation4 + $0xd70] sm:$0xf] }
 0x4cc   :  { %6226 = vmatpush.bf16.msra.mxu3 %v7942_v55  ;;  %6321 = vst [vmem:[#allocation17 + $0x18] sm:$0xff] %v10249_v9  ;;  %v10040_v55 = vld [vmem:[#allocation4 + $0x810] sm:$0xf0]  ;;  %v9398_v0 = vor.u32 %v10215_v63, %v9397_v1  ;;  %v9061_v59 = vld [vmem:[#allocation4 + $0xad0] sm:$0xf] }
 0x4cd   :  { %6239 = vmatpush.bf16.msrb.mxu0 %v8166_v16  ;;  %v10152_v16 = vld [vmem:[#allocation4 + $0xb90] sm:$0xf0]  ;;  %v8809_v9 = vld [vmem:[#allocation4 + $0x8d8] sm:$0xf] }
 0x4cf   :  { %6252 = vmatpush.bf16.msrb.mxu1 %v8390_v22  ;;  %6214 = vmatpush.bf16.msra.mxu2 %v7690_v27  ;;  %v8893_v22 = vld [vmem:[#allocation4 + $0x980] sm:$0xf] }
 0x4d0   :  { %6227 = vmatpush.bf16.msra.mxu3 %v7914_v50  ;;  %v9341_v27 = vld [vmem:[#allocation4 + $0xd00] sm:$0xf]  ;;  %v8894_v29 = vor.u32 %v10089_v25, %v8893_v22  ;;  %v10026_v50 = vld [vmem:[#allocation4 + $0x7a0] sm:$0xf0] }
 0x4d1   :  { %6240 = vmatpush.bf16.msrb.mxu0 %v8138_v34  ;;  %v10845_v7 = vpop.f32.mrf.mxu0  ;;  %v9089_v34 = vld [vmem:[#allocation4 + $0xb08] sm:$0xf]  ;;  %v8642_v37 = vor.u32 %v10026_v50, %v8641_v8 }
 0x4d2   :  { %6215 = vmatmul.bf16.vlgmr.msra.gmra.mxu2 %v10707_v6  ;;  %v8921_v6 = vld [vmem:[#allocation4 + $0x9b8] sm:$0xf] }
 0x4d3   :  { %6259 = vmatpush.bf16.msrb.mxu2 %v8782_v30  ;;  %6253 = vmatpush.bf16.msrb.mxu1 %v8362_v41  ;;  %v8922_v20 = vor.u32 %v10096_v5, %v8921_v6  ;;  %v8865_v30 = vld [vmem:[#allocation4 + $0x948] sm:$0xf]  ;;  %v10847_v36 = vpop.f32.mrf.mxu1  ;;  %v10194_v41 = vld [vmem:[#allocation4 + $0xce0] sm:$0xf0]  ;;  %v9257_v6 = vld [vmem:[#allocation4 + $0xc58] sm:$0xf] }
 0x4d4   :  { %6272 = vmatpush.bf16.msrb.mxu3 %v9006_v32  ;;  %6241 = vmatmul.bf16.vlgmr.msrb.gmra.mxu0 %v10715_v11  ;;  %v9146_v11 = vor.u32 %v10152_v16, %v9145_v15  ;;  %v9342_v32 = vor.u32 %v10201_v28, %v9341_v27  ;;  %v8866_v39 = vor.u32 %v10082_v2, %v8865_v30  ;;  %v10180_v5 = vld [vmem:[#allocation4 + $0xc70] sm:$0xf0] }
 0x4d5   :  { %6285 = vmatpush.bf16.msra.mxu0 %v9230_v38  ;;  %6228 = vmatmul.bf16.vlgmr.msra.gmra.mxu3 %v10711_v44  ;;  %v8698_v44 = vor.u32 %v10040_v55, %v8697_v60  ;;  %v9313_v38 = vld [vmem:[#allocation4 + $0xcc8] sm:$0xf]  ;;  %v10124_v60 = vld [vmem:[#allocation4 + $0xab0] sm:$0xf0] }
 0x4d6   :  { %6254 = vmatmul.bf16.vlgmr.msrb.gmra.mxu1 %v10719_v13  ;;  %v10145_v13 = vld [vmem:[#allocation4 + $0xb58] sm:$0xf0]  ;;  %v9314_v54 = vor.u32 %v10194_v41, %v9313_v38 }
 0x4d7   :  { %6298 = vmatpush.bf16.msra.mxu1 %v9454_v14  ;;  %6260 = vmatpush.bf16.msrb.mxu2 %v8754_v49  ;;  %v9118_v24 = vor.u32 %v10145_v13, %v9117_v26  ;;  %v9090_v14 = vor.u32 %v10138_v35, %v9089_v34  ;;  %v6008_v49 = vpop.f32.mrf.mxu2 }
 0x4d8   :  { %6273 = vmatpush.bf16.msrb.mxu3 %v8978_v62  ;;  %v10131_v62 = vld [vmem:[#allocation4 + $0xae8] sm:$0xf0]  ;;  %v6021_v31 = vpop.f32.mrf.mxu3 }
 0x4d9   :  { %6286 = vmatpush.bf16.msra.mxu0 %v9202_v51  ;;  %v9285_v51 = vld [vmem:[#allocation4 + $0xc90] sm:$0xf]  ;;  %v9062_v33 = vor.u32 %v10131_v62, %v9061_v59  ;;  %v6036_v1 = vpop.f32.mrf.mxu0 }
 0x4da   :  { %v9286_v63 = vor.u32 %v10187_v46, %v9285_v51 }
 0x4db   :  { %6299 = vmatpush.bf16.msra.mxu1 %v9426_v52  ;;  %6261 = vmatpush.bf16.msrb.mxu2 %v8726_v10  ;;  %v8585_v52 = vld [vmem:[#allocation4 + $0x718] sm:$0xf]  ;;  %v10068_v10 = vld [vmem:[#allocation4 + $0x8f0] sm:$0xf0]  ;;  %v6049_v55 = vpop.f32.mrf.mxu1 }
 0x4dc   :  { %6274 = vmatpush.bf16.msrb.mxu3 %v8950_v12  ;;  %v9033_v12 = vld [vmem:[#allocation4 + $0xa98] sm:$0xf] }
 0x4dd   :  { %6287 = vmatpush.bf16.msra.mxu0 %v9174_v61  ;;  %v8586_v61 = vor.u32 %v10012_v43, %v8585_v52  ;;  %v9034_v15 = vor.u32 %v10124_v60, %v9033_v12  ;;  %v3271_v12 = vperm.slane %v10849_v19, 6 }
 0x4df   :  { %6300 = vmatpush.bf16.msra.mxu1 %v9398_v0  ;;  %6262 = vmatpush.bf16.msrb.mxu2 %v8698_v44  ;;  %v8810_v0 = vor.u32 %v10068_v10, %v8809_v9  ;;  %v6010_v16 = vpop.f32.mrf.mxu2  ;;  %v9258_v44 = vor.u32 %v10180_v5, %v9257_v6 }
 0x4e0   :  { %6275 = vmatpush.bf16.msrb.mxu3 %v8922_v20  ;;  %v6023_v17 = vpop.f32.mrf.mxu3  ;;  %v3269_v20 = vperm.slane %v10849_v19, 4 }
 0x4e1   :  { %6288 = vmatpush.bf16.msra.mxu0 %v9146_v11 }
 0x4e2   :  { %v6009_v45 = vadd.f32 %v6008_v49, %v3269_v20 }
 0x4e3   :  { %6301 = vmatpush.bf16.msra.mxu1 %v9370_v18  ;;  %6263 = vmatpush.bf16.msrb.mxu2 %v8670_v23 }
 0x4e4   :  { %6276 = vmatpush.bf16.msrb.mxu3 %v8894_v29  ;;  %v6022_v21 = vadd.f32 %v6021_v31, %v6009_v45 }
 0x4e5   :  { %6289 = vmatpush.bf16.msra.mxu0 %v9118_v24 }
 0x4e6   :  { %v6035_v11 = vadd.f32 %v10845_v7, %v6022_v21 }
 0x4e7   :  { %6302 = vmatpush.bf16.msra.mxu1 %v9342_v32  ;;  %6264 = vmatpush.bf16.msrb.mxu2 %v8642_v37 }
 0x4e8   :  { %6277 = vmatpush.bf16.msrb.mxu3 %v8866_v39  ;;  %v6048_v25 = vadd.f32 %v10847_v36, %v6035_v11  ;;  %v3270_v36 = vperm.slane %v10849_v19, 5 }
 0x4e9   :  { %6290 = vmatpush.bf16.msra.mxu0 %v9090_v14 }
 0x4eb   :  { %6303 = vmatpush.bf16.msra.mxu1 %v9314_v54  ;;  %6265 = vmatpush.bf16.msrb.mxu2 %v8614_v4 }
 0x4ec   :  { %6278 = vmatpush.bf16.msrb.mxu3 %v8838_v47 }
 0x4ed   :  { %6291 = vmatpush.bf16.msra.mxu0 %v9062_v33 }
 0x4ef   :  { %6304 = vmatpush.bf16.msra.mxu1 %v9286_v63  ;;  %6266 = vmatpush.bf16.msrb.mxu2 %v8586_v61 }
 0x4f0   :  { %6279 = vmatpush.bf16.msrb.mxu3 %v8810_v0 }
 0x4f1   :  { %6292 = vmatpush.bf16.msra.mxu0 %v9034_v15  ;;  %v6086_v22 = vpop.f32.mrf.mxu0 }
 0x4f2   :  { %6267 = vmatmul.bf16.vlgmr.msrb.gmra.mxu2 %v10727_v48 }
 0x4f3   :  { %6305 = vmatpush.bf16.msra.mxu1 %v9258_v44  ;;  %6280 = vmatmul.bf16.vlgmr.msrb.gmra.mxu3 %v10731_v53  ;;  %v6099_v18 = vpop.f32.mrf.mxu1 }
 0x4f4   :  { %6293 = vmatmul.bf16.vlgmr.msra.gmra.mxu0 %v10735_v58 }
 0x4f5   :  { %v6060_v26 = vpop.f32.mrf.mxu2 }
 0x4f6   :  { %6306 = vmatmul.bf16.vlgmr.msra.gmra.mxu1 %v10739_v3  ;;  %v6061_v13 = vadd.f32 %v6060_v26, %v6048_v25 }
 0x4f8   :  { %v6073_v23 = vpop.f32.mrf.mxu3 }
 0x4f9   :  { %v6074_v27 = vadd.f32 %v6073_v23, %v6061_v13  ;;  %v6088_v48 = vpop.f32.mrf.mxu0 }
 0x4fb   :  { %v6087_v28 = vadd.f32 %v6086_v22, %v6074_v27  ;;  %v6101_v29 = vpop.f32.mrf.mxu1 }
 0x4fd   :  { %v6100_v53 = vadd.f32 %v6099_v18, %v6087_v28  ;;  %v6062_v8 = vpop.f32.mrf.mxu2 }
 0x4ff   :  { %10250 = vtanh.f32 %v6100_v53 }
 0x500   :  { %v6075_v58 = vpop.f32.mrf.mxu3 }
 0x505   :  { %v10251_v50 = vpop.eup %10250 }
 0x506   :  { %6322 = vst [vmem:[#allocation17 + $0x20] sm:$0xff] %v10251_v50 }
 0x511   :  { %v6138_v3 = vpop.f32.mrf.mxu0 }
 0x513   :  { %v6151_v24 = vpop.f32.mrf.mxu1 }
 0x515   :  { %v6112_v30 = vpop.f32.mrf.mxu2 }
 0x516   :  { %v6113_v37 = vadd.f32 %v6112_v30, %v3270_v36 }
 0x518   :  { %v6125_v2 = vpop.f32.mrf.mxu3 }
 0x519   :  { %v6140_v7 = vpop.f32.mrf.mxu0  ;;  %v6126_v38 = vadd.f32 %v6125_v2, %v6113_v37 }
 0x51b   :  { %v6153_v32 = vpop.f32.mrf.mxu1  ;;  %v6139_v41 = vadd.f32 %v6138_v3, %v6126_v38 }
 0x51d   :  { %v6114_v34 = vpop.f32.mrf.mxu2  ;;  %v6152_v40 = vadd.f32 %v6151_v24, %v6139_v41 }
 0x520   :  { %v6127_v35 = vpop.f32.mrf.mxu3 }
 0x531   :  { %v6190_v39 = vpop.f32.mrf.mxu0 }
 0x533   :  { %v6203_v42 = vpop.f32.mrf.mxu1 }
 0x535   :  { %v6164_v14 = vpop.f32.mrf.mxu2 }
 0x536   :  { %v6165_v56 = vadd.f32 %v6164_v14, %v6152_v40 }
 0x538   :  { %v6177_v57 = vpop.f32.mrf.mxu3 }
 0x539   :  { %v6178_v49 = vadd.f32 %v6177_v57, %v6165_v56  ;;  %v6192_v54 = vpop.f32.mrf.mxu0 }
 0x53b   :  { %v6191_v59 = vadd.f32 %v6190_v39, %v6178_v49  ;;  %v6205_v62 = vpop.f32.mrf.mxu1 }
 0x53d   :  { %v6204_v31 = vadd.f32 %v6203_v42, %v6191_v59  ;;  %v6166_v4 = vpop.f32.mrf.mxu2 }
 0x53f   :  { %10252 = vtanh.f32 %v6204_v31 }
 0x540   :  { %v6179_v51 = vpop.f32.mrf.mxu3 }
 0x545   :  { %v10253_v46 = vpop.eup %10252 }
 0x546   :  { %6323 = vst [vmem:[#allocation17 + $0x28] sm:$0xff] %v10253_v46 }
 0x551   :  { %v6242_v47 = vpop.f32.mrf.mxu0 }
 0x553   :  { %v6255_v52 = vpop.f32.mrf.mxu1 }
 0x555   :  { %v6216_v43 = vpop.f32.mrf.mxu2 }
 0x556   :  { %v6217_v60 = vadd.f32 %v6216_v43, %v3271_v12 }
 0x558   :  { %v6229_v33 = vpop.f32.mrf.mxu3 }
 0x559   :  { %v6244_v9 = vpop.f32.mrf.mxu0  ;;  %v6230_v55 = vadd.f32 %v6229_v33, %v6217_v60 }
 0x55b   :  { %v6257_v10 = vpop.f32.mrf.mxu1  ;;  %v6243_v61 = vadd.f32 %v6242_v47, %v6230_v55 }
 0x55d   :  { %v6218_v1 = vpop.f32.mrf.mxu2  ;;  %v6256_v0 = vadd.f32 %v6255_v52, %v6243_v61 }
 0x560   :  { %v6231_v63 = vpop.f32.mrf.mxu3 }
 0x571   :  { %v6294_v6 = vpop.f32.mrf.mxu0 }
 0x573   :  { %v6307_v5 = vpop.f32.mrf.mxu1 }
 0x575   :  { %v6268_v15 = vpop.f32.mrf.mxu2 }
 0x576   :  { %v6269_v16 = vadd.f32 %v6268_v15, %v6256_v0  ;;  %v6281_v44 = vpop.f32.mrf.mxu3 }
 0x578   :  { %v6282_v17 = vadd.f32 %v6281_v44, %v6269_v16 }
 0x579   :  { %v6296_v20 = vpop.f32.mrf.mxu0 }
 0x57a   :  { %v6295_v45 = vadd.f32 %v6294_v6, %v6282_v17 }
 0x57b   :  { %v6309_v21 = vpop.f32.mrf.mxu1 }
 0x57c   :  { %v6308_v11 = vadd.f32 %v6307_v5, %v6295_v45 }
 0x57d   :  { %v6270_v22 = vpop.f32.mrf.mxu2 }
 0x57e   :  { %10254 = vtanh.f32 %v6308_v11  ;;  %v6283_v25 = vpop.f32.mrf.mxu3 }
 0x584   :  { %v10255_v19 = vpop.eup %10254 }
 0x585   :  { %6324 = vst [vmem:[#allocation17 + $0x30] sm:$0xff] %v10255_v19 }
 0x586   :  { %6335 = dma.vmem_to_hbm [thread:$0]  %s6331_s7, 896, %s6333_s28, [#allocation8]  }
 0x587   :  { %10512 = dma.done.wait [#allocation8], 896  }
 0x588   :  { %10513 = vsyncadd [#allocation8], 4294966400 }
 0x589   :  { %6340 = vsyncpa [#allocation7], 1 }
 0x58a   :  { %6341 = vsyncpa [#allocation10], 1 }
 0x58b   :  { %6342 = vsyncpa [#allocation13], 1 }
 0x58c   :  { %6343 = vsyncpa [#allocation16], 1 }
 0x58d   :  { %6344 = vsyncpa [#allocation8], 1 }
 0x58e   :  { %6345 = vsyncmov [#allocation5] }
 0x591   :  { %s6346_s29 = vpop.sfrf %6345 }
 0x592   :  { %p9455_p0 = scmp.ne.s32.totalorder %s6346_s29, 0 }
 0x594   :  { %6350 = shalt.err (%p9455_p0)  }
 0x595   :  { %6352 = vsyncmov [#allocation5 + $0x1] }
 0x598   :  { %s6353_s30 = vpop.sfrf %6352 }
 0x599   :  { %p9456_p1 = scmp.ne.s32.totalorder %s6353_s30, 0 }
 0x59b   :  { %6357 = shalt.err (%p9456_p1)  }
 0x59c   :  { %6359 = vsyncmov [#allocation5 + $0x2] }
 0x59f   :  { %s6360_s9 = vpop.sfrf %6359 }
 0x5a0   :  { %p9457_p2 = scmp.ne.s32.totalorder %s6360_s9, 0 }
 0x5a2   :  { %6364 = shalt.err (%p9457_p2)  }

</bundles_post_ra>
